<compile_context>
chip_gen: v7x
topology: tpu7x:2x2x1
jax: 0.10.0
libtpu: 0.0.40
codegen_flags: <defaults>
</compile_context>

<pallas_src>
import functools

import numpy as np
import jax
import jax.numpy as jnp
from jax.experimental import pallas as pl
from jax.experimental.pallas import tpu as pltpu


_MS_WEIGHTS = (0.0448, 0.2856, 0.3001, 0.2363, 0.1333)
# Levels whose spatial extent is <= this use the VPU shifted-MAC conv path
# instead of MXU band matmuls (tiny matmuls are pure latency).
_SMALL_LEVEL = 8


# ----------------------------------------------------------------------------
# Static (numpy) constructors for the per-level conv / pooling matrices
# ----------------------------------------------------------------------------
def _gaussian_np(k, sigma=1.5):
    xs = np.arange(k, dtype=np.float64)
    g = np.exp(-((xs - k // 2) ** 2) / (2.0 * sigma ** 2))
    return (g / g.sum()).astype(np.float32)


def _band_np(n, k, g):
    """(n-k+1, n) band matrix: row o holds the gaussian taps at cols o..o+k-1."""
    nout = n - k + 1
    m = np.zeros((nout, n), np.float32)
    for o in range(nout):
        m[o, o:o + k] = g
    return m


def _pool_np(n):
    """(n//2, n) matrix implementing 1-D average pooling (kernel 2, stride 2)."""
    nout = n // 2
    m = np.zeros((nout, n), np.float32)
    for o in range(nout):
        m[o, 2 * o] = 0.5
        m[o, 2 * o + 1] = 0.5
    return m


def _level_meta(H, W, window_size, n_levels):
    meta = []
    h, w = H, W
    for _ in range(n_levels):
        k = min(window_size, h, w)          # real_size of the reference
        meta.append(dict(
            h=h, w=w, k=k, hout=h - k + 1, wout=w - k + 1,
            use_mxu=max(h, w) > _SMALL_LEVEL,
            taps=tuple(float(t) for t in _gaussian_np(k))))
        h //= 2
        w //= 2
    return meta


# ----------------------------------------------------------------------------
# Kernel: one depthwise channel per grid program, full 5-level pyramid in VMEM
# ----------------------------------------------------------------------------
def _msssim_kernel(cc_ref, x1_ref, x2_ref, *refs, meta):
    n_levels = len(meta)
    n_mxu = sum(1 for m in meta if m["use_mxu"])
    gv_refs = refs[0:n_mxu]
    gh_refs = refs[n_mxu:2 * n_mxu]
    pv_refs = refs[2 * n_mxu:2 * n_mxu + (n_levels - 1)]
    ph_refs = refs[2 * n_mxu + (n_levels - 1):2 * n_mxu + 2 * (n_levels - 1)]
    out_ref = refs[-1]

    f32 = jnp.float32
    bf16 = jnp.bfloat16

    y1 = x1_ref[0].astype(f32)          # (H, W)
    y2 = x2_ref[0].astype(f32)

    # Mean-center this channel once.  sigma/cov are shift-invariant (window
    # weights sum to 1) and mu is recovered by adding c back, so this is
    # algebraically identical to the reference but numerically robust for the
    # conv(y^2) - conv(y)^2 cancellation (also protects the bf16 matmuls).
    c = (jnp.mean(y1) + jnp.mean(y2)) * 0.5
    y1 = y1 - c
    y2 = y2 - c

    ssim_sums = []
    cs_sums = []
    mxu_idx = 0
    for l, m in enumerate(meta):
        hout, wout = m["hout"], m["wout"]
        c1 = cc_ref[l:l + 1, 0:1]       # (1, 1)  (0.01 * L_l)^2
        c2 = cc_ref[l:l + 1, 1:2]       # (1, 1)  (0.03 * L_l)^2

        if m["use_mxu"]:
            gv = gv_refs[mxu_idx][...]  # (hout, h)  bf16 band matrix
            gh = gh_refs[mxu_idx][...]  # (w, wout)  bf16 band matrix
            mxu_idx += 1

            def gconv(a, gv=gv, gh=gh):
                t = jnp.dot(gv, a.astype(bf16), preferred_element_type=f32)
                return jnp.dot(t.astype(bf16), gh, preferred_element_type=f32)
        else:
            # Small level: separable conv as k shifted multiply-adds (VPU),
            # no MXU latency chain for sub-tile operands.
            taps = m["taps"]

            def gconv(a, taps=taps, hout=hout, wout=wout):
                k = len(taps)
                acc = taps[0] * a[0:hout, :]
                for t in range(1, k):
                    acc = acc + taps[t] * a[t:t + hout, :]
                out = taps[0] * acc[:, 0:wout]
                for t in range(1, k):
                    out = out + taps[t] * acc[:, t:t + wout]
                return out

        muy1 = gconv(y1)
        muy2 = gconv(y2)
        mu1 = muy1 + c
        mu2 = muy2 + c
        sigma1_sq = gconv(y1 * y1) - muy1 * muy1
        sigma2_sq = gconv(y2 * y2) - muy2 * muy2
        sigma12 = gconv(y1 * y2) - muy1 * muy2

        v1 = 2.0 * sigma12 + c2
        v2 = sigma1_sq + sigma2_sq + c2
        r2 = pl.reciprocal(v2)                      # one reciprocal, reused
        cs_map = v1 * r2
        lum = (2.0 * mu1 * mu2 + c1) / (mu1 * mu1 + mu2 * mu2 + c1)
        ssim_map = cs_map * lum

        ssim_sums.append(jnp.sum(ssim_map, keepdims=True))
        cs_sums.append(jnp.sum(cs_map, keepdims=True))

        if l + 1 < n_levels:                        # avg_pool2d(2, 2) in f32
            pv = pv_refs[l][...]                    # (h//2, h)
            ph = ph_refs[l][...]                    # (w, w//2)
            y1 = jnp.dot(jnp.dot(pv, y1, preferred_element_type=f32), ph,
                         preferred_element_type=f32)
            y2 = jnp.dot(jnp.dot(pv, y2, preferred_element_type=f32), ph,
                         preferred_element_type=f32)

    # Single lane-contiguous store of all per-level partial sums.
    out_ref[0] = jnp.concatenate(ssim_sums + cs_sums, axis=1)   # (1, 2*levels)


# ----------------------------------------------------------------------------
# Wrapper
# ----------------------------------------------------------------------------
@functools.partial(jax.jit, static_argnames=("window_size",))
def msssim_pallas(img1, img2, window_size=11):
    """MS-SSIM of two NCHW batches (size_average=True, normalize=False)."""
    B, C, H, W = img1.shape
    N = B * C
    n_levels = len(_MS_WEIGHTS)
    meta = _level_meta(H, W, window_size, n_levels)

    x1 = img1.astype(jnp.float32).reshape(N, H, W)
    x2 = img2.astype(jnp.float32).reshape(N, H, W)

    # Per-level dynamic-range constants (val_range=None branch), hoisted to the
    # wrapper so grid programs have no cross-channel max/min coupling.  Uses
    # the same iterated avg_pool(2,2) of img1 as the reference.
    cc_rows = []
    a = x1
    for l, m in enumerate(meta):
        mx, mn = jnp.max(a), jnp.min(a)
        big_l = (jnp.where(mx > 128.0, 255.0, 1.0)
                 - jnp.where(mn < -0.5, -1.0, 0.0))
        cc_rows.append(jnp.stack([(0.01 * big_l) ** 2, (0.03 * big_l) ** 2]))
        if l + 1 < n_levels:
            h, w = m["h"], m["w"]
            a = a[:, :2 * (h // 2), :2 * (w // 2)].reshape(
                N, h // 2, 2, w // 2, 2).mean(axis=(2, 4))
    cc = jnp.stack(cc_rows).astype(jnp.float32)          # (n_levels, 2)

    # Per-level separable conv / pool matrices.  Conv weights in bf16 for the
    # MXU; pooling kept f32 so the pyramid carry stays exact.
    gv, gh, pv, ph = [], [], [], []
    for l, m in enumerate(meta):
        if m["use_mxu"]:
            g = _gaussian_np(m["k"])
            gv.append(jnp.asarray(_band_np(m["h"], m["k"], g), jnp.bfloat16))
            gh.append(jnp.asarray(_band_np(m["w"], m["k"], g).T, jnp.bfloat16))
        if l + 1 < n_levels:
            pv.append(jnp.asarray(_pool_np(m["h"]), jnp.float32))
            ph.append(jnp.asarray(_pool_np(m["w"]).T, jnp.float32))

    def shared_spec(arr):                # whole (tiny) weight, same every step
        return pl.BlockSpec(arr.shape, lambda i: (0, 0))

    in_specs = ([pl.BlockSpec((n_levels, 2), lambda i: (0, 0)),
                 pl.BlockSpec((1, H, W), lambda i: (i, 0, 0)),
                 pl.BlockSpec((1, H, W), lambda i: (i, 0, 0))]
                + [shared_spec(m_) for m_ in (gv + gh + pv + ph)])

    outs = pl.pallas_call(
        functools.partial(_msssim_kernel, meta=meta),
        out_shape=jax.ShapeDtypeStruct((N, 1, 2 * n_levels), jnp.float32),
        grid=(N,),
        in_specs=in_specs,
        out_specs=pl.BlockSpec((1, 1, 2 * n_levels), lambda i: (i, 0, 0)),
        compiler_params=pltpu.CompilerParams(
            dimension_semantics=("parallel",)),
    )(cc, x1, x2, *gv, *gh, *pv, *ph)

    sums = jnp.sum(outs[:, 0, :], axis=0)                # (2*n_levels,)
    counts = jnp.asarray([N * m["hout"] * m["wout"] for m in meta],
                         jnp.float32)
    mssim = sums[:n_levels] / counts
    mcs = sums[n_levels:] / counts

    weights = jnp.asarray(_MS_WEIGHTS, jnp.float32)
    pow1 = mcs ** weights
    pow2 = mssim ** weights
    # Reference combination: prod(pow1[:-1] * pow2[-1])  (pow2[-1] broadcasts).
    return jnp.prod(pow1[:-1] * pow2[-1])


# ----------------------------------------------------------------------------
# Pure-JAX reference (mirror of the PyTorch code) used only for the self-check
# ----------------------------------------------------------------------------
def _msssim_reference(img1, img2, window_size=11):
    def avg_pool(x):
        b, c, h, w = x.shape
        return x.reshape(b, c, h // 2, 2, w // 2, 2).mean(axis=(3, 5))

    def ssim(a, b):
        _, c, h, w = a.shape
        mx, mn = jnp.max(a), jnp.min(a)
        big_l = (jnp.where(mx > 128.0, 255.0, 1.0)
                 - jnp.where(mn < -0.5, -1.0, 0.0))
        k = min(window_size, h, w)
        g = jnp.asarray(_gaussian_np(k))
        w2d = jnp.broadcast_to(jnp.outer(g, g), (c, 1, k, k))

        def dwconv(x):
            return jax.lax.conv_general_dilated(
                x, w2d, window_strides=(1, 1), padding="VALID",
                dimension_numbers=("NCHW", "OIHW", "NCHW"),
                feature_group_count=c,
                precision=jax.lax.Precision.HIGHEST)

        mu1, mu2 = dwconv(a), dwconv(b)
        mu1_sq, mu2_sq, mu1_mu2 = mu1 * mu1, mu2 * mu2, mu1 * mu2
        s1 = dwconv(a * a) - mu1_sq
        s2 = dwconv(b * b) - mu2_sq
        s12 = dwconv(a * b) - mu1_mu2
        c1, c2 = (0.01 * big_l) ** 2, (0.03 * big_l) ** 2
        v1, v2 = 2.0 * s12 + c2, s1 + s2 + c2
        cs = jnp.mean(v1 / v2)
        ssim_map = ((2.0 * mu1_mu2 + c1) * v1) / ((mu1_sq + mu2_sq + c1) * v2)
        return jnp.mean(ssim_map), cs

    a = img1.astype(jnp.float32)
    b = img2.astype(jnp.float32)
    mssim, mcs = [], []
    for l in range(len(_MS_WEIGHTS)):
        sim, cs = ssim(a, b)
        mssim.append(sim)
        mcs.append(cs)
        if l + 1 < len(_MS_WEIGHTS):
            a, b = avg_pool(a), avg_pool(b)
    mssim = jnp.stack(mssim)
    mcs = jnp.stack(mcs)
    weights = jnp.asarray(_MS_WEIGHTS, jnp.float32)
    pow1 = mcs ** weights
    pow2 = mssim ** weights
    return jnp.prod(pow1[:-1] * pow2[-1])


if __name__ == "__main__":
    key = jax.random.PRNGKey(0)
    k1, k2 = jax.random.split(key)
    # batch=2, channels=3, 32x32 spatial: 32 is the smallest spatial size for
    # which the 5-level reference pyramid is well defined.  img2 is a noisy
    # version of img1 so the MS-SSIM power combination stays finite.
    img1 = jax.random.uniform(k1, (2, 3, 32, 32), dtype=jnp.float32)
    img2 = jnp.clip(
        img1 + 0.05 * jax.random.normal(k2, img1.shape, jnp.float32), 0.0, 1.0)

    out = msssim_pallas(img1, img2, window_size=11)
    jax.block_until_ready(out)
    assert out.shape == () and bool(jnp.isfinite(out)), out

    ref = _msssim_reference(img1, img2, window_size=11)
    assert bool(jnp.allclose(out, ref, rtol=1e-2, atol=1e-3)), (out, ref)

    print("KERNEL_OK")
</pallas_src>

<mosaic_0001>
module attributes {stable_mosaic.version = 11 : i64} {
  func.func @_msssim_kernel(%arg0: i32, %arg1: memref<5x2xf32, #tpu.memory_space<vmem>>, %arg2: memref<1x32x32xf32, #tpu.memory_space<vmem>>, %arg3: memref<1x32x32xf32, #tpu.memory_space<vmem>>, %arg4: memref<22x32xbf16, #tpu.memory_space<vmem>>, %arg5: memref<6x16xbf16, #tpu.memory_space<vmem>>, %arg6: memref<32x22xbf16, #tpu.memory_space<vmem>>, %arg7: memref<16x6xbf16, #tpu.memory_space<vmem>>, %arg8: memref<16x32xf32, #tpu.memory_space<vmem>>, %arg9: memref<8x16xf32, #tpu.memory_space<vmem>>, %arg10: memref<4x8xf32, #tpu.memory_space<vmem>>, %arg11: memref<2x4xf32, #tpu.memory_space<vmem>>, %arg12: memref<32x16xf32, #tpu.memory_space<vmem>>, %arg13: memref<16x8xf32, #tpu.memory_space<vmem>>, %arg14: memref<8x4xf32, #tpu.memory_space<vmem>>, %arg15: memref<4x2xf32, #tpu.memory_space<vmem>>, %arg16: memref<1x1x10xf32, #tpu.memory_space<vmem>>) attributes {dimension_semantics = [#tpu.dimension_semantics<parallel>], iteration_bounds = array<i64: 6>, scalar_prefetch = 0 : i64, scratch_operands = 0 : i64, tpu.core_type = #tpu.core_type<tc>, window_params = [{pipeline_mode = #tpu.pipeline_mode<synchronous>, transform_indices = @transform_0, window_bounds = array<i64: 5, 2>}, {transform_indices = @transform_1, window_bounds = array<i64: 1, 32, 32>}, {transform_indices = @transform_2, window_bounds = array<i64: 1, 32, 32>}, {pipeline_mode = #tpu.pipeline_mode<synchronous>, transform_indices = @transform_3, window_bounds = array<i64: 22, 32>}, {pipeline_mode = #tpu.pipeline_mode<synchronous>, transform_indices = @transform_4, window_bounds = array<i64: 6, 16>}, {pipeline_mode = #tpu.pipeline_mode<synchronous>, transform_indices = @transform_5, window_bounds = array<i64: 32, 22>}, {pipeline_mode = #tpu.pipeline_mode<synchronous>, transform_indices = @transform_6, window_bounds = array<i64: 16, 6>}, {pipeline_mode = #tpu.pipeline_mode<synchronous>, transform_indices = @transform_7, window_bounds = array<i64: 16, 32>}, {pipeline_mode = #tpu.pipeline_mode<synchronous>, transform_indices = @transform_8, window_bounds = array<i64: 8, 16>}, {pipeline_mode = #tpu.pipeline_mode<synchronous>, transform_indices = @transform_9, window_bounds = array<i64: 4, 8>}, {pipeline_mode = #tpu.pipeline_mode<synchronous>, transform_indices = @transform_10, window_bounds = array<i64: 2, 4>}, {pipeline_mode = #tpu.pipeline_mode<synchronous>, transform_indices = @transform_11, window_bounds = array<i64: 32, 16>}, {pipeline_mode = #tpu.pipeline_mode<synchronous>, transform_indices = @transform_12, window_bounds = array<i64: 16, 8>}, {pipeline_mode = #tpu.pipeline_mode<synchronous>, transform_indices = @transform_13, window_bounds = array<i64: 8, 4>}, {pipeline_mode = #tpu.pipeline_mode<synchronous>, transform_indices = @transform_14, window_bounds = array<i64: 4, 2>}, {transform_indices = @transform_15, window_bounds = array<i64: 1, 1, 10>}]} {
    %c0 = arith.constant 0 : index
    %c0_0 = arith.constant 0 : index
    %c0_1 = arith.constant 0 : index
    %0 = vector.load %arg2[%c0, %c0_0, %c0_1] : memref<1x32x32xf32, #tpu.memory_space<vmem>>, vector<1x32x32xf32>
    %1 = vector.shape_cast %0 : vector<1x32x32xf32> to vector<32x32xf32>
    %c0_2 = arith.constant 0 : index
    %c0_3 = arith.constant 0 : index
    %c0_4 = arith.constant 0 : index
    %2 = vector.load %arg3[%c0_2, %c0_3, %c0_4] : memref<1x32x32xf32, #tpu.memory_space<vmem>>, vector<1x32x32xf32>
    %3 = vector.shape_cast %2 : vector<1x32x32xf32> to vector<32x32xf32>
    %4 = vector.shape_cast %1 : vector<32x32xf32> to vector<1x32x32xf32>
    %cst = arith.constant dense<0.000000e+00> : vector<1xf32>
    %5 = vector.multi_reduction <add>, %4, %cst [1, 2] : vector<1x32x32xf32> to vector<1xf32>
    %6 = vector.shape_cast %5 : vector<1xf32> to vector<1x1x1xf32>
    %7 = vector.extract %6[0, 0, 0] : f32 from vector<1x1x1xf32>
    %cst_5 = arith.constant 1.024000e+03 : f32
    %8 = arith.divf %7, %cst_5 : f32
    %9 = vector.shape_cast %3 : vector<32x32xf32> to vector<1x32x32xf32>
    %cst_6 = arith.constant dense<0.000000e+00> : vector<1xf32>
    %10 = vector.multi_reduction <add>, %9, %cst_6 [1, 2] : vector<1x32x32xf32> to vector<1xf32>
    %11 = vector.shape_cast %10 : vector<1xf32> to vector<1x1x1xf32>
    %12 = vector.extract %11[0, 0, 0] : f32 from vector<1x1x1xf32>
    %cst_7 = arith.constant 1.024000e+03 : f32
    %13 = arith.divf %12, %cst_7 : f32
    %14 = arith.addf %8, %13 : f32
    %cst_8 = arith.constant 5.000000e-01 : f32
    %15 = arith.mulf %14, %cst_8 : f32
    %16 = vector.broadcast %15 : f32 to vector<32x32xf32>
    %17 = arith.subf %1, %16 : vector<32x32xf32>
    %18 = vector.broadcast %15 : f32 to vector<32x32xf32>
    %19 = arith.subf %3, %18 : vector<32x32xf32>
    %c0_9 = arith.constant 0 : index
    %c0_10 = arith.constant 0 : index
    %20 = vector.load %arg1[%c0_9, %c0_10] : memref<5x2xf32, #tpu.memory_space<vmem>>, vector<1x1xf32>
    %c0_11 = arith.constant 0 : index
    %c1 = arith.constant 1 : index
    %21 = vector.load %arg1[%c0_11, %c1] : memref<5x2xf32, #tpu.memory_space<vmem>>, vector<1x1xf32>
    %c0_12 = arith.constant 0 : index
    %c0_13 = arith.constant 0 : index
    %22 = vector.load %arg4[%c0_12, %c0_13] : memref<22x32xbf16, #tpu.memory_space<vmem>>, vector<22x32xbf16>
    %c0_14 = arith.constant 0 : index
    %c0_15 = arith.constant 0 : index
    %23 = vector.load %arg6[%c0_14, %c0_15] : memref<32x22xbf16, #tpu.memory_space<vmem>>, vector<32x22xbf16>
    %24 = arith.truncf %17 : vector<32x32xf32> to vector<32x32xbf16>
    %cst_16 = arith.constant dense<0.000000e+00> : vector<22x32xf32>
    %25 = tpu.matmul %22, %24, %cst_16 {dimension_numbers = #tpu.dot_dimension_numbers<[1], [0], [0], [1], [0, 0, 1, 1], [], []>} : vector<22x32xbf16>, vector<32x32xbf16>, vector<22x32xf32> -> vector<22x32xf32>
    %26 = arith.truncf %25 : vector<22x32xf32> to vector<22x32xbf16>
    %cst_17 = arith.constant dense<0.000000e+00> : vector<22x22xf32>
    %27 = tpu.matmul %26, %23, %cst_17 {dimension_numbers = #tpu.dot_dimension_numbers<[1], [0], [0], [1], [0, 0, 1, 1], [], []>} : vector<22x32xbf16>, vector<32x22xbf16>, vector<22x22xf32> -> vector<22x22xf32>
    %28 = arith.truncf %19 : vector<32x32xf32> to vector<32x32xbf16>
    %cst_18 = arith.constant dense<0.000000e+00> : vector<22x32xf32>
    %29 = tpu.matmul %22, %28, %cst_18 {dimension_numbers = #tpu.dot_dimension_numbers<[1], [0], [0], [1], [0, 0, 1, 1], [], []>} : vector<22x32xbf16>, vector<32x32xbf16>, vector<22x32xf32> -> vector<22x32xf32>
    %30 = arith.truncf %29 : vector<22x32xf32> to vector<22x32xbf16>
    %cst_19 = arith.constant dense<0.000000e+00> : vector<22x22xf32>
    %31 = tpu.matmul %30, %23, %cst_19 {dimension_numbers = #tpu.dot_dimension_numbers<[1], [0], [0], [1], [0, 0, 1, 1], [], []>} : vector<22x32xbf16>, vector<32x22xbf16>, vector<22x22xf32> -> vector<22x22xf32>
    %32 = vector.broadcast %15 : f32 to vector<22x22xf32>
    %33 = arith.addf %27, %32 : vector<22x22xf32>
    %34 = vector.broadcast %15 : f32 to vector<22x22xf32>
    %35 = arith.addf %31, %34 : vector<22x22xf32>
    %36 = arith.mulf %17, %17 : vector<32x32xf32>
    %37 = arith.truncf %36 : vector<32x32xf32> to vector<32x32xbf16>
    %cst_20 = arith.constant dense<0.000000e+00> : vector<22x32xf32>
    %38 = tpu.matmul %22, %37, %cst_20 {dimension_numbers = #tpu.dot_dimension_numbers<[1], [0], [0], [1], [0, 0, 1, 1], [], []>} : vector<22x32xbf16>, vector<32x32xbf16>, vector<22x32xf32> -> vector<22x32xf32>
    %39 = arith.truncf %38 : vector<22x32xf32> to vector<22x32xbf16>
    %cst_21 = arith.constant dense<0.000000e+00> : vector<22x22xf32>
    %40 = tpu.matmul %39, %23, %cst_21 {dimension_numbers = #tpu.dot_dimension_numbers<[1], [0], [0], [1], [0, 0, 1, 1], [], []>} : vector<22x32xbf16>, vector<32x22xbf16>, vector<22x22xf32> -> vector<22x22xf32>
    %41 = arith.mulf %27, %27 : vector<22x22xf32>
    %42 = arith.subf %40, %41 : vector<22x22xf32>
    %43 = arith.mulf %19, %19 : vector<32x32xf32>
    %44 = arith.truncf %43 : vector<32x32xf32> to vector<32x32xbf16>
    %cst_22 = arith.constant dense<0.000000e+00> : vector<22x32xf32>
    %45 = tpu.matmul %22, %44, %cst_22 {dimension_numbers = #tpu.dot_dimension_numbers<[1], [0], [0], [1], [0, 0, 1, 1], [], []>} : vector<22x32xbf16>, vector<32x32xbf16>, vector<22x32xf32> -> vector<22x32xf32>
    %46 = arith.truncf %45 : vector<22x32xf32> to vector<22x32xbf16>
    %cst_23 = arith.constant dense<0.000000e+00> : vector<22x22xf32>
    %47 = tpu.matmul %46, %23, %cst_23 {dimension_numbers = #tpu.dot_dimension_numbers<[1], [0], [0], [1], [0, 0, 1, 1], [], []>} : vector<22x32xbf16>, vector<32x22xbf16>, vector<22x22xf32> -> vector<22x22xf32>
    %48 = arith.mulf %31, %31 : vector<22x22xf32>
    %49 = arith.subf %47, %48 : vector<22x22xf32>
    %50 = arith.mulf %17, %19 : vector<32x32xf32>
    %51 = arith.truncf %50 : vector<32x32xf32> to vector<32x32xbf16>
    %cst_24 = arith.constant dense<0.000000e+00> : vector<22x32xf32>
    %52 = tpu.matmul %22, %51, %cst_24 {dimension_numbers = #tpu.dot_dimension_numbers<[1], [0], [0], [1], [0, 0, 1, 1], [], []>} : vector<22x32xbf16>, vector<32x32xbf16>, vector<22x32xf32> -> vector<22x32xf32>
    %53 = arith.truncf %52 : vector<22x32xf32> to vector<22x32xbf16>
    %cst_25 = arith.constant dense<0.000000e+00> : vector<22x22xf32>
    %54 = tpu.matmul %53, %23, %cst_25 {dimension_numbers = #tpu.dot_dimension_numbers<[1], [0], [0], [1], [0, 0, 1, 1], [], []>} : vector<22x32xbf16>, vector<32x22xbf16>, vector<22x22xf32> -> vector<22x22xf32>
    %55 = arith.mulf %27, %31 : vector<22x22xf32>
    %56 = arith.subf %54, %55 : vector<22x22xf32>
    %cst_26 = arith.constant 2.000000e+00 : f32
    %57 = vector.broadcast %cst_26 : f32 to vector<22x22xf32>
    %58 = arith.mulf %57, %56 : vector<22x22xf32>
    %59 = vector.broadcast %21 : vector<1x1xf32> to vector<22x22xf32>
    %60 = arith.addf %58, %59 : vector<22x22xf32>
    %61 = arith.addf %42, %49 : vector<22x22xf32>
    %62 = vector.broadcast %21 : vector<1x1xf32> to vector<22x22xf32>
    %63 = arith.addf %61, %62 : vector<22x22xf32>
    %64 = tpu.reciprocal %63 : vector<22x22xf32> -> vector<22x22xf32>
    %65 = arith.mulf %60, %64 : vector<22x22xf32>
    %cst_27 = arith.constant 2.000000e+00 : f32
    %66 = vector.broadcast %cst_27 : f32 to vector<22x22xf32>
    %67 = arith.mulf %66, %33 : vector<22x22xf32>
    %68 = arith.mulf %67, %35 : vector<22x22xf32>
    %69 = vector.broadcast %20 : vector<1x1xf32> to vector<22x22xf32>
    %70 = arith.addf %68, %69 : vector<22x22xf32>
    %71 = arith.mulf %33, %33 : vector<22x22xf32>
    %72 = arith.mulf %35, %35 : vector<22x22xf32>
    %73 = arith.addf %71, %72 : vector<22x22xf32>
    %74 = vector.broadcast %20 : vector<1x1xf32> to vector<22x22xf32>
    %75 = arith.addf %73, %74 : vector<22x22xf32>
    %76 = arith.divf %70, %75 : vector<22x22xf32>
    %77 = arith.mulf %65, %76 : vector<22x22xf32>
    %78 = vector.shape_cast %77 : vector<22x22xf32> to vector<1x22x22xf32>
    %cst_28 = arith.constant dense<0.000000e+00> : vector<1xf32>
    %79 = vector.multi_reduction <add>, %78, %cst_28 [1, 2] : vector<1x22x22xf32> to vector<1xf32>
    %80 = vector.shape_cast %79 : vector<1xf32> to vector<1x1x1xf32>
    %81 = vector.extract %80[0, 0, 0] : f32 from vector<1x1x1xf32>
    %82 = vector.broadcast %81 : f32 to vector<1x1xf32>
    %83 = vector.shape_cast %65 : vector<22x22xf32> to vector<1x22x22xf32>
    %cst_29 = arith.constant dense<0.000000e+00> : vector<1xf32>
    %84 = vector.multi_reduction <add>, %83, %cst_29 [1, 2] : vector<1x22x22xf32> to vector<1xf32>
    %85 = vector.shape_cast %84 : vector<1xf32> to vector<1x1x1xf32>
    %86 = vector.extract %85[0, 0, 0] : f32 from vector<1x1x1xf32>
    %87 = vector.broadcast %86 : f32 to vector<1x1xf32>
    %c0_30 = arith.constant 0 : index
    %c0_31 = arith.constant 0 : index
    %88 = vector.load %arg8[%c0_30, %c0_31] : memref<16x32xf32, #tpu.memory_space<vmem>>, vector<16x32xf32>
    %c0_32 = arith.constant 0 : index
    %c0_33 = arith.constant 0 : index
    %89 = vector.load %arg12[%c0_32, %c0_33] : memref<32x16xf32, #tpu.memory_space<vmem>>, vector<32x16xf32>
    %cst_34 = arith.constant dense<0.000000e+00> : vector<16x32xf32>
    %90 = tpu.matmul %88, %17, %cst_34 {dimension_numbers = #tpu.dot_dimension_numbers<[1], [0], [0], [1], [0, 0, 1, 1], [], []>} : vector<16x32xf32>, vector<32x32xf32>, vector<16x32xf32> -> vector<16x32xf32>
    %cst_35 = arith.constant dense<0.000000e+00> : vector<16x16xf32>
    %91 = tpu.matmul %90, %89, %cst_35 {dimension_numbers = #tpu.dot_dimension_numbers<[1], [0], [0], [1], [0, 0, 1, 1], [], []>} : vector<16x32xf32>, vector<32x16xf32>, vector<16x16xf32> -> vector<16x16xf32>
    %cst_36 = arith.constant dense<0.000000e+00> : vector<16x32xf32>
    %92 = tpu.matmul %88, %19, %cst_36 {dimension_numbers = #tpu.dot_dimension_numbers<[1], [0], [0], [1], [0, 0, 1, 1], [], []>} : vector<16x32xf32>, vector<32x32xf32>, vector<16x32xf32> -> vector<16x32xf32>
    %cst_37 = arith.constant dense<0.000000e+00> : vector<16x16xf32>
    %93 = tpu.matmul %92, %89, %cst_37 {dimension_numbers = #tpu.dot_dimension_numbers<[1], [0], [0], [1], [0, 0, 1, 1], [], []>} : vector<16x32xf32>, vector<32x16xf32>, vector<16x16xf32> -> vector<16x16xf32>
    %c1_38 = arith.constant 1 : index
    %c0_39 = arith.constant 0 : index
    %94 = vector.load %arg1[%c1_38, %c0_39] : memref<5x2xf32, #tpu.memory_space<vmem>>, vector<1x1xf32>
    %c1_40 = arith.constant 1 : index
    %c1_41 = arith.constant 1 : index
    %95 = vector.load %arg1[%c1_40, %c1_41] : memref<5x2xf32, #tpu.memory_space<vmem>>, vector<1x1xf32>
    %c0_42 = arith.constant 0 : index
    %c0_43 = arith.constant 0 : index
    %96 = vector.load %arg5[%c0_42, %c0_43] : memref<6x16xbf16, #tpu.memory_space<vmem>>, vector<6x16xbf16>
    %c0_44 = arith.constant 0 : index
    %c0_45 = arith.constant 0 : index
    %97 = vector.load %arg7[%c0_44, %c0_45] : memref<16x6xbf16, #tpu.memory_space<vmem>>, vector<16x6xbf16>
    %98 = arith.truncf %91 : vector<16x16xf32> to vector<16x16xbf16>
    %cst_46 = arith.constant dense<0.000000e+00> : vector<6x16xf32>
    %99 = tpu.matmul %96, %98, %cst_46 {dimension_numbers = #tpu.dot_dimension_numbers<[1], [0], [0], [1], [0, 0, 1, 1], [], []>} : vector<6x16xbf16>, vector<16x16xbf16>, vector<6x16xf32> -> vector<6x16xf32>
    %100 = arith.truncf %99 : vector<6x16xf32> to vector<6x16xbf16>
    %cst_47 = arith.constant dense<0.000000e+00> : vector<6x6xf32>
    %101 = tpu.matmul %100, %97, %cst_47 {dimension_numbers = #tpu.dot_dimension_numbers<[1], [0], [0], [1], [0, 0, 1, 1], [], []>} : vector<6x16xbf16>, vector<16x6xbf16>, vector<6x6xf32> -> vector<6x6xf32>
    %102 = arith.truncf %93 : vector<16x16xf32> to vector<16x16xbf16>
    %cst_48 = arith.constant dense<0.000000e+00> : vector<6x16xf32>
    %103 = tpu.matmul %96, %102, %cst_48 {dimension_numbers = #tpu.dot_dimension_numbers<[1], [0], [0], [1], [0, 0, 1, 1], [], []>} : vector<6x16xbf16>, vector<16x16xbf16>, vector<6x16xf32> -> vector<6x16xf32>
    %104 = arith.truncf %103 : vector<6x16xf32> to vector<6x16xbf16>
    %cst_49 = arith.constant dense<0.000000e+00> : vector<6x6xf32>
    %105 = tpu.matmul %104, %97, %cst_49 {dimension_numbers = #tpu.dot_dimension_numbers<[1], [0], [0], [1], [0, 0, 1, 1], [], []>} : vector<6x16xbf16>, vector<16x6xbf16>, vector<6x6xf32> -> vector<6x6xf32>
    %106 = vector.broadcast %15 : f32 to vector<6x6xf32>
    %107 = arith.addf %101, %106 : vector<6x6xf32>
    %108 = vector.broadcast %15 : f32 to vector<6x6xf32>
    %109 = arith.addf %105, %108 : vector<6x6xf32>
    %110 = arith.mulf %91, %91 : vector<16x16xf32>
    %111 = arith.truncf %110 : vector<16x16xf32> to vector<16x16xbf16>
    %cst_50 = arith.constant dense<0.000000e+00> : vector<6x16xf32>
    %112 = tpu.matmul %96, %111, %cst_50 {dimension_numbers = #tpu.dot_dimension_numbers<[1], [0], [0], [1], [0, 0, 1, 1], [], []>} : vector<6x16xbf16>, vector<16x16xbf16>, vector<6x16xf32> -> vector<6x16xf32>
    %113 = arith.truncf %112 : vector<6x16xf32> to vector<6x16xbf16>
    %cst_51 = arith.constant dense<0.000000e+00> : vector<6x6xf32>
    %114 = tpu.matmul %113, %97, %cst_51 {dimension_numbers = #tpu.dot_dimension_numbers<[1], [0], [0], [1], [0, 0, 1, 1], [], []>} : vector<6x16xbf16>, vector<16x6xbf16>, vector<6x6xf32> -> vector<6x6xf32>
    %115 = arith.mulf %101, %101 : vector<6x6xf32>
    %116 = arith.subf %114, %115 : vector<6x6xf32>
    %117 = arith.mulf %93, %93 : vector<16x16xf32>
    %118 = arith.truncf %117 : vector<16x16xf32> to vector<16x16xbf16>
    %cst_52 = arith.constant dense<0.000000e+00> : vector<6x16xf32>
    %119 = tpu.matmul %96, %118, %cst_52 {dimension_numbers = #tpu.dot_dimension_numbers<[1], [0], [0], [1], [0, 0, 1, 1], [], []>} : vector<6x16xbf16>, vector<16x16xbf16>, vector<6x16xf32> -> vector<6x16xf32>
    %120 = arith.truncf %119 : vector<6x16xf32> to vector<6x16xbf16>
    %cst_53 = arith.constant dense<0.000000e+00> : vector<6x6xf32>
    %121 = tpu.matmul %120, %97, %cst_53 {dimension_numbers = #tpu.dot_dimension_numbers<[1], [0], [0], [1], [0, 0, 1, 1], [], []>} : vector<6x16xbf16>, vector<16x6xbf16>, vector<6x6xf32> -> vector<6x6xf32>
    %122 = arith.mulf %105, %105 : vector<6x6xf32>
    %123 = arith.subf %121, %122 : vector<6x6xf32>
    %124 = arith.mulf %91, %93 : vector<16x16xf32>
    %125 = arith.truncf %124 : vector<16x16xf32> to vector<16x16xbf16>
    %cst_54 = arith.constant dense<0.000000e+00> : vector<6x16xf32>
    %126 = tpu.matmul %96, %125, %cst_54 {dimension_numbers = #tpu.dot_dimension_numbers<[1], [0], [0], [1], [0, 0, 1, 1], [], []>} : vector<6x16xbf16>, vector<16x16xbf16>, vector<6x16xf32> -> vector<6x16xf32>
    %127 = arith.truncf %126 : vector<6x16xf32> to vector<6x16xbf16>
    %cst_55 = arith.constant dense<0.000000e+00> : vector<6x6xf32>
    %128 = tpu.matmul %127, %97, %cst_55 {dimension_numbers = #tpu.dot_dimension_numbers<[1], [0], [0], [1], [0, 0, 1, 1], [], []>} : vector<6x16xbf16>, vector<16x6xbf16>, vector<6x6xf32> -> vector<6x6xf32>
    %129 = arith.mulf %101, %105 : vector<6x6xf32>
    %130 = arith.subf %128, %129 : vector<6x6xf32>
    %cst_56 = arith.constant 2.000000e+00 : f32
    %131 = vector.broadcast %cst_56 : f32 to vector<6x6xf32>
    %132 = arith.mulf %131, %130 : vector<6x6xf32>
    %133 = vector.broadcast %95 : vector<1x1xf32> to vector<6x6xf32>
    %134 = arith.addf %132, %133 : vector<6x6xf32>
    %135 = arith.addf %116, %123 : vector<6x6xf32>
    %136 = vector.broadcast %95 : vector<1x1xf32> to vector<6x6xf32>
    %137 = arith.addf %135, %136 : vector<6x6xf32>
    %138 = tpu.reciprocal %137 : vector<6x6xf32> -> vector<6x6xf32>
    %139 = arith.mulf %134, %138 : vector<6x6xf32>
    %cst_57 = arith.constant 2.000000e+00 : f32
    %140 = vector.broadcast %cst_57 : f32 to vector<6x6xf32>
    %141 = arith.mulf %140, %107 : vector<6x6xf32>
    %142 = arith.mulf %141, %109 : vector<6x6xf32>
    %143 = vector.broadcast %94 : vector<1x1xf32> to vector<6x6xf32>
    %144 = arith.addf %142, %143 : vector<6x6xf32>
    %145 = arith.mulf %107, %107 : vector<6x6xf32>
    %146 = arith.mulf %109, %109 : vector<6x6xf32>
    %147 = arith.addf %145, %146 : vector<6x6xf32>
    %148 = vector.broadcast %94 : vector<1x1xf32> to vector<6x6xf32>
    %149 = arith.addf %147, %148 : vector<6x6xf32>
    %150 = arith.divf %144, %149 : vector<6x6xf32>
    %151 = arith.mulf %139, %150 : vector<6x6xf32>
    %152 = vector.shape_cast %151 : vector<6x6xf32> to vector<1x6x6xf32>
    %cst_58 = arith.constant dense<0.000000e+00> : vector<1xf32>
    %153 = vector.multi_reduction <add>, %152, %cst_58 [1, 2] : vector<1x6x6xf32> to vector<1xf32>
    %154 = vector.shape_cast %153 : vector<1xf32> to vector<1x1x1xf32>
    %155 = vector.extract %154[0, 0, 0] : f32 from vector<1x1x1xf32>
    %156 = vector.broadcast %155 : f32 to vector<1x1xf32>
    %157 = vector.shape_cast %139 : vector<6x6xf32> to vector<1x6x6xf32>
    %cst_59 = arith.constant dense<0.000000e+00> : vector<1xf32>
    %158 = vector.multi_reduction <add>, %157, %cst_59 [1, 2] : vector<1x6x6xf32> to vector<1xf32>
    %159 = vector.shape_cast %158 : vector<1xf32> to vector<1x1x1xf32>
    %160 = vector.extract %159[0, 0, 0] : f32 from vector<1x1x1xf32>
    %161 = vector.broadcast %160 : f32 to vector<1x1xf32>
    %c0_60 = arith.constant 0 : index
    %c0_61 = arith.constant 0 : index
    %162 = vector.load %arg9[%c0_60, %c0_61] : memref<8x16xf32, #tpu.memory_space<vmem>>, vector<8x16xf32>
    %c0_62 = arith.constant 0 : index
    %c0_63 = arith.constant 0 : index
    %163 = vector.load %arg13[%c0_62, %c0_63] : memref<16x8xf32, #tpu.memory_space<vmem>>, vector<16x8xf32>
    %cst_64 = arith.constant dense<0.000000e+00> : vector<8x16xf32>
    %164 = tpu.matmul %162, %91, %cst_64 {dimension_numbers = #tpu.dot_dimension_numbers<[1], [0], [0], [1], [0, 0, 1, 1], [], []>} : vector<8x16xf32>, vector<16x16xf32>, vector<8x16xf32> -> vector<8x16xf32>
    %cst_65 = arith.constant dense<0.000000e+00> : vector<8x8xf32>
    %165 = tpu.matmul %164, %163, %cst_65 {dimension_numbers = #tpu.dot_dimension_numbers<[1], [0], [0], [1], [0, 0, 1, 1], [], []>} : vector<8x16xf32>, vector<16x8xf32>, vector<8x8xf32> -> vector<8x8xf32>
    %cst_66 = arith.constant dense<0.000000e+00> : vector<8x16xf32>
    %166 = tpu.matmul %162, %93, %cst_66 {dimension_numbers = #tpu.dot_dimension_numbers<[1], [0], [0], [1], [0, 0, 1, 1], [], []>} : vector<8x16xf32>, vector<16x16xf32>, vector<8x16xf32> -> vector<8x16xf32>
    %cst_67 = arith.constant dense<0.000000e+00> : vector<8x8xf32>
    %167 = tpu.matmul %166, %163, %cst_67 {dimension_numbers = #tpu.dot_dimension_numbers<[1], [0], [0], [1], [0, 0, 1, 1], [], []>} : vector<8x16xf32>, vector<16x8xf32>, vector<8x8xf32> -> vector<8x8xf32>
    %c2 = arith.constant 2 : index
    %c0_68 = arith.constant 0 : index
    %168 = vector.load %arg1[%c2, %c0_68] : memref<5x2xf32, #tpu.memory_space<vmem>>, vector<1x1xf32>
    %c2_69 = arith.constant 2 : index
    %c1_70 = arith.constant 1 : index
    %169 = vector.load %arg1[%c2_69, %c1_70] : memref<5x2xf32, #tpu.memory_space<vmem>>, vector<1x1xf32>
    %170 = vector.extract_strided_slice %165 {offsets = [0, 0], sizes = [1, 8], strides = [1, 1]} : vector<8x8xf32> to vector<1x8xf32>
    %cst_71 = arith.constant 0.00767284352 : f32
    %171 = vector.broadcast %cst_71 : f32 to vector<1x8xf32>
    %172 = arith.mulf %171, %170 : vector<1x8xf32>
    %173 = vector.extract_strided_slice %165 {offsets = [1, 0], sizes = [1, 8], strides = [1, 1]} : vector<8x8xf32> to vector<1x8xf32>
    %cst_72 = arith.constant 0.0363517664 : f32
    %174 = vector.broadcast %cst_72 : f32 to vector<1x8xf32>
    %175 = arith.mulf %174, %173 : vector<1x8xf32>
    %176 = arith.addf %172, %175 : vector<1x8xf32>
    %177 = vector.extract_strided_slice %165 {offsets = [2, 0], sizes = [1, 8], strides = [1, 1]} : vector<8x8xf32> to vector<1x8xf32>
    %cst_73 = arith.constant 0.110426918 : f32
    %178 = vector.broadcast %cst_73 : f32 to vector<1x8xf32>
    %179 = arith.mulf %178, %177 : vector<1x8xf32>
    %180 = arith.addf %176, %179 : vector<1x8xf32>
    %181 = vector.extract_strided_slice %165 {offsets = [3, 0], sizes = [1, 8], strides = [1, 1]} : vector<8x8xf32> to vector<1x8xf32>
    %cst_74 = arith.constant 0.215082273 : f32
    %182 = vector.broadcast %cst_74 : f32 to vector<1x8xf32>
    %183 = arith.mulf %182, %181 : vector<1x8xf32>
    %184 = arith.addf %180, %183 : vector<1x8xf32>
    %185 = vector.extract_strided_slice %165 {offsets = [4, 0], sizes = [1, 8], strides = [1, 1]} : vector<8x8xf32> to vector<1x8xf32>
    %cst_75 = arith.constant 0.268605262 : f32
    %186 = vector.broadcast %cst_75 : f32 to vector<1x8xf32>
    %187 = arith.mulf %186, %185 : vector<1x8xf32>
    %188 = arith.addf %184, %187 : vector<1x8xf32>
    %189 = vector.extract_strided_slice %165 {offsets = [5, 0], sizes = [1, 8], strides = [1, 1]} : vector<8x8xf32> to vector<1x8xf32>
    %cst_76 = arith.constant 0.215082273 : f32
    %190 = vector.broadcast %cst_76 : f32 to vector<1x8xf32>
    %191 = arith.mulf %190, %189 : vector<1x8xf32>
    %192 = arith.addf %188, %191 : vector<1x8xf32>
    %193 = vector.extract_strided_slice %165 {offsets = [6, 0], sizes = [1, 8], strides = [1, 1]} : vector<8x8xf32> to vector<1x8xf32>
    %cst_77 = arith.constant 0.110426918 : f32
    %194 = vector.broadcast %cst_77 : f32 to vector<1x8xf32>
    %195 = arith.mulf %194, %193 : vector<1x8xf32>
    %196 = arith.addf %192, %195 : vector<1x8xf32>
    %197 = vector.extract_strided_slice %165 {offsets = [7, 0], sizes = [1, 8], strides = [1, 1]} : vector<8x8xf32> to vector<1x8xf32>
    %cst_78 = arith.constant 0.0363517664 : f32
    %198 = vector.broadcast %cst_78 : f32 to vector<1x8xf32>
    %199 = arith.mulf %198, %197 : vector<1x8xf32>
    %200 = arith.addf %196, %199 : vector<1x8xf32>
    %201 = vector.extract_strided_slice %200 {offsets = [0, 0], sizes = [1, 1], strides = [1, 1]} : vector<1x8xf32> to vector<1x1xf32>
    %cst_79 = arith.constant 0.00767284352 : f32
    %202 = vector.broadcast %cst_79 : f32 to vector<1x1xf32>
    %203 = arith.mulf %202, %201 : vector<1x1xf32>
    %204 = vector.extract_strided_slice %200 {offsets = [0, 1], sizes = [1, 1], strides = [1, 1]} : vector<1x8xf32> to vector<1x1xf32>
    %cst_80 = arith.constant 0.0363517664 : f32
    %205 = vector.broadcast %cst_80 : f32 to vector<1x1xf32>
    %206 = arith.mulf %205, %204 : vector<1x1xf32>
    %207 = arith.addf %203, %206 : vector<1x1xf32>
    %208 = vector.extract_strided_slice %200 {offsets = [0, 2], sizes = [1, 1], strides = [1, 1]} : vector<1x8xf32> to vector<1x1xf32>
    %cst_81 = arith.constant 0.110426918 : f32
    %209 = vector.broadcast %cst_81 : f32 to vector<1x1xf32>
    %210 = arith.mulf %209, %208 : vector<1x1xf32>
    %211 = arith.addf %207, %210 : vector<1x1xf32>
    %212 = vector.extract_strided_slice %200 {offsets = [0, 3], sizes = [1, 1], strides = [1, 1]} : vector<1x8xf32> to vector<1x1xf32>
    %cst_82 = arith.constant 0.215082273 : f32
    %213 = vector.broadcast %cst_82 : f32 to vector<1x1xf32>
    %214 = arith.mulf %213, %212 : vector<1x1xf32>
    %215 = arith.addf %211, %214 : vector<1x1xf32>
    %216 = vector.extract_strided_slice %200 {offsets = [0, 4], sizes = [1, 1], strides = [1, 1]} : vector<1x8xf32> to vector<1x1xf32>
    %cst_83 = arith.constant 0.268605262 : f32
    %217 = vector.broadcast %cst_83 : f32 to vector<1x1xf32>
    %218 = arith.mulf %217, %216 : vector<1x1xf32>
    %219 = arith.addf %215, %218 : vector<1x1xf32>
    %220 = vector.extract_strided_slice %200 {offsets = [0, 5], sizes = [1, 1], strides = [1, 1]} : vector<1x8xf32> to vector<1x1xf32>
    %cst_84 = arith.constant 0.215082273 : f32
    %221 = vector.broadcast %cst_84 : f32 to vector<1x1xf32>
    %222 = arith.mulf %221, %220 : vector<1x1xf32>
    %223 = arith.addf %219, %222 : vector<1x1xf32>
    %224 = vector.extract_strided_slice %200 {offsets = [0, 6], sizes = [1, 1], strides = [1, 1]} : vector<1x8xf32> to vector<1x1xf32>
    %cst_85 = arith.constant 0.110426918 : f32
    %225 = vector.broadcast %cst_85 : f32 to vector<1x1xf32>
    %226 = arith.mulf %225, %224 : vector<1x1xf32>
    %227 = arith.addf %223, %226 : vector<1x1xf32>
    %228 = vector.extract_strided_slice %200 {offsets = [0, 7], sizes = [1, 1], strides = [1, 1]} : vector<1x8xf32> to vector<1x1xf32>
    %cst_86 = arith.constant 0.0363517664 : f32
    %229 = vector.broadcast %cst_86 : f32 to vector<1x1xf32>
    %230 = arith.mulf %229, %228 : vector<1x1xf32>
    %231 = arith.addf %227, %230 : vector<1x1xf32>
    %232 = vector.extract_strided_slice %167 {offsets = [0, 0], sizes = [1, 8], strides = [1, 1]} : vector<8x8xf32> to vector<1x8xf32>
    %cst_87 = arith.constant 0.00767284352 : f32
    %233 = vector.broadcast %cst_87 : f32 to vector<1x8xf32>
    %234 = arith.mulf %233, %232 : vector<1x8xf32>
    %235 = vector.extract_strided_slice %167 {offsets = [1, 0], sizes = [1, 8], strides = [1, 1]} : vector<8x8xf32> to vector<1x8xf32>
    %cst_88 = arith.constant 0.0363517664 : f32
    %236 = vector.broadcast %cst_88 : f32 to vector<1x8xf32>
    %237 = arith.mulf %236, %235 : vector<1x8xf32>
    %238 = arith.addf %234, %237 : vector<1x8xf32>
    %239 = vector.extract_strided_slice %167 {offsets = [2, 0], sizes = [1, 8], strides = [1, 1]} : vector<8x8xf32> to vector<1x8xf32>
    %cst_89 = arith.constant 0.110426918 : f32
    %240 = vector.broadcast %cst_89 : f32 to vector<1x8xf32>
    %241 = arith.mulf %240, %239 : vector<1x8xf32>
    %242 = arith.addf %238, %241 : vector<1x8xf32>
    %243 = vector.extract_strided_slice %167 {offsets = [3, 0], sizes = [1, 8], strides = [1, 1]} : vector<8x8xf32> to vector<1x8xf32>
    %cst_90 = arith.constant 0.215082273 : f32
    %244 = vector.broadcast %cst_90 : f32 to vector<1x8xf32>
    %245 = arith.mulf %244, %243 : vector<1x8xf32>
    %246 = arith.addf %242, %245 : vector<1x8xf32>
    %247 = vector.extract_strided_slice %167 {offsets = [4, 0], sizes = [1, 8], strides = [1, 1]} : vector<8x8xf32> to vector<1x8xf32>
    %cst_91 = arith.constant 0.268605262 : f32
    %248 = vector.broadcast %cst_91 : f32 to vector<1x8xf32>
    %249 = arith.mulf %248, %247 : vector<1x8xf32>
    %250 = arith.addf %246, %249 : vector<1x8xf32>
    %251 = vector.extract_strided_slice %167 {offsets = [5, 0], sizes = [1, 8], strides = [1, 1]} : vector<8x8xf32> to vector<1x8xf32>
    %cst_92 = arith.constant 0.215082273 : f32
    %252 = vector.broadcast %cst_92 : f32 to vector<1x8xf32>
    %253 = arith.mulf %252, %251 : vector<1x8xf32>
    %254 = arith.addf %250, %253 : vector<1x8xf32>
    %255 = vector.extract_strided_slice %167 {offsets = [6, 0], sizes = [1, 8], strides = [1, 1]} : vector<8x8xf32> to vector<1x8xf32>
    %cst_93 = arith.constant 0.110426918 : f32
    %256 = vector.broadcast %cst_93 : f32 to vector<1x8xf32>
    %257 = arith.mulf %256, %255 : vector<1x8xf32>
    %258 = arith.addf %254, %257 : vector<1x8xf32>
    %259 = vector.extract_strided_slice %167 {offsets = [7, 0], sizes = [1, 8], strides = [1, 1]} : vector<8x8xf32> to vector<1x8xf32>
    %cst_94 = arith.constant 0.0363517664 : f32
    %260 = vector.broadcast %cst_94 : f32 to vector<1x8xf32>
    %261 = arith.mulf %260, %259 : vector<1x8xf32>
    %262 = arith.addf %258, %261 : vector<1x8xf32>
    %263 = vector.extract_strided_slice %262 {offsets = [0, 0], sizes = [1, 1], strides = [1, 1]} : vector<1x8xf32> to vector<1x1xf32>
    %cst_95 = arith.constant 0.00767284352 : f32
    %264 = vector.broadcast %cst_95 : f32 to vector<1x1xf32>
    %265 = arith.mulf %264, %263 : vector<1x1xf32>
    %266 = vector.extract_strided_slice %262 {offsets = [0, 1], sizes = [1, 1], strides = [1, 1]} : vector<1x8xf32> to vector<1x1xf32>
    %cst_96 = arith.constant 0.0363517664 : f32
    %267 = vector.broadcast %cst_96 : f32 to vector<1x1xf32>
    %268 = arith.mulf %267, %266 : vector<1x1xf32>
    %269 = arith.addf %265, %268 : vector<1x1xf32>
    %270 = vector.extract_strided_slice %262 {offsets = [0, 2], sizes = [1, 1], strides = [1, 1]} : vector<1x8xf32> to vector<1x1xf32>
    %cst_97 = arith.constant 0.110426918 : f32
    %271 = vector.broadcast %cst_97 : f32 to vector<1x1xf32>
    %272 = arith.mulf %271, %270 : vector<1x1xf32>
    %273 = arith.addf %269, %272 : vector<1x1xf32>
    %274 = vector.extract_strided_slice %262 {offsets = [0, 3], sizes = [1, 1], strides = [1, 1]} : vector<1x8xf32> to vector<1x1xf32>
    %cst_98 = arith.constant 0.215082273 : f32
    %275 = vector.broadcast %cst_98 : f32 to vector<1x1xf32>
    %276 = arith.mulf %275, %274 : vector<1x1xf32>
    %277 = arith.addf %273, %276 : vector<1x1xf32>
    %278 = vector.extract_strided_slice %262 {offsets = [0, 4], sizes = [1, 1], strides = [1, 1]} : vector<1x8xf32> to vector<1x1xf32>
    %cst_99 = arith.constant 0.268605262 : f32
    %279 = vector.broadcast %cst_99 : f32 to vector<1x1xf32>
    %280 = arith.mulf %279, %278 : vector<1x1xf32>
    %281 = arith.addf %277, %280 : vector<1x1xf32>
    %282 = vector.extract_strided_slice %262 {offsets = [0, 5], sizes = [1, 1], strides = [1, 1]} : vector<1x8xf32> to vector<1x1xf32>
    %cst_100 = arith.constant 0.215082273 : f32
    %283 = vector.broadcast %cst_100 : f32 to vector<1x1xf32>
    %284 = arith.mulf %283, %282 : vector<1x1xf32>
    %285 = arith.addf %281, %284 : vector<1x1xf32>
    %286 = vector.extract_strided_slice %262 {offsets = [0, 6], sizes = [1, 1], strides = [1, 1]} : vector<1x8xf32> to vector<1x1xf32>
    %cst_101 = arith.constant 0.110426918 : f32
    %287 = vector.broadcast %cst_101 : f32 to vector<1x1xf32>
    %288 = arith.mulf %287, %286 : vector<1x1xf32>
    %289 = arith.addf %285, %288 : vector<1x1xf32>
    %290 = vector.extract_strided_slice %262 {offsets = [0, 7], sizes = [1, 1], strides = [1, 1]} : vector<1x8xf32> to vector<1x1xf32>
    %cst_102 = arith.constant 0.0363517664 : f32
    %291 = vector.broadcast %cst_102 : f32 to vector<1x1xf32>
    %292 = arith.mulf %291, %290 : vector<1x1xf32>
    %293 = arith.addf %289, %292 : vector<1x1xf32>
    %294 = vector.broadcast %15 : f32 to vector<1x1xf32>
    %295 = arith.addf %231, %294 : vector<1x1xf32>
    %296 = vector.broadcast %15 : f32 to vector<1x1xf32>
    %297 = arith.addf %293, %296 : vector<1x1xf32>
    %298 = arith.mulf %165, %165 : vector<8x8xf32>
    %299 = vector.extract_strided_slice %298 {offsets = [0, 0], sizes = [1, 8], strides = [1, 1]} : vector<8x8xf32> to vector<1x8xf32>
    %cst_103 = arith.constant 0.00767284352 : f32
    %300 = vector.broadcast %cst_103 : f32 to vector<1x8xf32>
    %301 = arith.mulf %300, %299 : vector<1x8xf32>
    %302 = vector.extract_strided_slice %298 {offsets = [1, 0], sizes = [1, 8], strides = [1, 1]} : vector<8x8xf32> to vector<1x8xf32>
    %cst_104 = arith.constant 0.0363517664 : f32
    %303 = vector.broadcast %cst_104 : f32 to vector<1x8xf32>
    %304 = arith.mulf %303, %302 : vector<1x8xf32>
    %305 = arith.addf %301, %304 : vector<1x8xf32>
    %306 = vector.extract_strided_slice %298 {offsets = [2, 0], sizes = [1, 8], strides = [1, 1]} : vector<8x8xf32> to vector<1x8xf32>
    %cst_105 = arith.constant 0.110426918 : f32
    %307 = vector.broadcast %cst_105 : f32 to vector<1x8xf32>
    %308 = arith.mulf %307, %306 : vector<1x8xf32>
    %309 = arith.addf %305, %308 : vector<1x8xf32>
    %310 = vector.extract_strided_slice %298 {offsets = [3, 0], sizes = [1, 8], strides = [1, 1]} : vector<8x8xf32> to vector<1x8xf32>
    %cst_106 = arith.constant 0.215082273 : f32
    %311 = vector.broadcast %cst_106 : f32 to vector<1x8xf32>
    %312 = arith.mulf %311, %310 : vector<1x8xf32>
    %313 = arith.addf %309, %312 : vector<1x8xf32>
    %314 = vector.extract_strided_slice %298 {offsets = [4, 0], sizes = [1, 8], strides = [1, 1]} : vector<8x8xf32> to vector<1x8xf32>
    %cst_107 = arith.constant 0.268605262 : f32
    %315 = vector.broadcast %cst_107 : f32 to vector<1x8xf32>
    %316 = arith.mulf %315, %314 : vector<1x8xf32>
    %317 = arith.addf %313, %316 : vector<1x8xf32>
    %318 = vector.extract_strided_slice %298 {offsets = [5, 0], sizes = [1, 8], strides = [1, 1]} : vector<8x8xf32> to vector<1x8xf32>
    %cst_108 = arith.constant 0.215082273 : f32
    %319 = vector.broadcast %cst_108 : f32 to vector<1x8xf32>
    %320 = arith.mulf %319, %318 : vector<1x8xf32>
    %321 = arith.addf %317, %320 : vector<1x8xf32>
    %322 = vector.extract_strided_slice %298 {offsets = [6, 0], sizes = [1, 8], strides = [1, 1]} : vector<8x8xf32> to vector<1x8xf32>
    %cst_109 = arith.constant 0.110426918 : f32
    %323 = vector.broadcast %cst_109 : f32 to vector<1x8xf32>
    %324 = arith.mulf %323, %322 : vector<1x8xf32>
    %325 = arith.addf %321, %324 : vector<1x8xf32>
    %326 = vector.extract_strided_slice %298 {offsets = [7, 0], sizes = [1, 8], strides = [1, 1]} : vector<8x8xf32> to vector<1x8xf32>
    %cst_110 = arith.constant 0.0363517664 : f32
    %327 = vector.broadcast %cst_110 : f32 to vector<1x8xf32>
    %328 = arith.mulf %327, %326 : vector<1x8xf32>
    %329 = arith.addf %325, %328 : vector<1x8xf32>
    %330 = vector.extract_strided_slice %329 {offsets = [0, 0], sizes = [1, 1], strides = [1, 1]} : vector<1x8xf32> to vector<1x1xf32>
    %cst_111 = arith.constant 0.00767284352 : f32
    %331 = vector.broadcast %cst_111 : f32 to vector<1x1xf32>
    %332 = arith.mulf %331, %330 : vector<1x1xf32>
    %333 = vector.extract_strided_slice %329 {offsets = [0, 1], sizes = [1, 1], strides = [1, 1]} : vector<1x8xf32> to vector<1x1xf32>
    %cst_112 = arith.constant 0.0363517664 : f32
    %334 = vector.broadcast %cst_112 : f32 to vector<1x1xf32>
    %335 = arith.mulf %334, %333 : vector<1x1xf32>
    %336 = arith.addf %332, %335 : vector<1x1xf32>
    %337 = vector.extract_strided_slice %329 {offsets = [0, 2], sizes = [1, 1], strides = [1, 1]} : vector<1x8xf32> to vector<1x1xf32>
    %cst_113 = arith.constant 0.110426918 : f32
    %338 = vector.broadcast %cst_113 : f32 to vector<1x1xf32>
    %339 = arith.mulf %338, %337 : vector<1x1xf32>
    %340 = arith.addf %336, %339 : vector<1x1xf32>
    %341 = vector.extract_strided_slice %329 {offsets = [0, 3], sizes = [1, 1], strides = [1, 1]} : vector<1x8xf32> to vector<1x1xf32>
    %cst_114 = arith.constant 0.215082273 : f32
    %342 = vector.broadcast %cst_114 : f32 to vector<1x1xf32>
    %343 = arith.mulf %342, %341 : vector<1x1xf32>
    %344 = arith.addf %340, %343 : vector<1x1xf32>
    %345 = vector.extract_strided_slice %329 {offsets = [0, 4], sizes = [1, 1], strides = [1, 1]} : vector<1x8xf32> to vector<1x1xf32>
    %cst_115 = arith.constant 0.268605262 : f32
    %346 = vector.broadcast %cst_115 : f32 to vector<1x1xf32>
    %347 = arith.mulf %346, %345 : vector<1x1xf32>
    %348 = arith.addf %344, %347 : vector<1x1xf32>
    %349 = vector.extract_strided_slice %329 {offsets = [0, 5], sizes = [1, 1], strides = [1, 1]} : vector<1x8xf32> to vector<1x1xf32>
    %cst_116 = arith.constant 0.215082273 : f32
    %350 = vector.broadcast %cst_116 : f32 to vector<1x1xf32>
    %351 = arith.mulf %350, %349 : vector<1x1xf32>
    %352 = arith.addf %348, %351 : vector<1x1xf32>
    %353 = vector.extract_strided_slice %329 {offsets = [0, 6], sizes = [1, 1], strides = [1, 1]} : vector<1x8xf32> to vector<1x1xf32>
    %cst_117 = arith.constant 0.110426918 : f32
    %354 = vector.broadcast %cst_117 : f32 to vector<1x1xf32>
    %355 = arith.mulf %354, %353 : vector<1x1xf32>
    %356 = arith.addf %352, %355 : vector<1x1xf32>
    %357 = vector.extract_strided_slice %329 {offsets = [0, 7], sizes = [1, 1], strides = [1, 1]} : vector<1x8xf32> to vector<1x1xf32>
    %cst_118 = arith.constant 0.0363517664 : f32
    %358 = vector.broadcast %cst_118 : f32 to vector<1x1xf32>
    %359 = arith.mulf %358, %357 : vector<1x1xf32>
    %360 = arith.addf %356, %359 : vector<1x1xf32>
    %361 = arith.mulf %231, %231 : vector<1x1xf32>
    %362 = arith.subf %360, %361 : vector<1x1xf32>
    %363 = arith.mulf %167, %167 : vector<8x8xf32>
    %364 = vector.extract_strided_slice %363 {offsets = [0, 0], sizes = [1, 8], strides = [1, 1]} : vector<8x8xf32> to vector<1x8xf32>
    %cst_119 = arith.constant 0.00767284352 : f32
    %365 = vector.broadcast %cst_119 : f32 to vector<1x8xf32>
    %366 = arith.mulf %365, %364 : vector<1x8xf32>
    %367 = vector.extract_strided_slice %363 {offsets = [1, 0], sizes = [1, 8], strides = [1, 1]} : vector<8x8xf32> to vector<1x8xf32>
    %cst_120 = arith.constant 0.0363517664 : f32
    %368 = vector.broadcast %cst_120 : f32 to vector<1x8xf32>
    %369 = arith.mulf %368, %367 : vector<1x8xf32>
    %370 = arith.addf %366, %369 : vector<1x8xf32>
    %371 = vector.extract_strided_slice %363 {offsets = [2, 0], sizes = [1, 8], strides = [1, 1]} : vector<8x8xf32> to vector<1x8xf32>
    %cst_121 = arith.constant 0.110426918 : f32
    %372 = vector.broadcast %cst_121 : f32 to vector<1x8xf32>
    %373 = arith.mulf %372, %371 : vector<1x8xf32>
    %374 = arith.addf %370, %373 : vector<1x8xf32>
    %375 = vector.extract_strided_slice %363 {offsets = [3, 0], sizes = [1, 8], strides = [1, 1]} : vector<8x8xf32> to vector<1x8xf32>
    %cst_122 = arith.constant 0.215082273 : f32
    %376 = vector.broadcast %cst_122 : f32 to vector<1x8xf32>
    %377 = arith.mulf %376, %375 : vector<1x8xf32>
    %378 = arith.addf %374, %377 : vector<1x8xf32>
    %379 = vector.extract_strided_slice %363 {offsets = [4, 0], sizes = [1, 8], strides = [1, 1]} : vector<8x8xf32> to vector<1x8xf32>
    %cst_123 = arith.constant 0.268605262 : f32
    %380 = vector.broadcast %cst_123 : f32 to vector<1x8xf32>
    %381 = arith.mulf %380, %379 : vector<1x8xf32>
    %382 = arith.addf %378, %381 : vector<1x8xf32>
    %383 = vector.extract_strided_slice %363 {offsets = [5, 0], sizes = [1, 8], strides = [1, 1]} : vector<8x8xf32> to vector<1x8xf32>
    %cst_124 = arith.constant 0.215082273 : f32
    %384 = vector.broadcast %cst_124 : f32 to vector<1x8xf32>
    %385 = arith.mulf %384, %383 : vector<1x8xf32>
    %386 = arith.addf %382, %385 : vector<1x8xf32>
    %387 = vector.extract_strided_slice %363 {offsets = [6, 0], sizes = [1, 8], strides = [1, 1]} : vector<8x8xf32> to vector<1x8xf32>
    %cst_125 = arith.constant 0.110426918 : f32
    %388 = vector.broadcast %cst_125 : f32 to vector<1x8xf32>
    %389 = arith.mulf %388, %387 : vector<1x8xf32>
    %390 = arith.addf %386, %389 : vector<1x8xf32>
    %391 = vector.extract_strided_slice %363 {offsets = [7, 0], sizes = [1, 8], strides = [1, 1]} : vector<8x8xf32> to vector<1x8xf32>
    %cst_126 = arith.constant 0.0363517664 : f32
    %392 = vector.broadcast %cst_126 : f32 to vector<1x8xf32>
    %393 = arith.mulf %392, %391 : vector<1x8xf32>
    %394 = arith.addf %390, %393 : vector<1x8xf32>
    %395 = vector.extract_strided_slice %394 {offsets = [0, 0], sizes = [1, 1], strides = [1, 1]} : vector<1x8xf32> to vector<1x1xf32>
    %cst_127 = arith.constant 0.00767284352 : f32
    %396 = vector.broadcast %cst_127 : f32 to vector<1x1xf32>
    %397 = arith.mulf %396, %395 : vector<1x1xf32>
    %398 = vector.extract_strided_slice %394 {offsets = [0, 1], sizes = [1, 1], strides = [1, 1]} : vector<1x8xf32> to vector<1x1xf32>
    %cst_128 = arith.constant 0.0363517664 : f32
    %399 = vector.broadcast %cst_128 : f32 to vector<1x1xf32>
    %400 = arith.mulf %399, %398 : vector<1x1xf32>
    %401 = arith.addf %397, %400 : vector<1x1xf32>
    %402 = vector.extract_strided_slice %394 {offsets = [0, 2], sizes = [1, 1], strides = [1, 1]} : vector<1x8xf32> to vector<1x1xf32>
    %cst_129 = arith.constant 0.110426918 : f32
    %403 = vector.broadcast %cst_129 : f32 to vector<1x1xf32>
    %404 = arith.mulf %403, %402 : vector<1x1xf32>
    %405 = arith.addf %401, %404 : vector<1x1xf32>
    %406 = vector.extract_strided_slice %394 {offsets = [0, 3], sizes = [1, 1], strides = [1, 1]} : vector<1x8xf32> to vector<1x1xf32>
    %cst_130 = arith.constant 0.215082273 : f32
    %407 = vector.broadcast %cst_130 : f32 to vector<1x1xf32>
    %408 = arith.mulf %407, %406 : vector<1x1xf32>
    %409 = arith.addf %405, %408 : vector<1x1xf32>
    %410 = vector.extract_strided_slice %394 {offsets = [0, 4], sizes = [1, 1], strides = [1, 1]} : vector<1x8xf32> to vector<1x1xf32>
    %cst_131 = arith.constant 0.268605262 : f32
    %411 = vector.broadcast %cst_131 : f32 to vector<1x1xf32>
    %412 = arith.mulf %411, %410 : vector<1x1xf32>
    %413 = arith.addf %409, %412 : vector<1x1xf32>
    %414 = vector.extract_strided_slice %394 {offsets = [0, 5], sizes = [1, 1], strides = [1, 1]} : vector<1x8xf32> to vector<1x1xf32>
    %cst_132 = arith.constant 0.215082273 : f32
    %415 = vector.broadcast %cst_132 : f32 to vector<1x1xf32>
    %416 = arith.mulf %415, %414 : vector<1x1xf32>
    %417 = arith.addf %413, %416 : vector<1x1xf32>
    %418 = vector.extract_strided_slice %394 {offsets = [0, 6], sizes = [1, 1], strides = [1, 1]} : vector<1x8xf32> to vector<1x1xf32>
    %cst_133 = arith.constant 0.110426918 : f32
    %419 = vector.broadcast %cst_133 : f32 to vector<1x1xf32>
    %420 = arith.mulf %419, %418 : vector<1x1xf32>
    %421 = arith.addf %417, %420 : vector<1x1xf32>
    %422 = vector.extract_strided_slice %394 {offsets = [0, 7], sizes = [1, 1], strides = [1, 1]} : vector<1x8xf32> to vector<1x1xf32>
    %cst_134 = arith.constant 0.0363517664 : f32
    %423 = vector.broadcast %cst_134 : f32 to vector<1x1xf32>
    %424 = arith.mulf %423, %422 : vector<1x1xf32>
    %425 = arith.addf %421, %424 : vector<1x1xf32>
    %426 = arith.mulf %293, %293 : vector<1x1xf32>
    %427 = arith.subf %425, %426 : vector<1x1xf32>
    %428 = arith.mulf %165, %167 : vector<8x8xf32>
    %429 = vector.extract_strided_slice %428 {offsets = [0, 0], sizes = [1, 8], strides = [1, 1]} : vector<8x8xf32> to vector<1x8xf32>
    %cst_135 = arith.constant 0.00767284352 : f32
    %430 = vector.broadcast %cst_135 : f32 to vector<1x8xf32>
    %431 = arith.mulf %430, %429 : vector<1x8xf32>
    %432 = vector.extract_strided_slice %428 {offsets = [1, 0], sizes = [1, 8], strides = [1, 1]} : vector<8x8xf32> to vector<1x8xf32>
    %cst_136 = arith.constant 0.0363517664 : f32
    %433 = vector.broadcast %cst_136 : f32 to vector<1x8xf32>
    %434 = arith.mulf %433, %432 : vector<1x8xf32>
    %435 = arith.addf %431, %434 : vector<1x8xf32>
    %436 = vector.extract_strided_slice %428 {offsets = [2, 0], sizes = [1, 8], strides = [1, 1]} : vector<8x8xf32> to vector<1x8xf32>
    %cst_137 = arith.constant 0.110426918 : f32
    %437 = vector.broadcast %cst_137 : f32 to vector<1x8xf32>
    %438 = arith.mulf %437, %436 : vector<1x8xf32>
    %439 = arith.addf %435, %438 : vector<1x8xf32>
    %440 = vector.extract_strided_slice %428 {offsets = [3, 0], sizes = [1, 8], strides = [1, 1]} : vector<8x8xf32> to vector<1x8xf32>
    %cst_138 = arith.constant 0.215082273 : f32
    %441 = vector.broadcast %cst_138 : f32 to vector<1x8xf32>
    %442 = arith.mulf %441, %440 : vector<1x8xf32>
    %443 = arith.addf %439, %442 : vector<1x8xf32>
    %444 = vector.extract_strided_slice %428 {offsets = [4, 0], sizes = [1, 8], strides = [1, 1]} : vector<8x8xf32> to vector<1x8xf32>
    %cst_139 = arith.constant 0.268605262 : f32
    %445 = vector.broadcast %cst_139 : f32 to vector<1x8xf32>
    %446 = arith.mulf %445, %444 : vector<1x8xf32>
    %447 = arith.addf %443, %446 : vector<1x8xf32>
    %448 = vector.extract_strided_slice %428 {offsets = [5, 0], sizes = [1, 8], strides = [1, 1]} : vector<8x8xf32> to vector<1x8xf32>
    %cst_140 = arith.constant 0.215082273 : f32
    %449 = vector.broadcast %cst_140 : f32 to vector<1x8xf32>
    %450 = arith.mulf %449, %448 : vector<1x8xf32>
    %451 = arith.addf %447, %450 : vector<1x8xf32>
    %452 = vector.extract_strided_slice %428 {offsets = [6, 0], sizes = [1, 8], strides = [1, 1]} : vector<8x8xf32> to vector<1x8xf32>
    %cst_141 = arith.constant 0.110426918 : f32
    %453 = vector.broadcast %cst_141 : f32 to vector<1x8xf32>
    %454 = arith.mulf %453, %452 : vector<1x8xf32>
    %455 = arith.addf %451, %454 : vector<1x8xf32>
    %456 = vector.extract_strided_slice %428 {offsets = [7, 0], sizes = [1, 8], strides = [1, 1]} : vector<8x8xf32> to vector<1x8xf32>
    %cst_142 = arith.constant 0.0363517664 : f32
    %457 = vector.broadcast %cst_142 : f32 to vector<1x8xf32>
    %458 = arith.mulf %457, %456 : vector<1x8xf32>
    %459 = arith.addf %455, %458 : vector<1x8xf32>
    %460 = vector.extract_strided_slice %459 {offsets = [0, 0], sizes = [1, 1], strides = [1, 1]} : vector<1x8xf32> to vector<1x1xf32>
    %cst_143 = arith.constant 0.00767284352 : f32
    %461 = vector.broadcast %cst_143 : f32 to vector<1x1xf32>
    %462 = arith.mulf %461, %460 : vector<1x1xf32>
    %463 = vector.extract_strided_slice %459 {offsets = [0, 1], sizes = [1, 1], strides = [1, 1]} : vector<1x8xf32> to vector<1x1xf32>
    %cst_144 = arith.constant 0.0363517664 : f32
    %464 = vector.broadcast %cst_144 : f32 to vector<1x1xf32>
    %465 = arith.mulf %464, %463 : vector<1x1xf32>
    %466 = arith.addf %462, %465 : vector<1x1xf32>
    %467 = vector.extract_strided_slice %459 {offsets = [0, 2], sizes = [1, 1], strides = [1, 1]} : vector<1x8xf32> to vector<1x1xf32>
    %cst_145 = arith.constant 0.110426918 : f32
    %468 = vector.broadcast %cst_145 : f32 to vector<1x1xf32>
    %469 = arith.mulf %468, %467 : vector<1x1xf32>
    %470 = arith.addf %466, %469 : vector<1x1xf32>
    %471 = vector.extract_strided_slice %459 {offsets = [0, 3], sizes = [1, 1], strides = [1, 1]} : vector<1x8xf32> to vector<1x1xf32>
    %cst_146 = arith.constant 0.215082273 : f32
    %472 = vector.broadcast %cst_146 : f32 to vector<1x1xf32>
    %473 = arith.mulf %472, %471 : vector<1x1xf32>
    %474 = arith.addf %470, %473 : vector<1x1xf32>
    %475 = vector.extract_strided_slice %459 {offsets = [0, 4], sizes = [1, 1], strides = [1, 1]} : vector<1x8xf32> to vector<1x1xf32>
    %cst_147 = arith.constant 0.268605262 : f32
    %476 = vector.broadcast %cst_147 : f32 to vector<1x1xf32>
    %477 = arith.mulf %476, %475 : vector<1x1xf32>
    %478 = arith.addf %474, %477 : vector<1x1xf32>
    %479 = vector.extract_strided_slice %459 {offsets = [0, 5], sizes = [1, 1], strides = [1, 1]} : vector<1x8xf32> to vector<1x1xf32>
    %cst_148 = arith.constant 0.215082273 : f32
    %480 = vector.broadcast %cst_148 : f32 to vector<1x1xf32>
    %481 = arith.mulf %480, %479 : vector<1x1xf32>
    %482 = arith.addf %478, %481 : vector<1x1xf32>
    %483 = vector.extract_strided_slice %459 {offsets = [0, 6], sizes = [1, 1], strides = [1, 1]} : vector<1x8xf32> to vector<1x1xf32>
    %cst_149 = arith.constant 0.110426918 : f32
    %484 = vector.broadcast %cst_149 : f32 to vector<1x1xf32>
    %485 = arith.mulf %484, %483 : vector<1x1xf32>
    %486 = arith.addf %482, %485 : vector<1x1xf32>
    %487 = vector.extract_strided_slice %459 {offsets = [0, 7], sizes = [1, 1], strides = [1, 1]} : vector<1x8xf32> to vector<1x1xf32>
    %cst_150 = arith.constant 0.0363517664 : f32
    %488 = vector.broadcast %cst_150 : f32 to vector<1x1xf32>
    %489 = arith.mulf %488, %487 : vector<1x1xf32>
    %490 = arith.addf %486, %489 : vector<1x1xf32>
    %491 = arith.mulf %231, %293 : vector<1x1xf32>
    %492 = arith.subf %490, %491 : vector<1x1xf32>
    %cst_151 = arith.constant 2.000000e+00 : f32
    %493 = vector.broadcast %cst_151 : f32 to vector<1x1xf32>
    %494 = arith.mulf %493, %492 : vector<1x1xf32>
    %495 = arith.addf %494, %169 : vector<1x1xf32>
    %496 = arith.addf %362, %427 : vector<1x1xf32>
    %497 = arith.addf %496, %169 : vector<1x1xf32>
    %498 = tpu.reciprocal %497 : vector<1x1xf32> -> vector<1x1xf32>
    %499 = arith.mulf %495, %498 : vector<1x1xf32>
    %cst_152 = arith.constant 2.000000e+00 : f32
    %500 = vector.broadcast %cst_152 : f32 to vector<1x1xf32>
    %501 = arith.mulf %500, %295 : vector<1x1xf32>
    %502 = arith.mulf %501, %297 : vector<1x1xf32>
    %503 = arith.addf %502, %168 : vector<1x1xf32>
    %504 = arith.mulf %295, %295 : vector<1x1xf32>
    %505 = arith.mulf %297, %297 : vector<1x1xf32>
    %506 = arith.addf %504, %505 : vector<1x1xf32>
    %507 = arith.addf %506, %168 : vector<1x1xf32>
    %508 = arith.divf %503, %507 : vector<1x1xf32>
    %509 = arith.mulf %499, %508 : vector<1x1xf32>
    %510 = vector.shape_cast %509 : vector<1x1xf32> to vector<1x1x1xf32>
    %cst_153 = arith.constant dense<0.000000e+00> : vector<1xf32>
    %511 = vector.multi_reduction <add>, %510, %cst_153 [1, 2] : vector<1x1x1xf32> to vector<1xf32>
    %512 = vector.shape_cast %511 : vector<1xf32> to vector<1x1x1xf32>
    %513 = vector.extract %512[0, 0, 0] : f32 from vector<1x1x1xf32>
    %514 = vector.broadcast %513 : f32 to vector<1x1xf32>
    %515 = vector.shape_cast %499 : vector<1x1xf32> to vector<1x1x1xf32>
    %cst_154 = arith.constant dense<0.000000e+00> : vector<1xf32>
    %516 = vector.multi_reduction <add>, %515, %cst_154 [1, 2] : vector<1x1x1xf32> to vector<1xf32>
    %517 = vector.shape_cast %516 : vector<1xf32> to vector<1x1x1xf32>
    %518 = vector.extract %517[0, 0, 0] : f32 from vector<1x1x1xf32>
    %519 = vector.broadcast %518 : f32 to vector<1x1xf32>
    %c0_155 = arith.constant 0 : index
    %c0_156 = arith.constant 0 : index
    %520 = vector.load %arg10[%c0_155, %c0_156] : memref<4x8xf32, #tpu.memory_space<vmem>>, vector<4x8xf32>
    %c0_157 = arith.constant 0 : index
    %c0_158 = arith.constant 0 : index
    %521 = vector.load %arg14[%c0_157, %c0_158] : memref<8x4xf32, #tpu.memory_space<vmem>>, vector<8x4xf32>
    %cst_159 = arith.constant dense<0.000000e+00> : vector<4x8xf32>
    %522 = tpu.matmul %520, %165, %cst_159 {dimension_numbers = #tpu.dot_dimension_numbers<[1], [0], [0], [1], [0, 0, 1, 1], [], []>} : vector<4x8xf32>, vector<8x8xf32>, vector<4x8xf32> -> vector<4x8xf32>
    %cst_160 = arith.constant dense<0.000000e+00> : vector<4x4xf32>
    %523 = tpu.matmul %522, %521, %cst_160 {dimension_numbers = #tpu.dot_dimension_numbers<[1], [0], [0], [1], [0, 0, 1, 1], [], []>} : vector<4x8xf32>, vector<8x4xf32>, vector<4x4xf32> -> vector<4x4xf32>
    %cst_161 = arith.constant dense<0.000000e+00> : vector<4x8xf32>
    %524 = tpu.matmul %520, %167, %cst_161 {dimension_numbers = #tpu.dot_dimension_numbers<[1], [0], [0], [1], [0, 0, 1, 1], [], []>} : vector<4x8xf32>, vector<8x8xf32>, vector<4x8xf32> -> vector<4x8xf32>
    %cst_162 = arith.constant dense<0.000000e+00> : vector<4x4xf32>
    %525 = tpu.matmul %524, %521, %cst_162 {dimension_numbers = #tpu.dot_dimension_numbers<[1], [0], [0], [1], [0, 0, 1, 1], [], []>} : vector<4x8xf32>, vector<8x4xf32>, vector<4x4xf32> -> vector<4x4xf32>
    %c3 = arith.constant 3 : index
    %c0_163 = arith.constant 0 : index
    %526 = vector.load %arg1[%c3, %c0_163] : memref<5x2xf32, #tpu.memory_space<vmem>>, vector<1x1xf32>
    %c3_164 = arith.constant 3 : index
    %c1_165 = arith.constant 1 : index
    %527 = vector.load %arg1[%c3_164, %c1_165] : memref<5x2xf32, #tpu.memory_space<vmem>>, vector<1x1xf32>
    %528 = vector.extract_strided_slice %523 {offsets = [0, 0], sizes = [1, 4], strides = [1, 1]} : vector<4x4xf32> to vector<1x4xf32>
    %cst_166 = arith.constant 0.136464864 : f32
    %529 = vector.broadcast %cst_166 : f32 to vector<1x4xf32>
    %530 = arith.mulf %529, %528 : vector<1x4xf32>
    %531 = vector.extract_strided_slice %523 {offsets = [1, 0], sizes = [1, 4], strides = [1, 1]} : vector<4x4xf32> to vector<1x4xf32>
    %cst_167 = arith.constant 0.265797257 : f32
    %532 = vector.broadcast %cst_167 : f32 to vector<1x4xf32>
    %533 = arith.mulf %532, %531 : vector<1x4xf32>
    %534 = arith.addf %530, %533 : vector<1x4xf32>
    %535 = vector.extract_strided_slice %523 {offsets = [2, 0], sizes = [1, 4], strides = [1, 1]} : vector<4x4xf32> to vector<1x4xf32>
    %cst_168 = arith.constant 0.331940621 : f32
    %536 = vector.broadcast %cst_168 : f32 to vector<1x4xf32>
    %537 = arith.mulf %536, %535 : vector<1x4xf32>
    %538 = arith.addf %534, %537 : vector<1x4xf32>
    %539 = vector.extract_strided_slice %523 {offsets = [3, 0], sizes = [1, 4], strides = [1, 1]} : vector<4x4xf32> to vector<1x4xf32>
    %cst_169 = arith.constant 0.265797257 : f32
    %540 = vector.broadcast %cst_169 : f32 to vector<1x4xf32>
    %541 = arith.mulf %540, %539 : vector<1x4xf32>
    %542 = arith.addf %538, %541 : vector<1x4xf32>
    %543 = vector.extract_strided_slice %542 {offsets = [0, 0], sizes = [1, 1], strides = [1, 1]} : vector<1x4xf32> to vector<1x1xf32>
    %cst_170 = arith.constant 0.136464864 : f32
    %544 = vector.broadcast %cst_170 : f32 to vector<1x1xf32>
    %545 = arith.mulf %544, %543 : vector<1x1xf32>
    %546 = vector.extract_strided_slice %542 {offsets = [0, 1], sizes = [1, 1], strides = [1, 1]} : vector<1x4xf32> to vector<1x1xf32>
    %cst_171 = arith.constant 0.265797257 : f32
    %547 = vector.broadcast %cst_171 : f32 to vector<1x1xf32>
    %548 = arith.mulf %547, %546 : vector<1x1xf32>
    %549 = arith.addf %545, %548 : vector<1x1xf32>
    %550 = vector.extract_strided_slice %542 {offsets = [0, 2], sizes = [1, 1], strides = [1, 1]} : vector<1x4xf32> to vector<1x1xf32>
    %cst_172 = arith.constant 0.331940621 : f32
    %551 = vector.broadcast %cst_172 : f32 to vector<1x1xf32>
    %552 = arith.mulf %551, %550 : vector<1x1xf32>
    %553 = arith.addf %549, %552 : vector<1x1xf32>
    %554 = vector.extract_strided_slice %542 {offsets = [0, 3], sizes = [1, 1], strides = [1, 1]} : vector<1x4xf32> to vector<1x1xf32>
    %cst_173 = arith.constant 0.265797257 : f32
    %555 = vector.broadcast %cst_173 : f32 to vector<1x1xf32>
    %556 = arith.mulf %555, %554 : vector<1x1xf32>
    %557 = arith.addf %553, %556 : vector<1x1xf32>
    %558 = vector.extract_strided_slice %525 {offsets = [0, 0], sizes = [1, 4], strides = [1, 1]} : vector<4x4xf32> to vector<1x4xf32>
    %cst_174 = arith.constant 0.136464864 : f32
    %559 = vector.broadcast %cst_174 : f32 to vector<1x4xf32>
    %560 = arith.mulf %559, %558 : vector<1x4xf32>
    %561 = vector.extract_strided_slice %525 {offsets = [1, 0], sizes = [1, 4], strides = [1, 1]} : vector<4x4xf32> to vector<1x4xf32>
    %cst_175 = arith.constant 0.265797257 : f32
    %562 = vector.broadcast %cst_175 : f32 to vector<1x4xf32>
    %563 = arith.mulf %562, %561 : vector<1x4xf32>
    %564 = arith.addf %560, %563 : vector<1x4xf32>
    %565 = vector.extract_strided_slice %525 {offsets = [2, 0], sizes = [1, 4], strides = [1, 1]} : vector<4x4xf32> to vector<1x4xf32>
    %cst_176 = arith.constant 0.331940621 : f32
    %566 = vector.broadcast %cst_176 : f32 to vector<1x4xf32>
    %567 = arith.mulf %566, %565 : vector<1x4xf32>
    %568 = arith.addf %564, %567 : vector<1x4xf32>
    %569 = vector.extract_strided_slice %525 {offsets = [3, 0], sizes = [1, 4], strides = [1, 1]} : vector<4x4xf32> to vector<1x4xf32>
    %cst_177 = arith.constant 0.265797257 : f32
    %570 = vector.broadcast %cst_177 : f32 to vector<1x4xf32>
    %571 = arith.mulf %570, %569 : vector<1x4xf32>
    %572 = arith.addf %568, %571 : vector<1x4xf32>
    %573 = vector.extract_strided_slice %572 {offsets = [0, 0], sizes = [1, 1], strides = [1, 1]} : vector<1x4xf32> to vector<1x1xf32>
    %cst_178 = arith.constant 0.136464864 : f32
    %574 = vector.broadcast %cst_178 : f32 to vector<1x1xf32>
    %575 = arith.mulf %574, %573 : vector<1x1xf32>
    %576 = vector.extract_strided_slice %572 {offsets = [0, 1], sizes = [1, 1], strides = [1, 1]} : vector<1x4xf32> to vector<1x1xf32>
    %cst_179 = arith.constant 0.265797257 : f32
    %577 = vector.broadcast %cst_179 : f32 to vector<1x1xf32>
    %578 = arith.mulf %577, %576 : vector<1x1xf32>
    %579 = arith.addf %575, %578 : vector<1x1xf32>
    %580 = vector.extract_strided_slice %572 {offsets = [0, 2], sizes = [1, 1], strides = [1, 1]} : vector<1x4xf32> to vector<1x1xf32>
    %cst_180 = arith.constant 0.331940621 : f32
    %581 = vector.broadcast %cst_180 : f32 to vector<1x1xf32>
    %582 = arith.mulf %581, %580 : vector<1x1xf32>
    %583 = arith.addf %579, %582 : vector<1x1xf32>
    %584 = vector.extract_strided_slice %572 {offsets = [0, 3], sizes = [1, 1], strides = [1, 1]} : vector<1x4xf32> to vector<1x1xf32>
    %cst_181 = arith.constant 0.265797257 : f32
    %585 = vector.broadcast %cst_181 : f32 to vector<1x1xf32>
    %586 = arith.mulf %585, %584 : vector<1x1xf32>
    %587 = arith.addf %583, %586 : vector<1x1xf32>
    %588 = vector.broadcast %15 : f32 to vector<1x1xf32>
    %589 = arith.addf %557, %588 : vector<1x1xf32>
    %590 = vector.broadcast %15 : f32 to vector<1x1xf32>
    %591 = arith.addf %587, %590 : vector<1x1xf32>
    %592 = arith.mulf %523, %523 : vector<4x4xf32>
    %593 = vector.extract_strided_slice %592 {offsets = [0, 0], sizes = [1, 4], strides = [1, 1]} : vector<4x4xf32> to vector<1x4xf32>
    %cst_182 = arith.constant 0.136464864 : f32
    %594 = vector.broadcast %cst_182 : f32 to vector<1x4xf32>
    %595 = arith.mulf %594, %593 : vector<1x4xf32>
    %596 = vector.extract_strided_slice %592 {offsets = [1, 0], sizes = [1, 4], strides = [1, 1]} : vector<4x4xf32> to vector<1x4xf32>
    %cst_183 = arith.constant 0.265797257 : f32
    %597 = vector.broadcast %cst_183 : f32 to vector<1x4xf32>
    %598 = arith.mulf %597, %596 : vector<1x4xf32>
    %599 = arith.addf %595, %598 : vector<1x4xf32>
    %600 = vector.extract_strided_slice %592 {offsets = [2, 0], sizes = [1, 4], strides = [1, 1]} : vector<4x4xf32> to vector<1x4xf32>
    %cst_184 = arith.constant 0.331940621 : f32
    %601 = vector.broadcast %cst_184 : f32 to vector<1x4xf32>
    %602 = arith.mulf %601, %600 : vector<1x4xf32>
    %603 = arith.addf %599, %602 : vector<1x4xf32>
    %604 = vector.extract_strided_slice %592 {offsets = [3, 0], sizes = [1, 4], strides = [1, 1]} : vector<4x4xf32> to vector<1x4xf32>
    %cst_185 = arith.constant 0.265797257 : f32
    %605 = vector.broadcast %cst_185 : f32 to vector<1x4xf32>
    %606 = arith.mulf %605, %604 : vector<1x4xf32>
    %607 = arith.addf %603, %606 : vector<1x4xf32>
    %608 = vector.extract_strided_slice %607 {offsets = [0, 0], sizes = [1, 1], strides = [1, 1]} : vector<1x4xf32> to vector<1x1xf32>
    %cst_186 = arith.constant 0.136464864 : f32
    %609 = vector.broadcast %cst_186 : f32 to vector<1x1xf32>
    %610 = arith.mulf %609, %608 : vector<1x1xf32>
    %611 = vector.extract_strided_slice %607 {offsets = [0, 1], sizes = [1, 1], strides = [1, 1]} : vector<1x4xf32> to vector<1x1xf32>
    %cst_187 = arith.constant 0.265797257 : f32
    %612 = vector.broadcast %cst_187 : f32 to vector<1x1xf32>
    %613 = arith.mulf %612, %611 : vector<1x1xf32>
    %614 = arith.addf %610, %613 : vector<1x1xf32>
    %615 = vector.extract_strided_slice %607 {offsets = [0, 2], sizes = [1, 1], strides = [1, 1]} : vector<1x4xf32> to vector<1x1xf32>
    %cst_188 = arith.constant 0.331940621 : f32
    %616 = vector.broadcast %cst_188 : f32 to vector<1x1xf32>
    %617 = arith.mulf %616, %615 : vector<1x1xf32>
    %618 = arith.addf %614, %617 : vector<1x1xf32>
    %619 = vector.extract_strided_slice %607 {offsets = [0, 3], sizes = [1, 1], strides = [1, 1]} : vector<1x4xf32> to vector<1x1xf32>
    %cst_189 = arith.constant 0.265797257 : f32
    %620 = vector.broadcast %cst_189 : f32 to vector<1x1xf32>
    %621 = arith.mulf %620, %619 : vector<1x1xf32>
    %622 = arith.addf %618, %621 : vector<1x1xf32>
    %623 = arith.mulf %557, %557 : vector<1x1xf32>
    %624 = arith.subf %622, %623 : vector<1x1xf32>
    %625 = arith.mulf %525, %525 : vector<4x4xf32>
    %626 = vector.extract_strided_slice %625 {offsets = [0, 0], sizes = [1, 4], strides = [1, 1]} : vector<4x4xf32> to vector<1x4xf32>
    %cst_190 = arith.constant 0.136464864 : f32
    %627 = vector.broadcast %cst_190 : f32 to vector<1x4xf32>
    %628 = arith.mulf %627, %626 : vector<1x4xf32>
    %629 = vector.extract_strided_slice %625 {offsets = [1, 0], sizes = [1, 4], strides = [1, 1]} : vector<4x4xf32> to vector<1x4xf32>
    %cst_191 = arith.constant 0.265797257 : f32
    %630 = vector.broadcast %cst_191 : f32 to vector<1x4xf32>
    %631 = arith.mulf %630, %629 : vector<1x4xf32>
    %632 = arith.addf %628, %631 : vector<1x4xf32>
    %633 = vector.extract_strided_slice %625 {offsets = [2, 0], sizes = [1, 4], strides = [1, 1]} : vector<4x4xf32> to vector<1x4xf32>
    %cst_192 = arith.constant 0.331940621 : f32
    %634 = vector.broadcast %cst_192 : f32 to vector<1x4xf32>
    %635 = arith.mulf %634, %633 : vector<1x4xf32>
    %636 = arith.addf %632, %635 : vector<1x4xf32>
    %637 = vector.extract_strided_slice %625 {offsets = [3, 0], sizes = [1, 4], strides = [1, 1]} : vector<4x4xf32> to vector<1x4xf32>
    %cst_193 = arith.constant 0.265797257 : f32
    %638 = vector.broadcast %cst_193 : f32 to vector<1x4xf32>
    %639 = arith.mulf %638, %637 : vector<1x4xf32>
    %640 = arith.addf %636, %639 : vector<1x4xf32>
    %641 = vector.extract_strided_slice %640 {offsets = [0, 0], sizes = [1, 1], strides = [1, 1]} : vector<1x4xf32> to vector<1x1xf32>
    %cst_194 = arith.constant 0.136464864 : f32
    %642 = vector.broadcast %cst_194 : f32 to vector<1x1xf32>
    %643 = arith.mulf %642, %641 : vector<1x1xf32>
    %644 = vector.extract_strided_slice %640 {offsets = [0, 1], sizes = [1, 1], strides = [1, 1]} : vector<1x4xf32> to vector<1x1xf32>
    %cst_195 = arith.constant 0.265797257 : f32
    %645 = vector.broadcast %cst_195 : f32 to vector<1x1xf32>
    %646 = arith.mulf %645, %644 : vector<1x1xf32>
    %647 = arith.addf %643, %646 : vector<1x1xf32>
    %648 = vector.extract_strided_slice %640 {offsets = [0, 2], sizes = [1, 1], strides = [1, 1]} : vector<1x4xf32> to vector<1x1xf32>
    %cst_196 = arith.constant 0.331940621 : f32
    %649 = vector.broadcast %cst_196 : f32 to vector<1x1xf32>
    %650 = arith.mulf %649, %648 : vector<1x1xf32>
    %651 = arith.addf %647, %650 : vector<1x1xf32>
    %652 = vector.extract_strided_slice %640 {offsets = [0, 3], sizes = [1, 1], strides = [1, 1]} : vector<1x4xf32> to vector<1x1xf32>
    %cst_197 = arith.constant 0.265797257 : f32
    %653 = vector.broadcast %cst_197 : f32 to vector<1x1xf32>
    %654 = arith.mulf %653, %652 : vector<1x1xf32>
    %655 = arith.addf %651, %654 : vector<1x1xf32>
    %656 = arith.mulf %587, %587 : vector<1x1xf32>
    %657 = arith.subf %655, %656 : vector<1x1xf32>
    %658 = arith.mulf %523, %525 : vector<4x4xf32>
    %659 = vector.extract_strided_slice %658 {offsets = [0, 0], sizes = [1, 4], strides = [1, 1]} : vector<4x4xf32> to vector<1x4xf32>
    %cst_198 = arith.constant 0.136464864 : f32
    %660 = vector.broadcast %cst_198 : f32 to vector<1x4xf32>
    %661 = arith.mulf %660, %659 : vector<1x4xf32>
    %662 = vector.extract_strided_slice %658 {offsets = [1, 0], sizes = [1, 4], strides = [1, 1]} : vector<4x4xf32> to vector<1x4xf32>
    %cst_199 = arith.constant 0.265797257 : f32
    %663 = vector.broadcast %cst_199 : f32 to vector<1x4xf32>
    %664 = arith.mulf %663, %662 : vector<1x4xf32>
    %665 = arith.addf %661, %664 : vector<1x4xf32>
    %666 = vector.extract_strided_slice %658 {offsets = [2, 0], sizes = [1, 4], strides = [1, 1]} : vector<4x4xf32> to vector<1x4xf32>
    %cst_200 = arith.constant 0.331940621 : f32
    %667 = vector.broadcast %cst_200 : f32 to vector<1x4xf32>
    %668 = arith.mulf %667, %666 : vector<1x4xf32>
    %669 = arith.addf %665, %668 : vector<1x4xf32>
    %670 = vector.extract_strided_slice %658 {offsets = [3, 0], sizes = [1, 4], strides = [1, 1]} : vector<4x4xf32> to vector<1x4xf32>
    %cst_201 = arith.constant 0.265797257 : f32
    %671 = vector.broadcast %cst_201 : f32 to vector<1x4xf32>
    %672 = arith.mulf %671, %670 : vector<1x4xf32>
    %673 = arith.addf %669, %672 : vector<1x4xf32>
    %674 = vector.extract_strided_slice %673 {offsets = [0, 0], sizes = [1, 1], strides = [1, 1]} : vector<1x4xf32> to vector<1x1xf32>
    %cst_202 = arith.constant 0.136464864 : f32
    %675 = vector.broadcast %cst_202 : f32 to vector<1x1xf32>
    %676 = arith.mulf %675, %674 : vector<1x1xf32>
    %677 = vector.extract_strided_slice %673 {offsets = [0, 1], sizes = [1, 1], strides = [1, 1]} : vector<1x4xf32> to vector<1x1xf32>
    %cst_203 = arith.constant 0.265797257 : f32
    %678 = vector.broadcast %cst_203 : f32 to vector<1x1xf32>
    %679 = arith.mulf %678, %677 : vector<1x1xf32>
    %680 = arith.addf %676, %679 : vector<1x1xf32>
    %681 = vector.extract_strided_slice %673 {offsets = [0, 2], sizes = [1, 1], strides = [1, 1]} : vector<1x4xf32> to vector<1x1xf32>
    %cst_204 = arith.constant 0.331940621 : f32
    %682 = vector.broadcast %cst_204 : f32 to vector<1x1xf32>
    %683 = arith.mulf %682, %681 : vector<1x1xf32>
    %684 = arith.addf %680, %683 : vector<1x1xf32>
    %685 = vector.extract_strided_slice %673 {offsets = [0, 3], sizes = [1, 1], strides = [1, 1]} : vector<1x4xf32> to vector<1x1xf32>
    %cst_205 = arith.constant 0.265797257 : f32
    %686 = vector.broadcast %cst_205 : f32 to vector<1x1xf32>
    %687 = arith.mulf %686, %685 : vector<1x1xf32>
    %688 = arith.addf %684, %687 : vector<1x1xf32>
    %689 = arith.mulf %557, %587 : vector<1x1xf32>
    %690 = arith.subf %688, %689 : vector<1x1xf32>
    %cst_206 = arith.constant 2.000000e+00 : f32
    %691 = vector.broadcast %cst_206 : f32 to vector<1x1xf32>
    %692 = arith.mulf %691, %690 : vector<1x1xf32>
    %693 = arith.addf %692, %527 : vector<1x1xf32>
    %694 = arith.addf %624, %657 : vector<1x1xf32>
    %695 = arith.addf %694, %527 : vector<1x1xf32>
    %696 = tpu.reciprocal %695 : vector<1x1xf32> -> vector<1x1xf32>
    %697 = arith.mulf %693, %696 : vector<1x1xf32>
    %cst_207 = arith.constant 2.000000e+00 : f32
    %698 = vector.broadcast %cst_207 : f32 to vector<1x1xf32>
    %699 = arith.mulf %698, %589 : vector<1x1xf32>
    %700 = arith.mulf %699, %591 : vector<1x1xf32>
    %701 = arith.addf %700, %526 : vector<1x1xf32>
    %702 = arith.mulf %589, %589 : vector<1x1xf32>
    %703 = arith.mulf %591, %591 : vector<1x1xf32>
    %704 = arith.addf %702, %703 : vector<1x1xf32>
    %705 = arith.addf %704, %526 : vector<1x1xf32>
    %706 = arith.divf %701, %705 : vector<1x1xf32>
    %707 = arith.mulf %697, %706 : vector<1x1xf32>
    %708 = vector.shape_cast %707 : vector<1x1xf32> to vector<1x1x1xf32>
    %cst_208 = arith.constant dense<0.000000e+00> : vector<1xf32>
    %709 = vector.multi_reduction <add>, %708, %cst_208 [1, 2] : vector<1x1x1xf32> to vector<1xf32>
    %710 = vector.shape_cast %709 : vector<1xf32> to vector<1x1x1xf32>
    %711 = vector.extract %710[0, 0, 0] : f32 from vector<1x1x1xf32>
    %712 = vector.broadcast %711 : f32 to vector<1x1xf32>
    %713 = vector.shape_cast %697 : vector<1x1xf32> to vector<1x1x1xf32>
    %cst_209 = arith.constant dense<0.000000e+00> : vector<1xf32>
    %714 = vector.multi_reduction <add>, %713, %cst_209 [1, 2] : vector<1x1x1xf32> to vector<1xf32>
    %715 = vector.shape_cast %714 : vector<1xf32> to vector<1x1x1xf32>
    %716 = vector.extract %715[0, 0, 0] : f32 from vector<1x1x1xf32>
    %717 = vector.broadcast %716 : f32 to vector<1x1xf32>
    %c0_210 = arith.constant 0 : index
    %c0_211 = arith.constant 0 : index
    %718 = vector.load %arg11[%c0_210, %c0_211] : memref<2x4xf32, #tpu.memory_space<vmem>>, vector<2x4xf32>
    %c0_212 = arith.constant 0 : index
    %c0_213 = arith.constant 0 : index
    %719 = vector.load %arg15[%c0_212, %c0_213] : memref<4x2xf32, #tpu.memory_space<vmem>>, vector<4x2xf32>
    %cst_214 = arith.constant dense<0.000000e+00> : vector<2x4xf32>
    %720 = tpu.matmul %718, %523, %cst_214 {dimension_numbers = #tpu.dot_dimension_numbers<[1], [0], [0], [1], [0, 0, 1, 1], [], []>} : vector<2x4xf32>, vector<4x4xf32>, vector<2x4xf32> -> vector<2x4xf32>
    %cst_215 = arith.constant dense<0.000000e+00> : vector<2x2xf32>
    %721 = tpu.matmul %720, %719, %cst_215 {dimension_numbers = #tpu.dot_dimension_numbers<[1], [0], [0], [1], [0, 0, 1, 1], [], []>} : vector<2x4xf32>, vector<4x2xf32>, vector<2x2xf32> -> vector<2x2xf32>
    %cst_216 = arith.constant dense<0.000000e+00> : vector<2x4xf32>
    %722 = tpu.matmul %718, %525, %cst_216 {dimension_numbers = #tpu.dot_dimension_numbers<[1], [0], [0], [1], [0, 0, 1, 1], [], []>} : vector<2x4xf32>, vector<4x4xf32>, vector<2x4xf32> -> vector<2x4xf32>
    %cst_217 = arith.constant dense<0.000000e+00> : vector<2x2xf32>
    %723 = tpu.matmul %722, %719, %cst_217 {dimension_numbers = #tpu.dot_dimension_numbers<[1], [0], [0], [1], [0, 0, 1, 1], [], []>} : vector<2x4xf32>, vector<4x2xf32>, vector<2x2xf32> -> vector<2x2xf32>
    %c4 = arith.constant 4 : index
    %c0_218 = arith.constant 0 : index
    %724 = vector.load %arg1[%c4, %c0_218] : memref<5x2xf32, #tpu.memory_space<vmem>>, vector<1x1xf32>
    %c4_219 = arith.constant 4 : index
    %c1_220 = arith.constant 1 : index
    %725 = vector.load %arg1[%c4_219, %c1_220] : memref<5x2xf32, #tpu.memory_space<vmem>>, vector<1x1xf32>
    %726 = vector.extract_strided_slice %721 {offsets = [0, 0], sizes = [1, 2], strides = [1, 1]} : vector<2x2xf32> to vector<1x2xf32>
    %cst_221 = arith.constant 0.444671959 : f32
    %727 = vector.broadcast %cst_221 : f32 to vector<1x2xf32>
    %728 = arith.mulf %727, %726 : vector<1x2xf32>
    %729 = vector.extract_strided_slice %721 {offsets = [1, 0], sizes = [1, 2], strides = [1, 1]} : vector<2x2xf32> to vector<1x2xf32>
    %cst_222 = arith.constant 0.555328071 : f32
    %730 = vector.broadcast %cst_222 : f32 to vector<1x2xf32>
    %731 = arith.mulf %730, %729 : vector<1x2xf32>
    %732 = arith.addf %728, %731 : vector<1x2xf32>
    %733 = vector.extract_strided_slice %732 {offsets = [0, 0], sizes = [1, 1], strides = [1, 1]} : vector<1x2xf32> to vector<1x1xf32>
    %cst_223 = arith.constant 0.444671959 : f32
    %734 = vector.broadcast %cst_223 : f32 to vector<1x1xf32>
    %735 = arith.mulf %734, %733 : vector<1x1xf32>
    %736 = vector.extract_strided_slice %732 {offsets = [0, 1], sizes = [1, 1], strides = [1, 1]} : vector<1x2xf32> to vector<1x1xf32>
    %cst_224 = arith.constant 0.555328071 : f32
    %737 = vector.broadcast %cst_224 : f32 to vector<1x1xf32>
    %738 = arith.mulf %737, %736 : vector<1x1xf32>
    %739 = arith.addf %735, %738 : vector<1x1xf32>
    %740 = vector.extract_strided_slice %723 {offsets = [0, 0], sizes = [1, 2], strides = [1, 1]} : vector<2x2xf32> to vector<1x2xf32>
    %cst_225 = arith.constant 0.444671959 : f32
    %741 = vector.broadcast %cst_225 : f32 to vector<1x2xf32>
    %742 = arith.mulf %741, %740 : vector<1x2xf32>
    %743 = vector.extract_strided_slice %723 {offsets = [1, 0], sizes = [1, 2], strides = [1, 1]} : vector<2x2xf32> to vector<1x2xf32>
    %cst_226 = arith.constant 0.555328071 : f32
    %744 = vector.broadcast %cst_226 : f32 to vector<1x2xf32>
    %745 = arith.mulf %744, %743 : vector<1x2xf32>
    %746 = arith.addf %742, %745 : vector<1x2xf32>
    %747 = vector.extract_strided_slice %746 {offsets = [0, 0], sizes = [1, 1], strides = [1, 1]} : vector<1x2xf32> to vector<1x1xf32>
    %cst_227 = arith.constant 0.444671959 : f32
    %748 = vector.broadcast %cst_227 : f32 to vector<1x1xf32>
    %749 = arith.mulf %748, %747 : vector<1x1xf32>
    %750 = vector.extract_strided_slice %746 {offsets = [0, 1], sizes = [1, 1], strides = [1, 1]} : vector<1x2xf32> to vector<1x1xf32>
    %cst_228 = arith.constant 0.555328071 : f32
    %751 = vector.broadcast %cst_228 : f32 to vector<1x1xf32>
    %752 = arith.mulf %751, %750 : vector<1x1xf32>
    %753 = arith.addf %749, %752 : vector<1x1xf32>
    %754 = vector.broadcast %15 : f32 to vector<1x1xf32>
    %755 = arith.addf %739, %754 : vector<1x1xf32>
    %756 = vector.broadcast %15 : f32 to vector<1x1xf32>
    %757 = arith.addf %753, %756 : vector<1x1xf32>
    %758 = arith.mulf %721, %721 : vector<2x2xf32>
    %759 = vector.extract_strided_slice %758 {offsets = [0, 0], sizes = [1, 2], strides = [1, 1]} : vector<2x2xf32> to vector<1x2xf32>
    %cst_229 = arith.constant 0.444671959 : f32
    %760 = vector.broadcast %cst_229 : f32 to vector<1x2xf32>
    %761 = arith.mulf %760, %759 : vector<1x2xf32>
    %762 = vector.extract_strided_slice %758 {offsets = [1, 0], sizes = [1, 2], strides = [1, 1]} : vector<2x2xf32> to vector<1x2xf32>
    %cst_230 = arith.constant 0.555328071 : f32
    %763 = vector.broadcast %cst_230 : f32 to vector<1x2xf32>
    %764 = arith.mulf %763, %762 : vector<1x2xf32>
    %765 = arith.addf %761, %764 : vector<1x2xf32>
    %766 = vector.extract_strided_slice %765 {offsets = [0, 0], sizes = [1, 1], strides = [1, 1]} : vector<1x2xf32> to vector<1x1xf32>
    %cst_231 = arith.constant 0.444671959 : f32
    %767 = vector.broadcast %cst_231 : f32 to vector<1x1xf32>
    %768 = arith.mulf %767, %766 : vector<1x1xf32>
    %769 = vector.extract_strided_slice %765 {offsets = [0, 1], sizes = [1, 1], strides = [1, 1]} : vector<1x2xf32> to vector<1x1xf32>
    %cst_232 = arith.constant 0.555328071 : f32
    %770 = vector.broadcast %cst_232 : f32 to vector<1x1xf32>
    %771 = arith.mulf %770, %769 : vector<1x1xf32>
    %772 = arith.addf %768, %771 : vector<1x1xf32>
    %773 = arith.mulf %739, %739 : vector<1x1xf32>
    %774 = arith.subf %772, %773 : vector<1x1xf32>
    %775 = arith.mulf %723, %723 : vector<2x2xf32>
    %776 = vector.extract_strided_slice %775 {offsets = [0, 0], sizes = [1, 2], strides = [1, 1]} : vector<2x2xf32> to vector<1x2xf32>
    %cst_233 = arith.constant 0.444671959 : f32
    %777 = vector.broadcast %cst_233 : f32 to vector<1x2xf32>
    %778 = arith.mulf %777, %776 : vector<1x2xf32>
    %779 = vector.extract_strided_slice %775 {offsets = [1, 0], sizes = [1, 2], strides = [1, 1]} : vector<2x2xf32> to vector<1x2xf32>
    %cst_234 = arith.constant 0.555328071 : f32
    %780 = vector.broadcast %cst_234 : f32 to vector<1x2xf32>
    %781 = arith.mulf %780, %779 : vector<1x2xf32>
    %782 = arith.addf %778, %781 : vector<1x2xf32>
    %783 = vector.extract_strided_slice %782 {offsets = [0, 0], sizes = [1, 1], strides = [1, 1]} : vector<1x2xf32> to vector<1x1xf32>
    %cst_235 = arith.constant 0.444671959 : f32
    %784 = vector.broadcast %cst_235 : f32 to vector<1x1xf32>
    %785 = arith.mulf %784, %783 : vector<1x1xf32>
    %786 = vector.extract_strided_slice %782 {offsets = [0, 1], sizes = [1, 1], strides = [1, 1]} : vector<1x2xf32> to vector<1x1xf32>
    %cst_236 = arith.constant 0.555328071 : f32
    %787 = vector.broadcast %cst_236 : f32 to vector<1x1xf32>
    %788 = arith.mulf %787, %786 : vector<1x1xf32>
    %789 = arith.addf %785, %788 : vector<1x1xf32>
    %790 = arith.mulf %753, %753 : vector<1x1xf32>
    %791 = arith.subf %789, %790 : vector<1x1xf32>
    %792 = arith.mulf %721, %723 : vector<2x2xf32>
    %793 = vector.extract_strided_slice %792 {offsets = [0, 0], sizes = [1, 2], strides = [1, 1]} : vector<2x2xf32> to vector<1x2xf32>
    %cst_237 = arith.constant 0.444671959 : f32
    %794 = vector.broadcast %cst_237 : f32 to vector<1x2xf32>
    %795 = arith.mulf %794, %793 : vector<1x2xf32>
    %796 = vector.extract_strided_slice %792 {offsets = [1, 0], sizes = [1, 2], strides = [1, 1]} : vector<2x2xf32> to vector<1x2xf32>
    %cst_238 = arith.constant 0.555328071 : f32
    %797 = vector.broadcast %cst_238 : f32 to vector<1x2xf32>
    %798 = arith.mulf %797, %796 : vector<1x2xf32>
    %799 = arith.addf %795, %798 : vector<1x2xf32>
    %800 = vector.extract_strided_slice %799 {offsets = [0, 0], sizes = [1, 1], strides = [1, 1]} : vector<1x2xf32> to vector<1x1xf32>
    %cst_239 = arith.constant 0.444671959 : f32
    %801 = vector.broadcast %cst_239 : f32 to vector<1x1xf32>
    %802 = arith.mulf %801, %800 : vector<1x1xf32>
    %803 = vector.extract_strided_slice %799 {offsets = [0, 1], sizes = [1, 1], strides = [1, 1]} : vector<1x2xf32> to vector<1x1xf32>
    %cst_240 = arith.constant 0.555328071 : f32
    %804 = vector.broadcast %cst_240 : f32 to vector<1x1xf32>
    %805 = arith.mulf %804, %803 : vector<1x1xf32>
    %806 = arith.addf %802, %805 : vector<1x1xf32>
    %807 = arith.mulf %739, %753 : vector<1x1xf32>
    %808 = arith.subf %806, %807 : vector<1x1xf32>
    %cst_241 = arith.constant 2.000000e+00 : f32
    %809 = vector.broadcast %cst_241 : f32 to vector<1x1xf32>
    %810 = arith.mulf %809, %808 : vector<1x1xf32>
    %811 = arith.addf %810, %725 : vector<1x1xf32>
    %812 = arith.addf %774, %791 : vector<1x1xf32>
    %813 = arith.addf %812, %725 : vector<1x1xf32>
    %814 = tpu.reciprocal %813 : vector<1x1xf32> -> vector<1x1xf32>
    %815 = arith.mulf %811, %814 : vector<1x1xf32>
    %cst_242 = arith.constant 2.000000e+00 : f32
    %816 = vector.broadcast %cst_242 : f32 to vector<1x1xf32>
    %817 = arith.mulf %816, %755 : vector<1x1xf32>
    %818 = arith.mulf %817, %757 : vector<1x1xf32>
    %819 = arith.addf %818, %724 : vector<1x1xf32>
    %820 = arith.mulf %755, %755 : vector<1x1xf32>
    %821 = arith.mulf %757, %757 : vector<1x1xf32>
    %822 = arith.addf %820, %821 : vector<1x1xf32>
    %823 = arith.addf %822, %724 : vector<1x1xf32>
    %824 = arith.divf %819, %823 : vector<1x1xf32>
    %825 = arith.mulf %815, %824 : vector<1x1xf32>
    %826 = vector.shape_cast %825 : vector<1x1xf32> to vector<1x1x1xf32>
    %cst_243 = arith.constant dense<0.000000e+00> : vector<1xf32>
    %827 = vector.multi_reduction <add>, %826, %cst_243 [1, 2] : vector<1x1x1xf32> to vector<1xf32>
    %828 = vector.shape_cast %827 : vector<1xf32> to vector<1x1x1xf32>
    %829 = vector.extract %828[0, 0, 0] : f32 from vector<1x1x1xf32>
    %830 = vector.broadcast %829 : f32 to vector<1x1xf32>
    %831 = vector.shape_cast %815 : vector<1x1xf32> to vector<1x1x1xf32>
    %cst_244 = arith.constant dense<0.000000e+00> : vector<1xf32>
    %832 = vector.multi_reduction <add>, %831, %cst_244 [1, 2] : vector<1x1x1xf32> to vector<1xf32>
    %833 = vector.shape_cast %832 : vector<1xf32> to vector<1x1x1xf32>
    %834 = vector.extract %833[0, 0, 0] : f32 from vector<1x1x1xf32>
    %835 = vector.broadcast %834 : f32 to vector<1x1xf32>
    %836 = tpu.concatenate %82, %156, %514, %712, %830, %87, %161, %519, %717, %835 in 1 : vector<1x1xf32>, vector<1x1xf32>, vector<1x1xf32>, vector<1x1xf32>, vector<1x1xf32>, vector<1x1xf32>, vector<1x1xf32>, vector<1x1xf32>, vector<1x1xf32>, vector<1x1xf32> -> vector<1x10xf32>
    %c0_245 = arith.constant 0 : index
    %c0_246 = arith.constant 0 : index
    %c0_247 = arith.constant 0 : index
    %837 = vector.load %arg16[%c0_245, %c0_246, %c0_247] : memref<1x1x10xf32, #tpu.memory_space<vmem>>, vector<1x1x10xf32>
    %838 = vector.shape_cast %837 : vector<1x1x10xf32> to vector<1x10xf32>
    %839 = vector.shape_cast %836 : vector<1x10xf32> to vector<1x1x10xf32>
    tpu.vector_store %arg16[%c0_245, %c0_246, %c0_247], %839 {strides = array<i32>} : memref<1x1x10xf32, #tpu.memory_space<vmem>>, vector<1x1x10xf32>,
    return
  }
  func.func @transform_0(%arg0: i32) -> (i32, i32) {
    %c0_i32 = arith.constant 0 : i32
    %c0_i32_0 = arith.constant 0 : i32
    %c0_i32_1 = arith.constant 0 : i32
    return %c0_i32, %c0_i32_0 : i32, i32
  }
  func.func @transform_1(%arg0: i32) -> (i32, i32, i32) {
    %c0_i32 = arith.constant 0 : i32
    %c0_i32_0 = arith.constant 0 : i32
    %c0_i32_1 = arith.constant 0 : i32
    return %arg0, %c0_i32, %c0_i32_0 : i32, i32, i32
  }
  func.func @transform_2(%arg0: i32) -> (i32, i32, i32) {
    %c0_i32 = arith.constant 0 : i32
    %c0_i32_0 = arith.constant 0 : i32
    %c0_i32_1 = arith.constant 0 : i32
    return %arg0, %c0_i32, %c0_i32_0 : i32, i32, i32
  }
  func.func @transform_3(%arg0: i32) -> (i32, i32) {
    %c0_i32 = arith.constant 0 : i32
    %c0_i32_0 = arith.constant 0 : i32
    %c0_i32_1 = arith.constant 0 : i32
    return %c0_i32, %c0_i32_0 : i32, i32
  }
  func.func @transform_4(%arg0: i32) -> (i32, i32) {
    %c0_i32 = arith.constant 0 : i32
    %c0_i32_0 = arith.constant 0 : i32
    %c0_i32_1 = arith.constant 0 : i32
    return %c0_i32, %c0_i32_0 : i32, i32
  }
  func.func @transform_5(%arg0: i32) -> (i32, i32) {
    %c0_i32 = arith.constant 0 : i32
    %c0_i32_0 = arith.constant 0 : i32
    %c0_i32_1 = arith.constant 0 : i32
    return %c0_i32, %c0_i32_0 : i32, i32
  }
  func.func @transform_6(%arg0: i32) -> (i32, i32) {
    %c0_i32 = arith.constant 0 : i32
    %c0_i32_0 = arith.constant 0 : i32
    %c0_i32_1 = arith.constant 0 : i32
    return %c0_i32, %c0_i32_0 : i32, i32
  }
  func.func @transform_7(%arg0: i32) -> (i32, i32) {
    %c0_i32 = arith.constant 0 : i32
    %c0_i32_0 = arith.constant 0 : i32
    %c0_i32_1 = arith.constant 0 : i32
    return %c0_i32, %c0_i32_0 : i32, i32
  }
  func.func @transform_8(%arg0: i32) -> (i32, i32) {
    %c0_i32 = arith.constant 0 : i32
    %c0_i32_0 = arith.constant 0 : i32
    %c0_i32_1 = arith.constant 0 : i32
    return %c0_i32, %c0_i32_0 : i32, i32
  }
  func.func @transform_9(%arg0: i32) -> (i32, i32) {
    %c0_i32 = arith.constant 0 : i32
    %c0_i32_0 = arith.constant 0 : i32
    %c0_i32_1 = arith.constant 0 : i32
    return %c0_i32, %c0_i32_0 : i32, i32
  }
  func.func @transform_10(%arg0: i32) -> (i32, i32) {
    %c0_i32 = arith.constant 0 : i32
    %c0_i32_0 = arith.constant 0 : i32
    %c0_i32_1 = arith.constant 0 : i32
    return %c0_i32, %c0_i32_0 : i32, i32
  }
  func.func @transform_11(%arg0: i32) -> (i32, i32) {
    %c0_i32 = arith.constant 0 : i32
    %c0_i32_0 = arith.constant 0 : i32
    %c0_i32_1 = arith.constant 0 : i32
    return %c0_i32, %c0_i32_0 : i32, i32
  }
  func.func @transform_12(%arg0: i32) -> (i32, i32) {
    %c0_i32 = arith.constant 0 : i32
    %c0_i32_0 = arith.constant 0 : i32
    %c0_i32_1 = arith.constant 0 : i32
    return %c0_i32, %c0_i32_0 : i32, i32
  }
  func.func @transform_13(%arg0: i32) -> (i32, i32) {
    %c0_i32 = arith.constant 0 : i32
    %c0_i32_0 = arith.constant 0 : i32
    %c0_i32_1 = arith.constant 0 : i32
    return %c0_i32, %c0_i32_0 : i32, i32
  }
  func.func @transform_14(%arg0: i32) -> (i32, i32) {
    %c0_i32 = arith.constant 0 : i32
    %c0_i32_0 = arith.constant 0 : i32
    %c0_i32_1 = arith.constant 0 : i32
    return %c0_i32, %c0_i32_0 : i32, i32
  }
  func.func @transform_15(%arg0: i32) -> (i32, i32, i32) {
    %c0_i32 = arith.constant 0 : i32
    %c0_i32_0 = arith.constant 0 : i32
    %c0_i32_1 = arith.constant 0 : i32
    return %arg0, %c0_i32, %c0_i32_0 : i32, i32, i32
  }
}

</mosaic_0001>

<bundles_post_ra>
// kernel: msssim_pallas.1
= control target key start
LH: loop header
LB: loop body
LE: loop exit
PB: predicated region body
PF: predicated region fallthrough
CT: control target
= control target key end

     0   :  { %s4377_s18 = smov 0   ;;  %s4883_s0 = inlined_call_operand.vmem [shape: f32[5,2], index: 0, kind: input, shape index: {}]   ;;  %s4884_s1 = inlined_call_operand.vmem [shape: f32[6,32,32], index: 1, kind: input, shape index: {}]   ;;  %s4885_s2 = inlined_call_operand.vmem [shape: f32[6,32,32], index: 2, kind: input, shape index: {}]   ;;  %s4886_s3 = inlined_call_operand.vmem [shape: bf16[22,32], index: 3, kind: input, shape index: {}]   ;;  %s4887_s4 = inlined_call_operand.vmem [shape: bf16[6,16], index: 4, kind: input, shape index: {}]   ;;  %s4888_s5 = inlined_call_operand.vmem [shape: bf16[32,22], index: 5, kind: input, shape index: {}]   ;;  %s4889_s6 = inlined_call_operand.vmem [shape: bf16[16,6], index: 6, kind: input, shape index: {}]   ;;  %s4890_s7 = inlined_call_operand.vmem [shape: f32[16,32], index: 7, kind: input, shape index: {}]   ;;  %s4891_s8 = inlined_call_operand.vmem [shape: f32[8,16], index: 8, kind: input, shape index: {}]   ;;  %s4892_s9 = inlined_call_operand.vmem [shape: f32[4,8], index: 9, kind: input, shape index: {}]   ;;  %s4893_s10 = inlined_call_operand.vmem [shape: f32[2,4], index: 10, kind: input, shape index: {}]   ;;  %s4894_s11 = inlined_call_operand.vmem [shape: f32[32,16], index: 11, kind: input, shape index: {}]   ;;  %s4895_s12 = inlined_call_operand.vmem [shape: f32[16,8], index: 12, kind: input, shape index: {}]   ;;  %s4896_s13 = inlined_call_operand.vmem [shape: f32[8,4], index: 13, kind: input, shape index: {}]   ;;  %s4897_s14 = inlined_call_operand.vmem [shape: f32[4,2], index: 14, kind: input, shape index: {}]   ;;  %s4898_s15 = inlined_call_operand.vmem [shape: f32[6,1,10], index: 15, kind: output, shape index: {}]  }
   0x1 LB: > { %s3716_s19 = sadd.s32 4294967295, %s4285_s18   ;;  %p3720_p0 = scmp.ge.s32.totalorder %s4285_s18, 1  ;;  %s4285_s18 = sphi %s4377_s18, %s25_s18  }
   0x2   : > { %p447_p1 = scmp.lt.s32.totalorder %s4285_s18, 7 }
   0x4   : > { %p448_p2 = pnand %p3720_p0, %p447_p1 }
   0x5   : > { %p498_p3 = scmp.lt.s32.totalorder (!%p448_p2), %s3716_s19, 5  ;;  %vm520_vm0 = vcmask (!%p448_p2), 261120   ;;  %v4405_v22 = vld [vmem:[%s4886_s3] sm:$0xff] (!%p448_p2)   ;;  %v4247_v48 = vld [vmem:[%s4886_s3 + $0x8] ss:$0 sps:$4 sm:$0x77] (!%p448_p2)  }
   0x6   : > { %451 = sbr.rel (%p448_p2) target bundleno = 2257 (0x8d1), region = 80  ;;  %3904 = vmatprep.mubr.msk.bf16.mxu0 (!%p448_p2), %vm520_vm0, %v4405_v22  ;;  %v4412_v29 = vld [vmem:[%s4888_s5] sm:$0xff] (!%p448_p2)   ;;  %vm4289_vm1 = vmmov (!%p448_p2), 0   ;;  %vm1588_vm2 = vcmask (!%p448_p2), 130048   ;;  %vm1227_vm3 = vcmask (!%p448_p2), 179200   ;;  %vm1231_vm4 = vcmask (!%p448_p2), 177152  }
   0x7   : > { %3908 = vmatprep.subr.bf16.mxu1 (!%p448_p2), %v4412_v29  ;;  %vm2751_vm5 = vcmask (!%p448_p2), 64512   ;;  %vm2061_vm6 = vcmask (!%p448_p2), 46080   ;;  %vm3240_vm7 = vcmask (!%p448_p2), 1043456   ;;  %vm3236_vm8 = vcmask (!%p448_p2), 31744  }
   0x8   : > { %3909 = vmatpush3.bf16.msra.mxu1 (!%p448_p2), %v4412_v29  ;;  %vm3639_vm9 = vcmask (!%p448_p2), 7168   ;;  %vm3641_vm10 = vcmask (!%p448_p2), 15360   ;;  %vm3643_vm11 = vcmask (!%p448_p2), 23552   ;;  %vm3646_vm12 = vcmask (!%p448_p2), 39936  }
   0x9   : > { %vm3648_vm13 = vcmask (!%p448_p2), 48128   ;;  %vm3650_vm14 = vcmask (!%p448_p2), 56320   ;;  %vm3653_vm15 = vcmask (!%p448_p2), 72704  }
   0xd   : > { %s4900_s19 = smov (!%p498_p3, %s3716_s19), 5 }
   0xe   : > { %s3786_s20 = sshll.u32 %s4900_s19, 5 }
   0xf   : > { %s502_s23 = scalar_lea.vmem %s4884_s1, %s3786_s20  ;;  %s507_s26 = scalar_lea.vmem %s4885_s2, %s3786_s20 }
  0x10   : > { %v512_v0 = vld [vmem:[%s502_s23] sm:$0xff]  ;;  %v513_v1 = vld [vmem:[%s502_s23 + $0x8] sm:$0xff]  ;;  %v514_v2 = vld [vmem:[%s502_s23 + $0x10] sm:$0xff] }
  0x11   : > { %v515_v3 = vld [vmem:[%s502_s23 + $0x18] sm:$0xff]  ;;  %v521_v4 = vsel %vm520_vm0, %v512_v0, 0.0  ;;  %v522_v5 = vsel %vm520_vm0, %v513_v1, 0.0  ;;  %v524_v6 = vsel %vm520_vm0, %v514_v2, 0.0  ;;  %v516_v7 = vld [vmem:[%s507_s26] sm:$0xff]  ;;  %v517_v8 = vld [vmem:[%s507_s26 + $0x8] sm:$0xff] }
  0x12   : > { %v523_v9 = vadd.f32 %v522_v5, %v521_v4  ;;  %v518_v10 = vld [vmem:[%s507_s26 + $0x10] sm:$0xff]  ;;  %v519_v11 = vld [vmem:[%s507_s26 + $0x18] sm:$0xff]  ;;  %v540_v12 = vsel %vm520_vm0, %v516_v7, 0.0  ;;  %v541_v13 = vsel %vm520_vm0, %v517_v8, 0.0  ;;  %v526_v14 = vsel %vm520_vm0, %v515_v3, 0.0 }
  0x13   : > { %v542_v15 = vadd.f32 %v541_v13, %v540_v12  ;;  %v543_v16 = vsel %vm520_vm0, %v518_v10, 0.0  ;;  %v545_v19 = vsel %vm520_vm0, %v519_v11, 0.0 }
  0x14   : > { %v525_v17 = vadd.f32 %v524_v6, %v523_v9  ;;  %v1259_v6 = vld [vmem:[%s4890_s7] sm:$0xff] }
  0x15   : > { %v544_v18 = vadd.f32 %v543_v16, %v542_v15  ;;  %v4463_v9 = vld [vmem:[%s4883_s0] sm:$0x1] }
  0x16   : > { %v527_v20 = vadd.f32 %v526_v14, %v525_v17 }
  0x17   : > { %v546_v21 = vadd.f32 %v545_v19, %v544_v18 }
  0x18   : > { %528 = vadd.xlane.f32.xlu0 %v527_v20 }
  0x1c   : > { %547 = vadd.xlane.f32.xlu0 %v546_v21 }
  0xa5   : > { %v529_v23 = vpop.xlane.xlu0 %528 }
  0xa6   : > { %v530_v24 = vrot.slane %v529_v23, 4 }
  0xa8   : > { %v531_v25 = vadd.f32 %v530_v24, %v529_v23 }
  0xa9   : > { %v548_v26 = vpop.xlane.xlu0 %547 }
  0xaa   : > { %v532_v27 = vrot.slane %v531_v25, 2  ;;  %v549_v28 = vrot.slane %v548_v26, 4 }
  0xac   : > { %v550_v30 = vadd.f32 %v549_v28, %v548_v26  ;;  %v533_v31 = vadd.f32 %v532_v27, %v531_v25 }
  0xae   : > { %v551_v32 = vrot.slane %v550_v30, 2  ;;  %v534_v33 = vrot.slane %v533_v31, 1 }
  0xb0   : > { %v535_v34 = vadd.f32 %v534_v33, %v533_v31  ;;  %v552_v35 = vadd.f32 %v551_v32, %v550_v30 }
  0xb2   : > { %4196 = vpush %v535_v34  ;;  %v553_v36 = vrot.slane %v552_v35, 1 }
  0xb4   : > { %v554_v37 = vadd.f32 %v553_v36, %v552_v35  ;;  %v1261_v35 = vld [vmem:[%s4894_s11] sm:$0xff]  ;;  %v1262_v36 = vld [vmem:[%s4894_s11 + $0x8] sm:$0xff] }
  0xb6   : > { %4198 = vpush %v554_v37 }
  0xe3   : > { %s4197_s16 = spop %4196 }
  0xe4   : > { %s539_s17 = smul.f32 0.0009765625, %s4197_s16 }
  0xe7   : > { %s4199_s20 = spop %4198 }
  0xe8   : > { %s558_s21 = smul.f32 0.0009765625, %s4199_s20  ;;  %s4294_s20 = smov 121  }
  0xea   : > { %s559_s22 = sadd.f32 %s558_s21, %s539_s17  ;;  %s4287_s21 = smov 127  }
  0xeb   : > { %1174 = vrot.lane.b32.xlu1 %v4463_v9, %s4287_s21  ;;  %s4293_s17 = smov 123  }
  0xec   : > { %s560_s23 = smul.f32 0.5, %s559_s22  ;;  %s4295_s22 = smov 125  }
  0xee   : > { %v4416_v38 = vstv %s560_s23  ;;  %s4296_s23 = smov 124  }
  0xef   : > { %v562_v39 = vsub.f32 %v512_v0, %v4416_v38  ;;  %v563_v40 = vsub.f32 %v513_v1, %v4416_v38  ;;  %v564_v41 = vsub.f32 %v514_v2, %v4416_v38  ;;  %v565_v42 = vsub.f32 %v515_v3, %v4416_v38 }
  0xf0   : > { %v566_v45 = vsub.f32 %v516_v7, %v4416_v38  ;;  %v567_v46 = vsub.f32 %v517_v8, %v4416_v38  ;;  %v568_v49 = vsub.f32 %v518_v10, %v4416_v38  ;;  %v569_v50 = vsub.f32 %v519_v11, %v4416_v38  ;;  %v1260_v7 = vld [vmem:[%s4890_s7 + $0x8] sm:$0xff] }
  0xf1   : > { %v578_v43 = vpack.c.bf16 %v563_v40, %v562_v39  ;;  %v579_v44 = vpack.c.bf16 %v565_v42, %v564_v41  ;;  %v822_v52 = vmul.f32 %v562_v39, %v562_v39  ;;  %v823_v53 = vmul.f32 %v563_v40, %v563_v40  ;;  %v4455_v8 = vld [vmem:[%s4888_s5 + $0x8] sm:$0xff]  }
  0xf2   : > { %v710_v47 = vpack.c.bf16 %v567_v46, %v566_v45  ;;  %v711_v51 = vpack.c.bf16 %v569_v50, %v568_v49  ;;  %v824_v55 = vmul.f32 %v564_v41, %v564_v41  ;;  %v825_v56 = vmul.f32 %v565_v42, %v565_v42  ;;  %3910 = vmatprep.subr.bf16.mxu1 %v4455_v8 }
  0xf3   : > { %3900 = vmatprep.subr.bf16.mxu0 %v578_v43  ;;  %v826_v54 = vpack.c.bf16 %v823_v53, %v822_v52  ;;  %v938_v58 = vmul.f32 %v566_v45, %v566_v45  ;;  %v939_v59 = vmul.f32 %v567_v46, %v567_v46  ;;  %v940_v61 = vmul.f32 %v568_v49, %v568_v49 }
  0xf4   : > { %3901 = vmatpush3.bf16.msra.mxu0 %v578_v43  ;;  %v827_v57 = vpack.c.bf16 %v825_v56, %v824_v55  ;;  %v941_v62 = vmul.f32 %v569_v50, %v569_v50  ;;  %v1054_v0 = vmul.f32 %v566_v45, %v562_v39  ;;  %v1055_v1 = vmul.f32 %v567_v46, %v563_v40 }
  0xf5   : > { %3902 = vmatprep.subr.bf16.mxu0 %v579_v44  ;;  %v942_v60 = vpack.c.bf16 %v939_v59, %v938_v58  ;;  %v1056_v3 = vmul.f32 %v568_v49, %v564_v41  ;;  %v1057_v4 = vmul.f32 %v569_v50, %v565_v42  ;;  %3911 = vmatpush3.bf16.msra.mxu1 %v4455_v8  ;;  %v1263_v42 = vld [vmem:[%s4894_s11 + $0x10] sm:$0xff]  ;;  %v4288_v52 = vmov 0.0  }
  0xf6   : > { %v943_v63 = vpack.c.bf16 %v941_v62, %v940_v61  ;;  %v1058_v2 = vpack.c.bf16 %v1055_v1, %v1054_v0  ;;  %3924 = vmatprep.subr.bf16.mxu1 %v4412_v29  ;;  %v4160_v40 = vpack.c.bf16 %v1262_v36, %v1261_v35 }
  0xf7   : > { %v1059_v5 = vpack.c.bf16 %v1057_v4, %v1056_v3 }
  0xf8   : > { %3903 = vmatpush3.bf16.msra.mxu0 %v579_v44 }
  0xf9   : > { %3916 = vmatprep.subr.bf16.mxu0 %v710_v47 }
  0xfb   : > { %3905 = vmatmul.mubr.msk.bf16.vlgmr.msra.gmra.mrb[0].mxu0 %vm520_vm0, %v4247_v48 }
  0xfc   : > { %3917 = vmatpush3.bf16.msra.mxu0 %v710_v47  ;;  %3920 = vmatprep.mubr.msk.bf16.mxu0 %vm520_vm0, %v4405_v22 }
  0xfd   : > { %3918 = vmatprep.subr.bf16.mxu0 %v711_v51 }
 0x100   : > { %3919 = vmatpush3.bf16.msra.mxu0 %v711_v51 }
 0x101   : > { %3932 = vmatprep.subr.bf16.mxu0 %v826_v54 }
 0x103   : > { %3921 = vmatmul.mubr.msk.bf16.vlgmr.msra.gmra.mrb[4].mxu0 %vm520_vm0, %v4247_v48 }
 0x104   : > { %3933 = vmatpush3.bf16.msra.mxu0 %v826_v54  ;;  %3936 = vmatprep.mubr.msk.bf16.mxu0 %vm520_vm0, %v4405_v22 }
 0x105   : > { %3934 = vmatprep.subr.bf16.mxu0 %v827_v57 }
 0x108   : > { %3935 = vmatpush3.bf16.msra.mxu0 %v827_v57 }
 0x109   : > { %3948 = vmatprep.subr.bf16.mxu0 %v942_v60 }
 0x10b   : > { %3937 = vmatmul.mubr.msk.bf16.vlgmr.msra.gmra.mrb[8].mxu0 %vm520_vm0, %v4247_v48 }
 0x10c   : > { %3949 = vmatpush3.bf16.msra.mxu0 %v942_v60  ;;  %3952 = vmatprep.mubr.msk.bf16.mxu0 %vm520_vm0, %v4405_v22 }
 0x10d   : > { %3950 = vmatprep.subr.bf16.mxu0 %v943_v63 }
 0x110   : > { %3951 = vmatpush3.bf16.msra.mxu0 %v943_v63 }
 0x111   : > { %3964 = vmatprep.subr.bf16.mxu0 %v1058_v2 }
 0x113   : > { %3953 = vmatmul.mubr.msk.bf16.vlgmr.msra.gmra.mrb[12].mxu0 %vm520_vm0, %v4247_v48 }
 0x114   : > { %3965 = vmatpush3.bf16.msra.mxu0 %v1058_v2  ;;  %3968 = vmatprep.mubr.msk.bf16.mxu0 %vm520_vm0, %v4405_v22 }
 0x115   : > { %3966 = vmatprep.subr.bf16.mxu0 %v1059_v5 }
 0x118   : > { %3967 = vmatpush3.bf16.msra.mxu0 %v1059_v5 }
 0x119   : > { %4153 = vmatprep.subr.bf16.mxu0 %v578_v43 }
 0x11b   : > { %3969 = vmatmul.mubr.msk.bf16.vlgmr.msra.gmra.mrb[16].mxu0 %vm520_vm0, %v4247_v48 }
 0x11c   : > { %4155 = vmatpush3.bf16.msra.mxu0 %v578_v43  ;;  %3988 = vmatprep.mubr.msk.f32.mxu0 %vm520_vm0, %v1259_v6  ;;  %v1264_v43 = vld [vmem:[%s4894_s11 + $0x18] sm:$0xff] }
 0x11d   : > { %4157 = vmatprep.subr.bf16.mxu0 %v579_v44 }
 0x120   : > { %4159 = vmatpush3.bf16.msra.mxu0 %v579_v44 }
 0x121   : > { %4169 = vmatprep.subr.bf16.mxu0 %v710_v47 }
 0x123   : > { %3989 = vmatmul.mubr.msk.f32.vlgmr.msra.gmra.mrb[20].mxu0 %vm520_vm0, %v1260_v7 }
 0x124   : > { %4171 = vmatpush3.bf16.msra.mxu0 %v710_v47  ;;  %4010 = vmatprep.mubr.msk.f32.mxu0 %vm520_vm0, %v1259_v6 }
 0x125   : > { %4173 = vmatprep.subr.bf16.mxu0 %v711_v51 }
 0x128   : > { %4175 = vmatpush3.bf16.msra.mxu0 %v711_v51 }
 0x129   : > { %4024 = vmatprep.subr.bf16.mxu0 %v4288_v52 }
 0x12b   : > { %4011 = vmatmul.mubr.msk.f32.vlgmr.msra.gmra.mrb[22].mxu0 %vm520_vm0, %v1260_v7 }
 0x12c   : > { %4026 = vmatprep.mubr.msk.bf16.mxu0 %vm4289_vm1, %v4288_v52 }
 0x15d   : > { %v1175_v49 = vpop.permute.xlu1 %1174 }
 0x15e   : > { %4200 = vpush %v1175_v49 }
 0x15f   : > { %4202 = vpush %v4463_v9 }
 0x18f   : > { %s4518_s30 = spop %4200 }
 0x190   : > { %s4203_s16 = spop %4202 }
 0x1ce   : > { %v3906_v10 = vpop.f32.mrb[0].mxu0 }
 0x1cf   : > { %v628_v11 = vpop.f32.mrb[1].mxu0  ;;  %v643_v15 = vpack.c.bf16 %v3906_v10, %v3906_v10 }
 0x1d0   : > { %v3907_v12 = vpop.f32.mrb[2].mxu0 }
 0x1d1   : > { %v631_v13 = vpop.f32.mrb[3].mxu0 }
 0x1d2   : > { %v642_v14 = vpack.c.bf16 %v631_v13, %v628_v11 }
 0x1d4   : > { %3912 = vmatprep.mubr.msk.bf16.mxu1 %vm520_vm0, %v642_v14 }
 0x1d5   : > { %3913 = vmatmul.mubr.msk.bf16.vlgmr.msra.gmra.mrb[0].mxu1 %vm520_vm0, %v643_v15  ;;  %v1201_v15 = vstv %s4203_s16  ;;  %s4292_s16 = smov 122  }
 0x1d6   : > { %3925 = vmatpush3.bf16.msra.mxu1 %v4412_v29  ;;  %v3922_v16 = vpop.f32.mrb[4].mxu0 }
 0x1d7   : > { %v746_v17 = vpop.f32.mrb[5].mxu0  ;;  %3926 = vmatprep.subr.bf16.mxu1 %v4455_v8  ;;  %v761_v21 = vpack.c.bf16 %v3922_v16, %v3922_v16 }
 0x1d8   : > { %v3923_v18 = vpop.f32.mrb[6].mxu0 }
 0x1d9   : > { %v749_v19 = vpop.f32.mrb[7].mxu0 }
 0x1da   : > { %v760_v20 = vpack.c.bf16 %v749_v19, %v746_v17  ;;  %3927 = vmatpush3.bf16.msra.mxu1 %v4455_v8 }
 0x1db   : > { %3940 = vmatprep.subr.bf16.mxu1 %v4412_v29 }
 0x1dc   : > { %3928 = vmatprep.mubr.msk.bf16.mxu1 %vm520_vm0, %v760_v20 }
 0x1dd   : > { %3929 = vmatmul.mubr.msk.bf16.vlgmr.msra.gmra.mrb[4].mxu1 %vm520_vm0, %v761_v21 }
 0x1de   : > { %3941 = vmatpush3.bf16.msra.mxu1 %v4412_v29  ;;  %v3938_v22 = vpop.f32.mrb[8].mxu0 }
 0x1df   : > { %v862_v23 = vpop.f32.mrb[9].mxu0  ;;  %3942 = vmatprep.subr.bf16.mxu1 %v4455_v8  ;;  %v877_v27 = vpack.c.bf16 %v3938_v22, %v3938_v22 }
 0x1e0   : > { %v3939_v24 = vpop.f32.mrb[10].mxu0 }
 0x1e1   : > { %v865_v25 = vpop.f32.mrb[11].mxu0 }
 0x1e2   : > { %v876_v26 = vpack.c.bf16 %v865_v25, %v862_v23  ;;  %3943 = vmatpush3.bf16.msra.mxu1 %v4455_v8 }
 0x1e3   : > { %3956 = vmatprep.subr.bf16.mxu1 %v4412_v29 }
 0x1e4   : > { %3944 = vmatprep.mubr.msk.bf16.mxu1 %vm520_vm0, %v876_v26 }
 0x1e5   : > { %3945 = vmatmul.mubr.msk.bf16.vlgmr.msra.gmra.mrb[8].mxu1 %vm520_vm0, %v877_v27 }
 0x1e6   : > { %3957 = vmatpush3.bf16.msra.mxu1 %v4412_v29  ;;  %v3954_v28 = vpop.f32.mrb[12].mxu0 }
 0x1e7   : > { %v978_v30 = vpop.f32.mrb[13].mxu0  ;;  %3958 = vmatprep.subr.bf16.mxu1 %v4455_v8  ;;  %v993_v34 = vpack.c.bf16 %v3954_v28, %v3954_v28 }
 0x1e8   : > { %v3955_v31 = vpop.f32.mrb[14].mxu0 }
 0x1e9   : > { %v981_v32 = vpop.f32.mrb[15].mxu0 }
 0x1ea   : > { %v992_v33 = vpack.c.bf16 %v981_v32, %v978_v30  ;;  %3959 = vmatpush3.bf16.msra.mxu1 %v4455_v8 }
 0x1eb   : > { %3972 = vmatprep.subr.bf16.mxu1 %v4412_v29 }
 0x1ec   : > { %3960 = vmatprep.mubr.msk.bf16.mxu1 %vm520_vm0, %v992_v33 }
 0x1ed   : > { %3961 = vmatmul.mubr.msk.bf16.vlgmr.msra.gmra.mrb[12].mxu1 %vm520_vm0, %v993_v34 }
 0x1ee   : > { %3973 = vmatpush3.bf16.msra.mxu1 %v4412_v29  ;;  %v3970_v37 = vpop.f32.mrb[16].mxu0  ;;  %v4164_v29 = vpack.c.bf16 %v1264_v43, %v1263_v42  ;;  %v1177_v42 = vstv %s4518_s30  ;;  %s4291_s30 = smov 126  }
 0x1ef   : > { %v1094_v39 = vpop.f32.mrb[17].mxu0  ;;  %3974 = vmatprep.subr.bf16.mxu1 %v4455_v8  ;;  %v1109_v46 = vpack.c.bf16 %v3970_v37, %v3970_v37 }
 0x1f0   : > { %v3971_v41 = vpop.f32.mrb[18].mxu0 }
 0x1f1   : > { %v1097_v44 = vpop.f32.mrb[19].mxu0 }
 0x1f2   : > { %v1108_v45 = vpack.c.bf16 %v1097_v44, %v1094_v39  ;;  %3975 = vmatpush3.bf16.msra.mxu1 %v4455_v8 }
 0x1f3   : > { %4161 = vmatprep.subr.bf16.mxu1 %v4160_v40 }
 0x1f4   : > { %3976 = vmatprep.mubr.msk.bf16.mxu1 %vm520_vm0, %v1108_v45 }
 0x1f5   : > { %3977 = vmatmul.mubr.msk.bf16.vlgmr.msra.gmra.mrb[16].mxu1 %vm520_vm0, %v1109_v46 }
 0x1f6   : > { %4163 = vmatpush3.bf16.msra.mxu1 %v4160_v40  ;;  %v3990_v47 = vpop.f32.mrb[20].mxu0 }
 0x1f7   : > { %4165 = vmatprep.subr.bf16.mxu1 %v4164_v29  ;;  %v1337_v48 = vpop.f32.mrb[21].mxu0 }
 0x1f8   : > { %3999 = vmatprep.mubr.msk.f32.mxu1 %vm520_vm0, %v1337_v48 }
 0x1fa   : > { %4167 = vmatpush3.bf16.msra.mxu1 %v4164_v29 }
 0x1fb   : > { %4177 = vmatprep.subr.bf16.mxu1 %v4160_v40 }
 0x1fd   : > { %4000 = vmatmul.mubr.msk.f32.vlgmr.msra.gmra.mrb[20].mxu1 %vm520_vm0, %v3990_v47 }
 0x1fe   : > { %4179 = vmatpush3.bf16.msra.mxu1 %v4160_v40  ;;  %v4012_v50 = vpop.f32.mrb[22].mxu0 }
 0x1ff   : > { %4181 = vmatprep.subr.bf16.mxu1 %v4164_v29  ;;  %v1493_v51 = vpop.f32.mrb[23].mxu0 }
 0x200   : > { %4021 = vmatprep.mubr.msk.f32.mxu1 %vm520_vm0, %v1493_v51 }
 0x202   : > { %4183 = vmatpush3.bf16.msra.mxu1 %v4164_v29 }
 0x203   : > { %4030 = vmatprep.subr.bf16.mxu1 %v4288_v52 }
 0x205   : > { %4022 = vmatmul.mubr.msk.f32.vlgmr.msra.gmra.mrb[22].mxu1 %vm520_vm0, %v4012_v50  ;;  %vm3655_vm0 = vcmask 73728  }
 0x206   : > { %4032 = vmatprep.mubr.msk.bf16.mxu1 %vm4289_vm1, %v4288_v52 }
 0x2a8   : > { %v3914_v53 = vpop.f32.mrb[0].mxu1 }
 0x2a9   : > { %v696_v54 = vpop.f32.mrb[1].mxu1  ;;  %v818_v57 = vadd.f32 %v3914_v53, %v4416_v38  ;;  %v934_v22 = vmul.f32 %v3914_v53, %v3914_v53 }
 0x2aa   : > { %v3915_v55 = vpop.f32.mrb[2].mxu1  ;;  %v816_v58 = vadd.f32 %v696_v54, %v4416_v38  ;;  %v932_v26 = vmul.f32 %v696_v54, %v696_v54 }
 0x2ab   : > { %v699_v56 = vpop.f32.mrb[3].mxu1  ;;  %v1196_v61 = vmul.f32 2.0, %v818_v57  ;;  %v1208_v5 = vmul.f32 %v818_v57, %v818_v57 }
 0x2ac   : > { %v817_v59 = vadd.f32 %v699_v56, %v4416_v38  ;;  %v1194_v1 = vmul.f32 2.0, %v816_v58  ;;  %v1206_v6 = vmul.f32 %v816_v58, %v816_v58  ;;  %v933_v33 = vmul.f32 %v699_v56, %v699_v56 }
 0x2ae   : > { %v1195_v10 = vmul.f32 2.0, %v817_v59  ;;  %v1207_v17 = vmul.f32 %v817_v59, %v817_v59 }
 0x2b0   : > { %v3930_v60 = vpop.f32.mrb[4].mxu1 }
 0x2b1   : > { %v821_v62 = vadd.f32 %v3930_v60, %v4416_v38  ;;  %v802_v63 = vpop.f32.mrb[5].mxu1  ;;  %v4521_v0 = vmul.f32 %v3930_v60, %v3914_v53  ;;  %v1050_v36 = vmul.f32 %v3930_v60, %v3930_v60 }
 0x2b2   : > { %v819_v2 = vadd.f32 %v802_v63, %v4416_v38  ;;  %v3931_v3 = vpop.f32.mrb[6].mxu1  ;;  %v4524_v4 = vmul.f32 %v802_v63, %v696_v54  ;;  %v1048_v39 = vmul.f32 %v802_v63, %v802_v63 }
 0x2b3   : > { %v1199_v7 = vmul.f32 %v1196_v61, %v821_v62  ;;  %v1211_v8 = vmul.f32 %v821_v62, %v821_v62  ;;  %v805_v9 = vpop.f32.mrb[7].mxu1 }
 0x2b4   : > { %v1197_v11 = vmul.f32 %v1194_v1, %v819_v2  ;;  %v1209_v12 = vmul.f32 %v819_v2, %v819_v2  ;;  %v820_v13 = vadd.f32 %v805_v9, %v4416_v38  ;;  %v1165_v16 = vmul.f32 %v805_v9, %v699_v56 }
 0x2b5   : > { %v1214_v14 = vadd.f32 %v1211_v8, %v1208_v5  ;;  %v1049_v45 = vmul.f32 %v805_v9, %v805_v9  ;;  %v1205_v46 = vadd.f32 %v1201_v15, %v1199_v7 }
 0x2b6   : > { %v1212_v18 = vadd.f32 %v1209_v12, %v1206_v6  ;;  %v1198_v19 = vmul.f32 %v1195_v10, %v820_v13  ;;  %v1210_v20 = vmul.f32 %v820_v13, %v820_v13  ;;  %v1203_v47 = vadd.f32 %v1201_v15, %v1197_v11 }
 0x2b7   : > { %v1217_v21 = vadd.f32 %v1214_v14, %v1201_v15 }
 0x2b8   : > { %v1213_v23 = vadd.f32 %v1210_v20, %v1207_v17  ;;  %v1215_v24 = vadd.f32 %v1212_v18, %v1201_v15  ;;  %v3946_v25 = vpop.f32.mrb[8].mxu1  ;;  %v1204_v55 = vadd.f32 %v1201_v15, %v1198_v19 }
 0x2b9   : > { %4251 = vrcp.f32 %v1217_v21  ;;  %v937_v27 = vsub.f32 %v3946_v25, %v934_v22  ;;  %v918_v28 = vpop.f32.mrb[9].mxu1 }
 0x2ba   : > { %v1216_v30 = vadd.f32 %v1213_v23, %v1201_v15  ;;  %4253 = vrcp.f32 %v1215_v24  ;;  %v935_v31 = vsub.f32 %v918_v28, %v932_v26  ;;  %v3947_v32 = vpop.f32.mrb[10].mxu1 }
 0x2bb   : > { %v921_v34 = vpop.f32.mrb[11].mxu1 }
 0x2bc   : > { %4255 = vrcp.f32 %v1216_v30  ;;  %v936_v35 = vsub.f32 %v921_v34, %v933_v33 }
 0x2c0   : > { %v3962_v37 = vpop.f32.mrb[12].mxu1 }
 0x2c1   : > { %v1053_v40 = vsub.f32 %v3962_v37, %v1050_v36  ;;  %v1034_v41 = vpop.f32.mrb[13].mxu1 }
 0x2c2   : > { %v1051_v43 = vsub.f32 %v1034_v41, %v1048_v39  ;;  %v3963_v44 = vpop.f32.mrb[14].mxu1 }
 0x2c3   : > { %v4252_v29 = vpop.eup %4251  ;;  %v1184_v48 = vadd.f32 %v1053_v40, %v937_v27  ;;  %v1037_v49 = vpop.f32.mrb[15].mxu1 }
 0x2c4   : > { %v4254_v50 = vpop.eup %4253  ;;  %v1182_v51 = vadd.f32 %v1051_v43, %v935_v31  ;;  %v1052_v53 = vsub.f32 %v1037_v49, %v1049_v45  ;;  %v1223_v54 = vmul.f32 %v4252_v29, %v1205_v46  ;;  %v2084_v49 = vld [vmem:[%s4891_s8] sm:$0xff] }
 0x2c5   : > { %v1187_v56 = vadd.f32 %v1184_v48, %v1177_v42  ;;  %v1219_v57 = vmul.f32 %v4254_v50, %v1203_v47  ;;  %v4290_v48 = vmov 0.0|0.0   ;;  %v4250_v50 = vld [vmem:[%s4889_s6] sm:$0xff]  }
 0x2c6   : > { %v4256_v58 = vpop.eup %4255  ;;  %v1185_v59 = vadd.f32 %v1182_v51, %v1177_v42  ;;  %v1183_v60 = vadd.f32 %v1052_v53, %v936_v35  ;;  %4031 = vmatpush3.bf16.msra.mxu1 %v4250_v50  ;;  %v4577_v51 = vld [vmem:[%s4883_s0 + $0x1] sm:$0x1] }
 0x2c7   : > { %4257 = vrcp.f32 %v1187_v56  ;;  %v1221_v61 = vmul.f32 %v4256_v58, %v1204_v55  ;;  %4042 = vmatprep.subr.bf16.mxu1 %v4288_v52 }
 0x2c8   : > { %4259 = vrcp.f32 %v1185_v59  ;;  %v1186_v62 = vadd.f32 %v1183_v60, %v1177_v42  ;;  %v3978_v63 = vpop.f32.mrb[16].mxu1 }
 0x2c9   : > { %v1169_v1 = vsub.f32 %v3978_v63, %v4521_v0  ;;  %v1150_v2 = vpop.f32.mrb[17].mxu1 }
 0x2ca   : > { %4261 = vrcp.f32 %v1186_v62  ;;  %v1167_v3 = vsub.f32 %v1150_v2, %v4524_v4  ;;  %v3979_v5 = vpop.f32.mrb[18].mxu1 }
 0x2cb   : > { %v1153_v6 = vpop.f32.mrb[19].mxu1  ;;  %v1172_v7 = vmul.f32 2.0, %v1169_v1 }
 0x2cc   : > { %v1168_v8 = vsub.f32 %v1153_v6, %v1165_v16  ;;  %v1170_v9 = vmul.f32 2.0, %v1167_v3  ;;  %v1584_v16 = vld [vmem:[%s4887_s4] sm:$0x7] }
 0x2cd   : > { %v1181_v11 = vadd.f32 %v1177_v42, %v1172_v7 }
 0x2ce   : > { %v1171_v10 = vmul.f32 2.0, %v1168_v8  ;;  %v1179_v14 = vadd.f32 %v1177_v42, %v1170_v9 }
 0x2d0   : > { %v4001_v12 = vpop.f32.mrb[20].mxu1  ;;  %v1180_v22 = vadd.f32 %v1177_v42, %v1171_v10 }
 0x2d1   : > { %v4258_v13 = vpop.eup %4257  ;;  %v1770_v15 = vmul.f32 %v4001_v12, %v4001_v12  ;;  %v1418_v17 = vpop.f32.mrb[21].mxu1 }
 0x2d2   : > { %v4260_v18 = vpop.eup %4259  ;;  %v1587_v19 = vpack.c.bf16 %v4001_v12, %v1418_v17  ;;  %v1769_v20 = vmul.f32 %v1418_v17, %v1418_v17  ;;  %v1193_v0 = vmul.f32 %v4258_v13, %v1181_v11 }
 0x2d3   : > { %v1191_v21 = vmul.f32 %v4260_v18, %v1179_v14 }
 0x2d4   : > { %v4262_v23 = vpop.eup %4261  ;;  %v1771_v4 = vpack.c.bf16 %v1770_v15, %v1769_v20  ;;  %4025 = vmatpush3.bf16.msra.mxu0 %v1587_v19  ;;  %v1226_v24 = vmul.f32 %v1223_v54, %v1193_v0  ;;  %v1247_v33 = vsel %vm1231_vm4, %v1193_v0, 0.0 }
 0x2d5   : > { %v1192_v25 = vmul.f32 %v4262_v23, %v1180_v22  ;;  %4036 = vmatprep.subr.bf16.mxu0 %v4288_v52  ;;  %v1224_v26 = vmul.f32 %v1219_v57, %v1191_v21  ;;  %v1244_v27 = vsel %vm1227_vm3, %v1191_v21, 0.0 }
 0x2d6   : > { %v1232_v29 = vsel %vm1231_vm4, %v1226_v24, 0.0  ;;  %v2086_v24 = vld [vmem:[%s4895_s12 + $0x8] sm:$0xff] }
 0x2d7   : > { %4027 = vmatmul.mubr.msk.bf16.vlgmr.msra.gmra.mrb[24].mxu0 %vm1588_vm2, %v1584_v16  ;;  %v1245_v28 = vsel %vm1227_vm3, %v1192_v25, 0.0  ;;  %v1225_v30 = vmul.f32 %v1221_v61, %v1192_v25  ;;  %v1228_v37 = vsel %vm1227_vm3, %v1224_v26, 0.0 }
 0x2d8   : > { %v4023_v31 = vpop.f32.mrb[22].mxu1  ;;  %v1246_v32 = vadd.f32 %v1245_v28, %v1244_v27  ;;  %4038 = vmatprep.mubr.msk.bf16.mxu0 %vm4289_vm1, %v4288_v52 }
 0x2d9   : > { %v1859_v34 = vmul.f32 %v4023_v31, %v4023_v31  ;;  %v1948_v35 = vmul.f32 %v4023_v31, %v4001_v12  ;;  %v1574_v36 = vpop.f32.mrb[23].mxu1  ;;  %v1229_v39 = vsel %vm1227_vm3, %v1225_v30, 0.0 }
 0x2da   : > { %v1682_v40 = vpack.c.bf16 %v4023_v31, %v1574_v36  ;;  %v1858_v41 = vmul.f32 %v1574_v36, %v1574_v36  ;;  %v1947_v42 = vmul.f32 %v1574_v36, %v1418_v17  ;;  %v1248_v43 = vadd.f32 %v1247_v33, %v1246_v32 }
 0x2db   : > { %v1230_v44 = vadd.f32 %v1229_v39, %v1228_v37  ;;  %v4618_v37 = vld [vmem:[%s4883_s0 + $0x2] sm:$0x1]  ;;  %v4625_v39 = vld [vmem:[%s4883_s0 + $0x3] sm:$0x1] }
 0x2dc   : > { %v1860_v45 = vpack.c.bf16 %v1859_v34, %v1858_v41  ;;  %v1949_v46 = vpack.c.bf16 %v1948_v35, %v1947_v42  ;;  %4037 = vmatpush3.bf16.msra.mxu0 %v1682_v40  ;;  %1249 = vadd.xlane.f32.xlu0 %v1248_v43 }
 0x2dd   : > { %4048 = vmatprep.subr.bf16.mxu0 %v4288_v52  ;;  %v1233_v47 = vadd.f32 %v1232_v29, %v1230_v44 }
 0x2df   : > { %1234 = vadd.xlane.f32.xlu1 %v1233_v47  ;;  %4039 = vmatmul.mubr.msk.bf16.vlgmr.msra.gmra.mrb[28].mxu0 %vm1588_vm2, %v1584_v16 }
 0x2e0   : > { %4049 = vmatpush3.bf16.msra.mxu0 %v1771_v4  ;;  %4050 = vmatprep.mubr.msk.bf16.mxu0 %vm4289_vm1, %v4288_v52 }
 0x2e1   : > { %4060 = vmatprep.subr.bf16.mxu0 %v4288_v52 }
 0x2e7   : > { %4051 = vmatmul.mubr.msk.bf16.vlgmr.msra.gmra.mrb[32].mxu0 %vm1588_vm2, %v1584_v16 }
 0x2e8   : > { %4061 = vmatpush3.bf16.msra.mxu0 %v1860_v45  ;;  %4062 = vmatprep.mubr.msk.bf16.mxu0 %vm4289_vm1, %v4288_v52 }
 0x2e9   : > { %4072 = vmatprep.subr.bf16.mxu0 %v4288_v52 }
 0x2ef   : > { %4063 = vmatmul.mubr.msk.bf16.vlgmr.msra.gmra.mrb[36].mxu0 %vm1588_vm2, %v1584_v16 }
 0x2f0   : > { %4073 = vmatpush3.bf16.msra.mxu0 %v1949_v46  ;;  %4074 = vmatprep.mubr.msk.bf16.mxu0 %vm4289_vm1, %v4288_v52 }
 0x2f1   : > { %4184 = vmatprep.subr.bf16.mxu0 %v4290_v48 }
 0x2f2   : > { %2038 = vrot.lane.b32.xlu0 %v4577_v51, %s4287_s21 }
 0x2f6   : > { %2725 = vrot.lane.b32.xlu0 %v4618_v37, %s4287_s21 }
 0x2f7   : > { %4075 = vmatmul.mubr.msk.bf16.vlgmr.msra.gmra.mrb[40].mxu0 %vm1588_vm2, %v1584_v16  ;;  %v2085_v16 = vld [vmem:[%s4895_s12] sm:$0xff] }
 0x2f8   : > { %4186 = vmatpush3.bf16.msra.mxu0 %v1587_v19  ;;  %4088 = vmatprep.mubr.msk.f32.mxu0 %vm4289_vm1, %v4288_v52  ;;  %v4188_v26 = vpack.c.bf16 %v2086_v24, %v2085_v16 }
 0x2f9   : > { %4190 = vmatprep.subr.bf16.mxu0 %v4290_v48 }
 0x2fa   : > { %3210 = vrot.lane.b32.xlu0 %v4625_v39, %s4287_s21 }
 0x2ff   : > { %4089 = vmatmul.mubr.msk.f32.vlgmr.msra.gmra.mrb[44].mxu0 %vm1588_vm2, %v2084_v49 }
 0x300   : > { %4192 = vmatpush3.bf16.msra.mxu0 %v1682_v40  ;;  %4102 = vmatprep.mubr.msk.f32.mxu0 %vm4289_vm1, %v4288_v52 }
 0x301   : > { %4112 = vmatprep.subr.mxu0 %v4288_v52 }
 0x303   : > { %4103 = vmatmul.mubr.msk.f32.vlgmr.msra.gmra.mrb[46].mxu0 %vm1588_vm2, %v2084_v49 }
 0x304   : > { %4114 = vmatprep.mubr.msk.f32.mxu0 %vm4289_vm1, %v4288_v52 }
 0x369   : > { %v1250_v53 = vpop.xlane.xlu0 %1249 }
 0x36a   : > { %v1251_v54 = vrot.slane %v1250_v53, 4 }
 0x36c   : > { %v1252_v55 = vadd.f32 %v1251_v54, %v1250_v53  ;;  %v1235_v56 = vpop.xlane.xlu1 %1234 }
 0x36d   : > { %v1236_v57 = vrot.slane %v1235_v56, 4  ;;  %v2039_v31 = vpop.permute.xlu0 %2038 }
 0x36e   : > { %v1253_v58 = vrot.slane %v1252_v55, 2 }
 0x36f   : > { %v1237_v59 = vadd.f32 %v1236_v57, %v1235_v56 }
 0x370   : > { %v1254_v60 = vadd.f32 %v1253_v58, %v1252_v55 }
 0x371   : > { %v1238_v61 = vrot.slane %v1237_v59, 2 }
 0x372   : > { %v1255_v63 = vrot.slane %v1254_v60, 1 }
 0x373   : > { %v1239_v62 = vadd.f32 %v1238_v61, %v1237_v59 }
 0x374   : > { %v1256_v3 = vadd.f32 %v1255_v63, %v1254_v60 }
 0x375   : > { %v1240_v1 = vrot.slane %v1239_v62, 1 }
 0x377   : > { %v1241_v2 = vadd.f32 %v1240_v1, %v1239_v62 }
 0x379   : > { %4204 = vpush %v1241_v2 }
 0x37a   : > { %4206 = vpush %v1256_v3 }
 0x37b   : > { %4208 = vpush %v2039_v31 }
 0x37c   : > { %4210 = vpush %v4577_v51 }
 0x3aa   : > { %v1626_v5 = vpop.f32.mrb[24].mxu0  ;;  %s4630_s24 = spop %4204 }
 0x3ab   : > { %v1632_v6 = vpack.c.bf16 %v1626_v5, %v1626_v5  ;;  %v4028_v7 = vpop.f32.mrb[25].mxu0  ;;  %s4632_s25 = spop %4206 }
 0x3ac   : > { %v1629_v8 = vpop.f32.mrb[26].mxu0  ;;  %s4635_s26 = spop %4208 }
 0x3ad   : > { %v4029_v9 = vpop.f32.mrb[27].mxu0  ;;  %4033 = vmatmul.mubr.msk.bf16.vlgmr.msra.gmra.mrb[24].mxu1 %vm1588_vm2, %v1632_v6  ;;  %s4211_s27 = spop %4210  ;;  %v2041_v6 = vstv %s4635_s26  ;;  %s510_s26 = scalar_lea.vmem %s4898_s15, %s4900_s19 }
 0x3ae   : > { %4043 = vmatpush3.bf16.msra.mxu1 %v4250_v50  ;;  %4044 = vmatprep.mubr.msk.bf16.mxu1 %vm4289_vm1, %v4288_v52  ;;  %v2051_v56 = vstv %s4211_s27 }
 0x3af   : > { %4054 = vmatprep.subr.bf16.mxu1 %v4288_v52 }
 0x3b2   : > { %v1717_v10 = vpop.f32.mrb[28].mxu0 }
 0x3b3   : > { %v1723_v11 = vpack.c.bf16 %v1717_v10, %v1717_v10  ;;  %v4040_v12 = vpop.f32.mrb[29].mxu0 }
 0x3b4   : > { %v1720_v13 = vpop.f32.mrb[30].mxu0 }
 0x3b5   : > { %v4041_v14 = vpop.f32.mrb[31].mxu0  ;;  %4045 = vmatmul.mubr.msk.bf16.vlgmr.msra.gmra.mrb[28].mxu1 %vm1588_vm2, %v1723_v11 }
 0x3b6   : > { %4055 = vmatpush3.bf16.msra.mxu1 %v4250_v50  ;;  %4056 = vmatprep.mubr.msk.bf16.mxu1 %vm4289_vm1, %v4288_v52 }
 0x3b7   : > { %4066 = vmatprep.subr.bf16.mxu1 %v4288_v52 }
 0x3ba   : > { %v1806_v15 = vpop.f32.mrb[32].mxu0 }
 0x3bb   : > { %v1812_v17 = vpack.c.bf16 %v1806_v15, %v1806_v15  ;;  %v4052_v18 = vpop.f32.mrb[33].mxu0 }
 0x3bc   : > { %v1809_v19 = vpop.f32.mrb[34].mxu0 }
 0x3bd   : > { %v4053_v20 = vpop.f32.mrb[35].mxu0  ;;  %4057 = vmatmul.mubr.msk.bf16.vlgmr.msra.gmra.mrb[32].mxu1 %vm1588_vm2, %v1812_v17 }
 0x3be   : > { %4067 = vmatpush3.bf16.msra.mxu1 %v4250_v50  ;;  %4068 = vmatprep.mubr.msk.bf16.mxu1 %vm4289_vm1, %v4288_v52 }
 0x3bf   : > { %4078 = vmatprep.subr.bf16.mxu1 %v4288_v52 }
 0x3c2   : > { %v1895_v0 = vpop.f32.mrb[36].mxu0 }
 0x3c3   : > { %v1901_v21 = vpack.c.bf16 %v1895_v0, %v1895_v0  ;;  %v4064_v22 = vpop.f32.mrb[37].mxu0  ;;  %v2749_v0 = vld [vmem:[%s4892_s9] sm:$0xf] }
 0x3c4   : > { %v1898_v23 = vpop.f32.mrb[38].mxu0 }
 0x3c5   : > { %v4065_v4 = vpop.f32.mrb[39].mxu0  ;;  %4069 = vmatmul.mubr.msk.bf16.vlgmr.msra.gmra.mrb[36].mxu1 %vm1588_vm2, %v1901_v21 }
 0x3c6   : > { %4079 = vmatpush3.bf16.msra.mxu1 %v4250_v50  ;;  %4080 = vmatprep.mubr.msk.bf16.mxu1 %vm4289_vm1, %v4288_v52 }
 0x3c7   : > { %4187 = vmatprep.subr.bf16.mxu1 %v4290_v48 }
 0x3ca   : > { %v1984_v25 = vpop.f32.mrb[40].mxu0 }
 0x3cb   : > { %v1990_v27 = vpack.c.bf16 %v1984_v25, %v1984_v25  ;;  %v4076_v28 = vpop.f32.mrb[41].mxu0 }
 0x3cc   : > { %v1987_v30 = vpop.f32.mrb[42].mxu0 }
 0x3cd   : > { %v4077_v32 = vpop.f32.mrb[43].mxu0  ;;  %4081 = vmatmul.mubr.msk.bf16.vlgmr.msra.gmra.mrb[40].mxu1 %vm1588_vm2, %v1990_v27 }
 0x3ce   : > { %4189 = vmatpush3.bf16.msra.mxu1 %v4188_v26  ;;  %4095 = vmatprep.mubr.msk.f32.mxu1 %vm4289_vm1, %v4288_v52 }
 0x3cf   : > { %4193 = vmatprep.subr.bf16.mxu1 %v4290_v48 }
 0x3d2   : > { %v2156_v33 = vpop.f32.mrb[44].mxu0 }
 0x3d3   : > { %v4090_v34 = vpop.f32.mrb[45].mxu0 }
 0x3d5   : > { %4096 = vmatmul.mubr.msk.f32.vlgmr.msra.gmra.mrb[44].mxu1 %vm1588_vm2, %v2156_v33 }
 0x3d6   : > { %4195 = vmatpush3.bf16.msra.mxu1 %v4188_v26  ;;  %v2299_v35 = vpop.f32.mrb[46].mxu0  ;;  %4109 = vmatprep.mubr.msk.f32.mxu1 %vm4289_vm1, %v4288_v52 }
 0x3d7   : > { %v4104_v36 = vpop.f32.mrb[47].mxu0  ;;  %4117 = vmatprep.subr.mxu1 %v4288_v52 }
 0x3d9   : > { %4110 = vmatmul.mubr.msk.f32.vlgmr.msra.gmra.mrb[46].mxu1 %vm1588_vm2, %v2299_v35 }
 0x3da   : > { %4119 = vmatprep.mubr.msk.f32.mxu1 %vm4289_vm1, %v4288_v52 }
 0x480   : > { %v1676_v40 = vpop.f32.mrb[24].mxu1 }
 0x481   : > { %v4034_v41 = vpop.f32.mrb[25].mxu1  ;;  %v1767_v44 = vadd.f32 %v1676_v40, %v4416_v38  ;;  %v1856_v58 = vmul.f32 %v1676_v40, %v1676_v40 }
 0x482   : > { %v1679_v42 = vpop.f32.mrb[26].mxu1 }
 0x483   : > { %v4035_v43 = vpop.f32.mrb[27].mxu1  ;;  %v2048_v47 = vmul.f32 2.0, %v1767_v44  ;;  %v2054_v53 = vmul.f32 %v1767_v44, %v1767_v44 }
 0x488   : > { %v1761_v45 = vpop.f32.mrb[28].mxu1 }
 0x489   : > { %v1768_v46 = vadd.f32 %v1761_v45, %v4416_v38  ;;  %v4046_v29 = vpop.f32.mrb[29].mxu1  ;;  %v2034_v48 = vmul.f32 %v1761_v45, %v1676_v40  ;;  %v1945_v1 = vmul.f32 %v1761_v45, %v1761_v45 }
 0x48a   : > { %v1764_v49 = vpop.f32.mrb[30].mxu1 }
 0x48b   : > { %v4047_v50 = vpop.f32.mrb[31].mxu1  ;;  %v2049_v51 = vmul.f32 %v2048_v47, %v1768_v46  ;;  %v2055_v54 = vmul.f32 %v1768_v46, %v1768_v46 }
 0x48d   : > { %v2056_v55 = vadd.f32 %v2055_v54, %v2054_v53  ;;  %v2053_v7 = vadd.f32 %v2051_v56, %v2049_v51 }
 0x48f   : > { %v2057_v57 = vadd.f32 %v2056_v55, %v2051_v56 }
 0x490   : > { %v1850_v59 = vpop.f32.mrb[32].mxu1 }
 0x491   : > { %4263 = vrcp.f32 %v2057_v57  ;;  %v1857_v60 = vsub.f32 %v1850_v59, %v1856_v58  ;;  %v4058_v61 = vpop.f32.mrb[33].mxu1 }
 0x492   : > { %v1853_v62 = vpop.f32.mrb[34].mxu1 }
 0x493   : > { %v4059_v63 = vpop.f32.mrb[35].mxu1 }
 0x498   : > { %v1939_v2 = vpop.f32.mrb[36].mxu1 }
 0x499   : > { %v1946_v3 = vsub.f32 %v1939_v2, %v1945_v1  ;;  %v4070_v5 = vpop.f32.mrb[37].mxu1 }
 0x49a   : > { %v1942_v8 = vpop.f32.mrb[38].mxu1 }
 0x49b   : > { %v4264_v9 = vpop.eup %4263  ;;  %v2044_v10 = vadd.f32 %v1946_v3, %v1857_v60  ;;  %v4071_v11 = vpop.f32.mrb[39].mxu1 }
 0x49c   : > { %v2059_v12 = vmul.f32 %v4264_v9, %v2053_v7 }
 0x49d   : > { %v2045_v13 = vadd.f32 %v2044_v10, %v2041_v6 }
 0x49f   : > { %4265 = vrcp.f32 %v2045_v13 }
 0x4a0   : > { %v2028_v14 = vpop.f32.mrb[40].mxu1 }
 0x4a1   : > { %v2035_v15 = vsub.f32 %v2028_v14, %v2034_v48  ;;  %v4082_v17 = vpop.f32.mrb[41].mxu1 }
 0x4a2   : > { %v2031_v18 = vpop.f32.mrb[42].mxu1 }
 0x4a3   : > { %v4083_v19 = vpop.f32.mrb[43].mxu1  ;;  %v2036_v20 = vmul.f32 2.0, %v2035_v15 }
 0x4a5   : > { %v2043_v21 = vadd.f32 %v2041_v6, %v2036_v20 }
 0x4a8   : > { %v2229_v22 = vpop.f32.mrb[44].mxu1 }
 0x4a9   : > { %v4266_v23 = vpop.eup %4265  ;;  %v2378_v4 = vmul.f32 0.036351766, %v2229_v22  ;;  %v2383_v16 = vmul.f32 0.11042692, %v2229_v22  ;;  %4113 = vmatpush3.msra.mxu0 %v2229_v22  ;;  %v4097_v24 = vpop.f32.mrb[45].mxu1  ;;  %v2513_v32 = vmul.f32 %v2229_v22, %v2229_v22 }
 0x4aa   : > { %4115 = vmatmul.mubr.msk.f32.vlgmr.msra.gmra.mrb[48].mxu0 %vm2751_vm5, %v2749_v0  ;;  %4122 = vmatprep.subr.mxu0 %v4288_v52  ;;  %v2047_v25 = vmul.f32 %v4266_v23, %v2043_v21  ;;  %v2377_v26 = vmul.f32 0.0076728435, %v2229_v22  ;;  %v2388_v28 = vmul.f32 0.21508227, %v2229_v22  ;;  %v2393_v31 = vmul.f32 0.26860526, %v2229_v22 }
 0x4ab   : > { %v2380_v27 = vrot.slane %v2378_v4, 1  ;;  %4124 = vmatprep.mubr.msk.f32.mxu0 %vm4289_vm1, %v4288_v52  ;;  %v2385_v30 = vrot.slane %v2383_v16, 2  ;;  %v2515_v53 = vmul.f32 0.036351766, %v2513_v32  ;;  %v2520_v56 = vmul.f32 0.11042692, %v2513_v32 }
 0x4ac   : > { %v2372_v33 = vpop.f32.mrb[46].mxu1  ;;  %v2073_v34 = vsel %vm2061_vm6, %v2047_v25, 0.0  ;;  %v2390_v45 = vrot.slane %v2388_v28, 3  ;;  %v2060_v29 = vmul.f32 %v2059_v12, %v2047_v25  ;;  %v2395_v47 = vrot.slane %v2393_v31, 4 }
 0x4ad   : > { %v2382_v35 = vadd.f32 %v2380_v27, %v2377_v26  ;;  %v2444_v36 = vmul.f32 0.0076728435, %v2372_v33  ;;  %v4646_v40 = vmul.f32 0.036351766, %v2372_v33  ;;  %v4648_v41 = vmul.f32 0.11042692, %v2372_v33  ;;  %4123 = vmatpush3.msra.mxu0 %v2372_v33  ;;  %2074 = vadd.xlane.f32.xlu1 %v2073_v34 }
 0x4ae   : > { %v4650_v42 = vmul.f32 %v2372_v33, %v2229_v22  ;;  %v4111_v43 = vpop.f32.mrb[47].mxu1  ;;  %4125 = vmatmul.mubr.msk.f32.vlgmr.msra.gmra.mrb[50].mxu0 %vm2751_vm5, %v2749_v0  ;;  %4132 = vmatprep.subr.mxu0 %v4288_v52  ;;  %v2062_v51 = vsel %vm2061_vm6, %v2060_v29, 0.0  ;;  %v2398_v54 = vrot.slane %v2388_v28, 5  ;;  %v2455_v55 = vmul.f32 0.21508227, %v2372_v33 }
 0x4af   : > { %v2387_v44 = vadd.f32 %v2385_v30, %v2382_v35  ;;  %v2447_v46 = vrot.slane %v4646_v40, 1  ;;  %4134 = vmatprep.mubr.msk.f32.mxu0 %vm4289_vm1, %v4288_v52  ;;  %v2452_v48 = vrot.slane %v4648_v41, 2  ;;  %2063 = vadd.xlane.f32.xlu0 %v2062_v51  ;;  %v2514_v58 = vmul.f32 0.0076728435, %v2513_v32 }
 0x4b0   : > { %v2517_v59 = vrot.slane %v2515_v53, 1  ;;  %v2525_v60 = vmul.f32 0.21508227, %v2513_v32  ;;  %v2583_v62 = vmul.f32 %v2372_v33, %v2372_v33  ;;  %v2401_v63 = vrot.slane %v2383_v16, 6 }
 0x4b1   : > { %v2392_v49 = vadd.f32 %v2390_v45, %v2387_v44  ;;  %v2449_v50 = vadd.f32 %v2447_v46, %v2444_v36  ;;  %v2522_v3 = vrot.slane %v2520_v56, 2  ;;  %v2530_v5 = vmul.f32 0.26860526, %v2513_v32 }
 0x4b2   : > { %v2519_v2 = vadd.f32 %v2517_v59, %v2514_v58  ;;  %v2457_v6 = vrot.slane %v2455_v55, 3  ;;  %v2460_v7 = vmul.f32 0.26860526, %v2372_v33  ;;  %v2404_v9 = vrot.slane %v2378_v4, 7 }
 0x4b3   : > { %v2397_v57 = vadd.f32 %v2395_v47, %v2392_v49  ;;  %v2454_v61 = vadd.f32 %v2452_v48, %v2449_v50  ;;  %v2527_v11 = vrot.slane %v2525_v60, 3  ;;  %v4659_v13 = vmul.f32 0.036351766, %v2583_v62 }
 0x4b4   : > { %v2524_v10 = vadd.f32 %v2522_v3, %v2519_v2  ;;  %v2532_v17 = vrot.slane %v2530_v5, 4  ;;  %v2462_v18 = vrot.slane %v2460_v7, 4  ;;  %v2535_v0 = vrot.slane %v2525_v60, 5 }
 0x4b5   : > { %v2400_v1 = vadd.f32 %v2398_v54, %v2397_v57  ;;  %v2459_v12 = vadd.f32 %v2457_v6, %v2454_v61  ;;  %v2584_v22 = vmul.f32 0.0076728435, %v2583_v62  ;;  %v2587_v23 = vrot.slane %v4659_v13, 1 }
 0x4b6   : > { %v2529_v15 = vadd.f32 %v2527_v11, %v2524_v10  ;;  %v2590_v16 = vmul.f32 0.11042692, %v2583_v62  ;;  %v2538_v24 = vrot.slane %v2520_v56, 6  ;;  %v2465_v25 = vrot.slane %v2455_v55, 5 }
 0x4b7   : > { %v2403_v8 = vadd.f32 %v2401_v63, %v2400_v1  ;;  %v2464_v21 = vadd.f32 %v2462_v18, %v2459_v12  ;;  %v2541_v27 = vrot.slane %v2515_v53, 7  ;;  %v2589_v30 = vadd.f32 %v2587_v23, %v2584_v22 }
 0x4b8   : > { %v2534_v20 = vadd.f32 %v2532_v17, %v2529_v15  ;;  %v2592_v31 = vrot.slane %v2590_v16, 2  ;;  %v2468_v33 = vrot.slane %v4648_v41, 6  ;;  %v2595_v34 = vmul.f32 0.21508227, %v2583_v62 }
 0x4b9   : > { %v4661_v14 = vadd.f32 %v2404_v9, %v2403_v8  ;;  %v2467_v28 = vadd.f32 %v2465_v25, %v2464_v21  ;;  %v2471_v45 = vrot.slane %v4646_v40, 7  ;;  %v2600_v29 = vmul.f32 0.26860526, %v2583_v62 }
 0x4ba   : > { %v2537_v4 = vadd.f32 %v2535_v0, %v2534_v20  ;;  %v2594_v43 = vadd.f32 %v2592_v31, %v2589_v30  ;;  %v2597_v46 = vrot.slane %v2595_v34, 3  ;;  %v2655_v53 = vmul.f32 0.036351766, %v4650_v42  ;;  %v4746_v30 = vpop.permute.xlu0 %2725 }
 0x4bb   : > { %v2414_v19 = vmul.f32 0.11042692, %v4661_v14  ;;  %v2470_v36 = vadd.f32 %v2468_v33, %v2467_v28  ;;  %v2408_v44 = vmul.f32 0.036351766, %v4661_v14  ;;  %v2420_v49 = vmul.f32 0.21508227, %v4661_v14 }
 0x4bc   : > { %v2540_v26 = vadd.f32 %v2538_v24, %v2537_v4  ;;  %v2599_v41 = vadd.f32 %v2597_v46, %v2594_v43  ;;  %v2602_v50 = vrot.slane %v2600_v29, 4  ;;  %v2426_v54 = vmul.f32 0.26860526, %v4661_v14  ;;  %v4742_v28 = vld [vmem:[%s4896_s13] sm:$0xff] }
 0x4bd   : > { %v4676_v48 = vadd.f32 %v2471_v45, %v2470_v36  ;;  %v2605_v55 = vrot.slane %v2595_v34, 5  ;;  %v2657_v58 = vrot.slane %v2655_v53, 1  ;;  %v2608_v59 = vrot.slane %v2590_v16, 6  ;;  %4118 = vmatpush3.msra.mxu1 %v4742_v28 }
 0x4be   : > { %2416 = vrot.lane.b32.xlu1 %v2414_v19, %s4291_s30  ;;  %v4666_v32 = vadd.f32 %v2541_v27, %v2540_v26  ;;  %v2604_v51 = vadd.f32 %v2602_v50, %v2599_v41  ;;  %v2654_v60 = vmul.f32 0.0076728435, %v4650_v42  ;;  %v2660_v61 = vmul.f32 0.11042692, %v4650_v42  ;;  %4127 = vmatprep.subr.mxu1 %v4288_v52  ;;  %v4748_v31 = vpop.permute.xlu0 %3210 }
 0x4bf   : > { %v2487_v40 = vmul.f32 0.21508227, %v4676_v48  ;;  %v2493_v56 = vmul.f32 0.26860526, %v4676_v48  ;;  %v2611_v1 = vrot.slane %v4659_v13, 7  ;;  %v2681_v22 = vrot.slane %v2655_v53, 7 }
 0x4c0   : > { %v2557_v35 = vmul.f32 0.21508227, %v4666_v32  ;;  %v2545_v47 = vmul.f32 0.036351766, %v4666_v32  ;;  %v2607_v57 = vadd.f32 %v2605_v55, %v2604_v51  ;;  %v2659_v63 = vadd.f32 %v2657_v58, %v2654_v60 }
 0x4c1   : > { %v2662_v2 = vrot.slane %v2660_v61, 2  ;;  %v2665_v3 = vmul.f32 0.21508227, %v4650_v42  ;;  %v2481_v5 = vmul.f32 0.11042692, %v4676_v48  ;;  %v2678_v0 = vrot.slane %v2660_v61, 6 }
 0x4c2   : > { %2436 = vrot.lane.b32.xlu1 %v2414_v19, %s4292_s16  ;;  %v2610_v62 = vadd.f32 %v2608_v59, %v2607_v57  ;;  %v2670_v9 = vmul.f32 0.26860526, %v4650_v42  ;;  %v2551_v12 = vmul.f32 0.11042692, %v4666_v32  ;;  %v2563_v20 = vmul.f32 0.26860526, %v4666_v32 }
 0x4c3   : > { %v2664_v7 = vadd.f32 %v2662_v2, %v2659_v63  ;;  %v2667_v8 = vrot.slane %v2665_v3, 3  ;;  %v2675_v18 = vrot.slane %v2665_v3, 5  ;;  %v2475_v16 = vmul.f32 0.036351766, %v4676_v48 }
 0x4c4   : > { %v4696_v6 = vadd.f32 %v2611_v1, %v2610_v62  ;;  %v2672_v13 = vrot.slane %v2670_v9, 4  ;;  %v2407_v29 = vmul.f32 0.0076728435, %v4661_v14 }
 0x4c5   : > { %2410 = vrot.lane.b32.xlu0 %v2408_v44, %s4287_s21  ;;  %v2669_v11 = vadd.f32 %v2667_v8, %v2664_v7  ;;  %v2544_v8 = vmul.f32 0.0076728435, %v4666_v32  ;;  %v2474_v32 = vmul.f32 0.0076728435, %v4676_v48 }
 0x4c6   : > { %2569 = vrot.lane.b32.xlu1 %v2557_v35, %s4293_s17  ;;  %v2621_v10 = vmul.f32 0.11042692, %v4696_v6  ;;  %v2627_v15 = vmul.f32 0.21508227, %v4696_v6  ;;  %v2633_v42 = vmul.f32 0.26860526, %v4696_v6 }
 0x4c7   : > { %v2674_v17 = vadd.f32 %v2672_v13, %v2669_v11  ;;  %v2615_v26 = vmul.f32 0.036351766, %v4696_v6 }
 0x4c9   : > { %2422 = vrot.lane.b32.xlu0 %v2420_v49, %s4295_s22  ;;  %v2677_v19 = vadd.f32 %v2675_v18, %v2674_v17 }
 0x4ca   : > { %2577 = vrot.lane.b32.xlu1 %v2545_v47, %s4294_s20 }
 0x4cb   : > { %v2680_v21 = vadd.f32 %v2678_v0, %v2677_v19 }
 0x4cd   : > { %2428 = vrot.lane.b32.xlu0 %v2426_v54, %s4296_s23  ;;  %v4714_v23 = vadd.f32 %v2681_v22, %v2680_v21 }
 0x4ce   : > { %2489 = vrot.lane.b32.xlu1 %v2487_v40, %s4295_s22 }
 0x4cf   : > { %v4720_v4 = vmul.f32 0.11042692, %v4714_v23  ;;  %v2703_v24 = vmul.f32 0.26860526, %v4714_v23  ;;  %v2697_v25 = vmul.f32 0.21508227, %v4714_v23 }
 0x4d0   : > { %v4733_v27 = vmul.f32 0.036351766, %v4714_v23 }
 0x4d1   : > { %2432 = vrot.lane.b32.xlu0 %v2420_v49, %s4293_s17 }
 0x4d2   : > { %2495 = vrot.lane.b32.xlu1 %v2493_v56, %s4296_s23 }
 0x4d5   : > { %2440 = vrot.lane.b32.xlu0 %v2408_v44, %s4294_s20 }
 0x4d6   : > { %2499 = vrot.lane.b32.xlu1 %v2487_v40, %s4293_s17 }
 0x4d9   : > { %2547 = vrot.lane.b32.xlu0 %v2545_v47, %s4287_s21 }
 0x4da   : > { %2503 = vrot.lane.b32.xlu1 %v2481_v5, %s4292_s16 }
 0x4dd   : > { %2553 = vrot.lane.b32.xlu0 %v2551_v12, %s4291_s30 }
 0x4de   : > { %2623 = vrot.lane.b32.xlu1 %v2621_v10, %s4291_s30 }
 0x4e1   : > { %2559 = vrot.lane.b32.xlu0 %v2557_v35, %s4295_s22 }
 0x4e2   : > { %2629 = vrot.lane.b32.xlu1 %v2627_v15, %s4295_s22 }
 0x4e5   : > { %2565 = vrot.lane.b32.xlu0 %v2563_v20, %s4296_s23 }
 0x4e6   : > { %2635 = vrot.lane.b32.xlu1 %v2633_v42, %s4296_s23 }
 0x4e9   : > { %2573 = vrot.lane.b32.xlu0 %v2551_v12, %s4292_s16 }
 0x4ea   : > { %2639 = vrot.lane.b32.xlu1 %v2627_v15, %s4293_s17 }
 0x4ed   : > { %2477 = vrot.lane.b32.xlu0 %v2475_v16, %s4287_s21 }
 0x4ee   : > { %2643 = vrot.lane.b32.xlu1 %v2621_v10, %s4292_s16 }
 0x4f1   : > { %2483 = vrot.lane.b32.xlu0 %v2481_v5, %s4291_s30 }
 0x4f2   : > { %2693 = vrot.lane.b32.xlu1 %v4720_v4, %s4291_s30 }
 0x4f5   : > { %2507 = vrot.lane.b32.xlu0 %v2475_v16, %s4294_s20 }
 0x4f6   : > { %2705 = vrot.lane.b32.xlu1 %v2703_v24, %s4296_s23 }
 0x4f9   : > { %2617 = vrot.lane.b32.xlu0 %v2615_v26, %s4287_s21 }
 0x4fa   : > { %2709 = vrot.lane.b32.xlu1 %v2697_v25, %s4293_s17 }
 0x4fd   : > { %2687 = vrot.lane.b32.xlu0 %v4733_v27, %s4287_s21 }
 0x501   : > { %2647 = vrot.lane.b32.xlu0 %v2615_v26, %s4294_s20 }
 0x505   : > { %2699 = vrot.lane.b32.xlu0 %v2697_v25, %s4295_s22 }
 0x53a   : > { %v2075_v33 = vpop.xlane.xlu1 %2074 }
 0x53b   : > { %v2076_v34 = vrot.slane %v2075_v33, 4 }
 0x53c   : > { %v2064_v44 = vpop.xlane.xlu0 %2063 }
 0x53d   : > { %v2077_v35 = vadd.f32 %v2076_v34, %v2075_v33  ;;  %v2065_v45 = vrot.slane %v2064_v44, 4 }
 0x53e   : > { %v2417_v36 = vpop.permute.xlu1 %2416 }
 0x53f   : > { %v2078_v43 = vrot.slane %v2077_v35, 2  ;;  %v2066_v46 = vadd.f32 %v2065_v45, %v2064_v44 }
 0x540   : > { %v2411_v41 = vpop.permute.xlu0 %2410 }
 0x541   : > { %v2079_v49 = vadd.f32 %v2078_v43, %v2077_v35  ;;  %v2067_v50 = vrot.slane %v2066_v46, 2  ;;  %v2413_v40 = vadd.f32 %v2411_v41, %v2407_v29  ;;  %v2614_v41 = vmul.f32 0.0076728435, %v4696_v6 }
 0x542   : > { %v2437_v47 = vpop.permute.xlu1 %2436 }
 0x543   : > { %v2419_v51 = vadd.f32 %v2417_v36, %v2413_v40  ;;  %v2068_v54 = vadd.f32 %v2067_v50, %v2066_v46  ;;  %v2080_v56 = vrot.slane %v2079_v49, 1 }
 0x544   : > { %v2423_v55 = vpop.permute.xlu0 %2422 }
 0x545   : > { %v2425_v57 = vadd.f32 %v2423_v55, %v2419_v51  ;;  %v2069_v58 = vrot.slane %v2068_v54, 1  ;;  %v2081_v61 = vadd.f32 %v2080_v56, %v2079_v49 }
 0x546   : > { %v2570_v53 = vpop.permute.xlu1 %2569 }
 0x547   : > { %v2070_v59 = vadd.f32 %v2069_v58, %v2068_v54 }
 0x548   : > { %v2429_v60 = vpop.permute.xlu0 %2428 }
 0x549   : > { %v2431_v63 = vadd.f32 %v2429_v60, %v2425_v57  ;;  %4212 = vpush %v2070_v59 }
 0x54a   : > { %v2578_v62 = vpop.permute.xlu1 %2577  ;;  %4214 = vpush %v2081_v61 }
 0x54c   : > { %v2433_v14 = vpop.permute.xlu0 %2432 }
 0x54d   : > { %v2435_v1 = vadd.f32 %v2433_v14, %v2431_v63 }
 0x54e   : > { %v2490_v2 = vpop.permute.xlu1 %2489 }
 0x54f   : > { %v2439_v3 = vadd.f32 %v2437_v47, %v2435_v1 }
 0x550   : > { %v2441_v5 = vpop.permute.xlu0 %2440 }
 0x551   : > { %v2443_v7 = vadd.f32 %v2441_v5, %v2439_v3 }
 0x552   : > { %v2496_v9 = vpop.permute.xlu1 %2495 }
 0x553   : > { %v2581_v24 = vmul.f32 %v2443_v7, %v2443_v7  ;;  %v2511_v50 = vadd.f32 %v2443_v7, %v4416_v38 }
 0x554   : > { %v2548_v10 = vpop.permute.xlu0 %2547 }
 0x555   : > { %v2550_v11 = vadd.f32 %v2548_v10, %v2544_v8  ;;  %v2733_v48 = vmul.f32 2.0, %v2511_v50  ;;  %v2736_v61 = vmul.f32 %v2511_v50, %v2511_v50 }
 0x556   : > { %v2500_v13 = vpop.permute.xlu1 %2499 }
 0x558   : > { %v2554_v12 = vpop.permute.xlu0 %2553 }
 0x559   : > { %v2556_v17 = vadd.f32 %v2554_v12, %v2550_v11 }
 0x55a   : > { %v2504_v42 = vpop.permute.xlu1 %2503 }
 0x55c   : > { %v2560_v15 = vpop.permute.xlu0 %2559 }
 0x55d   : > { %v2562_v18 = vadd.f32 %v2560_v15, %v2556_v17 }
 0x55e   : > { %v2624_v16 = vpop.permute.xlu1 %2623 }
 0x560   : > { %v2566_v19 = vpop.permute.xlu0 %2565 }
 0x561   : > { %v2568_v20 = vadd.f32 %v2566_v19, %v2562_v18 }
 0x562   : > { %v2630_v35 = vpop.permute.xlu1 %2629 }
 0x563   : > { %v2572_v0 = vadd.f32 %v2570_v53, %v2568_v20 }
 0x564   : > { %v2574_v21 = vpop.permute.xlu0 %2573 }
 0x565   : > { %v2576_v22 = vadd.f32 %v2574_v21, %v2572_v0 }
 0x566   : > { %v2636_v29 = vpop.permute.xlu1 %2635 }
 0x567   : > { %v2580_v25 = vadd.f32 %v2578_v62, %v2576_v22 }
 0x568   : > { %v2478_v26 = vpop.permute.xlu0 %2477 }
 0x569   : > { %v2582_v33 = vsub.f32 %v2580_v25, %v2581_v24  ;;  %v2480_v34 = vadd.f32 %v2478_v26, %v2474_v32 }
 0x56a   : > { %v2640_v55 = vpop.permute.xlu1 %2639 }
 0x56c   : > { %v2484_v36 = vpop.permute.xlu0 %2483 }
 0x56d   : > { %v2486_v43 = vadd.f32 %v2484_v36, %v2480_v34 }
 0x56e   : > { %v2644_v3 = vpop.permute.xlu1 %2643 }
 0x56f   : > { %v2492_v44 = vadd.f32 %v2490_v2, %v2486_v43 }
 0x570   : > { %v2508_v45 = vpop.permute.xlu0 %2507 }
 0x571   : > { %v2498_v46 = vadd.f32 %v2496_v9, %v2492_v44 }
 0x573   : > { %v2502_v47 = vadd.f32 %v2500_v13, %v2498_v46 }
 0x574   : > { %v2618_v49 = vpop.permute.xlu0 %2617 }
 0x575   : > { %v2506_v40 = vadd.f32 %v2504_v42, %v2502_v47  ;;  %v2620_v51 = vadd.f32 %v2618_v49, %v2614_v41  ;;  %v3234_v42 = vld [vmem:[%s4893_s10] sm:$0x3] }
 0x577   : > { %v2510_v53 = vadd.f32 %v2508_v45, %v2506_v40  ;;  %v2626_v54 = vadd.f32 %v2624_v16, %v2620_v51 }
 0x578   : > { %v4756_v58 = vpop.permute.xlu0 %2687 }
 0x579   : > { %v2512_v56 = vadd.f32 %v2510_v53, %v4416_v38  ;;  %v2632_v57 = vadd.f32 %v2630_v35, %v2626_v54  ;;  %v4758_v60 = vmul.f32 %v2510_v53, %v2443_v7 }
 0x57b   : > { %v2734_v62 = vmul.f32 %v2733_v48, %v2512_v56  ;;  %v2737_v6 = vmul.f32 %v2512_v56, %v2512_v56  ;;  %v2638_v63 = vadd.f32 %v2636_v29, %v2632_v57 }
 0x57c   : > { %v2648_v10 = vpop.permute.xlu0 %2647 }
 0x57d   : > { %v2821_v59 = vpop.f32.mrb[48].mxu0  ;;  %v2738_v1 = vadd.f32 %v2737_v6, %v2736_v61  ;;  %v2642_v2 = vadd.f32 %v2640_v55, %v2638_v63  ;;  %v2735_v15 = vadd.f32 %v2734_v62, %v4618_v37 }
 0x57e   : > { %v4116_v14 = vpop.f32.mrb[49].mxu0  ;;  %4120 = vmatmul.mubr.msk.f32.vlgmr.msra.gmra.mrb[48].mxu1 %vm2751_vm5, %v2821_v59 }
 0x57f   : > { %4128 = vmatpush3.msra.mxu1 %v4742_v28  ;;  %4129 = vmatprep.mubr.msk.f32.mxu1 %vm4289_vm1, %v4288_v52  ;;  %v2739_v7 = vadd.f32 %v2738_v1, %v4618_v37  ;;  %v2646_v8 = vadd.f32 %v2644_v3, %v2642_v2  ;;  %v2651_v28 = vmul.f32 %v2510_v53, %v2510_v53 }
 0x580   : > { %4137 = vmatprep.subr.mxu1 %v4288_v52 }
 0x581   : > { %v2964_v5 = vpop.f32.mrb[50].mxu0  ;;  %4267 = vrcp.f32 %v2739_v7  ;;  %v2650_v11 = vadd.f32 %v2648_v10, %v2646_v8 }
 0x582   : > { %4130 = vmatmul.mubr.msk.f32.vlgmr.msra.gmra.mrb[50].mxu1 %vm2751_vm5, %v2964_v5  ;;  %v4126_v9 = vpop.f32.mrb[51].mxu0 }
 0x583   : > { %4139 = vmatprep.mubr.msk.f32.mxu1 %vm4289_vm1, %v4288_v52  ;;  %v2652_v12 = vsub.f32 %v2650_v11, %v2651_v28 }
 0x585   : > { %v4769_v13 = vadd.f32 %v2652_v12, %v2582_v33 }
 0x58b   : > { %v4268_v17 = vpop.eup %4267 }
 0x58c   : > { %v4772_v18 = vmul.f32 %v4268_v17, %v2735_v15 }
 0x651   : > { %v2894_v19 = vpop.f32.mrb[48].mxu1 }
 0x652   : > { %v3043_v20 = vmul.f32 0.26579726, %v2894_v19  ;;  %v3048_v0 = vmul.f32 0.33194062, %v2894_v19  ;;  %v3106_v21 = vmul.f32 %v2894_v19, %v2894_v19  ;;  %4133 = vmatpush3.msk.msra.mxu0 %vm3240_vm7, %v2894_v19  ;;  %v4121_v22 = vpop.f32.mrb[49].mxu1 }
 0x653   : > { %4135 = vmatmul.mubr.msk.f32.vlgmr.msra.gmra.mrb[52].mxu0 %vm3236_vm8, %v3234_v42  ;;  %4142 = vmatprep.subr.mxu0 %v4288_v52  ;;  %v3042_v37 = vmul.f32 0.13646486, %v2894_v19 }
 0x654   : > { %v3045_v16 = vrot.slane %v3043_v20, 1  ;;  %4144 = vmatprep.mubr.msk.f32.mxu0 %vm4289_vm1, %v4288_v52  ;;  %v3108_v25 = vmul.f32 0.26579726, %v3106_v21  ;;  %v3113_v26 = vmul.f32 0.33194062, %v3106_v21  ;;  %v3050_v33 = vrot.slane %v3048_v0, 2 }
 0x655   : > { %v3037_v24 = vpop.f32.mrb[50].mxu1  ;;  %v3107_v44 = vmul.f32 0.13646486, %v3106_v21  ;;  %v3053_v41 = vrot.slane %v3043_v20, 3 }
 0x656   : > { %v3074_v32 = vmul.f32 0.26579726, %v3037_v24  ;;  %v3140_v34 = vmul.f32 %v3037_v24, %v3037_v24  ;;  %4143 = vmatpush3.msk.msra.mxu0 %vm3240_vm7, %v3037_v24  ;;  %v3174_v35 = vmul.f32 %v3037_v24, %v2894_v19  ;;  %v4131_v36 = vpop.f32.mrb[51].mxu1  ;;  %v3047_v43 = vadd.f32 %v3045_v16, %v3042_v37 }
 0x657   : > { %4145 = vmatmul.mubr.msk.f32.vlgmr.msra.gmra.mrb[54].mxu0 %vm3236_vm8, %v3234_v42  ;;  %v3110_v45 = vrot.slane %v3108_v25, 1  ;;  %v3073_v46 = vmul.f32 0.13646486, %v3037_v24  ;;  %v3079_v47 = vmul.f32 0.33194062, %v3037_v24  ;;  %v3115_v40 = vrot.slane %v3113_v26, 2 }
 0x658   : > { %v3076_v29 = vrot.slane %v3074_v32, 1  ;;  %v3052_v49 = vadd.f32 %v3050_v33, %v3047_v43  ;;  %v3142_v51 = vmul.f32 0.26579726, %v3140_v34  ;;  %v3118_v55 = vrot.slane %v3108_v25, 3  ;;  %v3235_v26 = vld [vmem:[%s4897_s14] sm:$0xf]  ;;  %v4808_v33 = vpop.permute.xlu1 %2693 }
 0x659   : > { %v3112_v50 = vadd.f32 %v3110_v45, %v3107_v44  ;;  %v3081_v48 = vrot.slane %v3079_v47, 2  ;;  %v3141_v57 = vmul.f32 0.13646486, %v3140_v34  ;;  %v3147_v59 = vmul.f32 0.33194062, %v3140_v34  ;;  %4138 = vmatpush3.msk.msra.mxu1 %vm3240_vm7, %v3235_v26 }
 0x65a   : > { %v3055_v53 = vadd.f32 %v3053_v41, %v3052_v49  ;;  %v3078_v56 = vadd.f32 %v3076_v29, %v3073_v46  ;;  %v3144_v6 = vrot.slane %v3142_v51, 1  ;;  %v3176_v63 = vmul.f32 0.26579726, %v3174_v35  ;;  %4147 = vmatprep.subr.mxu1 %v4288_v52 }
 0x65b   : > { %v3117_v54 = vadd.f32 %v3115_v40, %v3112_v50  ;;  %v3149_v1 = vrot.slane %v3147_v59, 2  ;;  %v3084_v8 = vrot.slane %v3074_v32, 3  ;;  %v3175_v9 = vmul.f32 0.13646486, %v3174_v35 }
 0x65c   : > { %v3057_v61 = vmul.f32 0.26579726, %v3055_v53  ;;  %v3083_v14 = vadd.f32 %v3081_v48, %v3078_v56  ;;  %v3063_v3 = vmul.f32 0.33194062, %v3055_v53  ;;  %v3146_v5 = vadd.f32 %v3144_v6, %v3141_v57  ;;  %v4810_v32 = vpop.permute.xlu1 %2705 }
 0x65d   : > { %v3120_v62 = vadd.f32 %v3118_v55, %v3117_v54  ;;  %v3178_v7 = vrot.slane %v3176_v63, 1  ;;  %v3181_v10 = vmul.f32 0.33194062, %v3174_v35  ;;  %v3152_v17 = vrot.slane %v3142_v51, 3  ;;  %v4814_v35 = vpop.permute.xlu0 %2699 }
 0x65e   : > { %3069 = vrot.lane.b32.xlu1 %v3057_v61, %s4295_s22  ;;  %3059 = vrot.lane.b32.xlu0 %v3057_v61, %s4287_s21  ;;  %v3086_v11 = vadd.f32 %v3084_v8, %v3083_v14  ;;  %v3151_v12 = vadd.f32 %v3149_v1, %v3146_v5  ;;  %v3186_v22 = vrot.slane %v3176_v63, 3  ;;  %v3056_v44 = vmul.f32 0.13646486, %v3055_v53 }
 0x65f   : > { %v3122_v2 = vmul.f32 0.26579726, %v3120_v62  ;;  %v3128_v28 = vmul.f32 0.33194062, %v3120_v62  ;;  %v3180_v15 = vadd.f32 %v3178_v7, %v3175_v9  ;;  %v3183_v42 = vrot.slane %v3181_v10, 2 }
 0x660   : > { %v3088_v19 = vmul.f32 0.26579726, %v3086_v11  ;;  %v3094_v20 = vmul.f32 0.33194062, %v3086_v11  ;;  %v3154_v0 = vadd.f32 %v3152_v17, %v3151_v12  ;;  %v4812_v34 = vpop.permute.xlu1 %2709  ;;  %v3121_v47 = vmul.f32 0.13646486, %v3120_v62 }
 0x661   : > { %v3185_v21 = vadd.f32 %v3183_v42, %v3180_v15  ;;  %v3087_v56 = vmul.f32 0.13646486, %v3086_v11 }
 0x662   : > { %3124 = vrot.lane.b32.xlu1 %v3122_v2, %s4287_s21  ;;  %3065 = vrot.lane.b32.xlu0 %v3063_v3, %s4291_s30  ;;  %v3156_v37 = vmul.f32 0.26579726, %v3154_v0  ;;  %v3162_v25 = vmul.f32 0.33194062, %v3154_v0  ;;  %v3155_v10 = vmul.f32 0.13646486, %v3154_v0 }
 0x663   : > { %v4792_v16 = vadd.f32 %v3186_v22, %v3185_v21 }
 0x665   : > { %v4797_v24 = vmul.f32 0.26579726, %v4792_v16 }
 0x666   : > { %3130 = vrot.lane.b32.xlu1 %v3128_v28, %s4291_s30  ;;  %3134 = vrot.lane.b32.xlu0 %v3122_v2, %s4295_s22 }
 0x66a   : > { %3090 = vrot.lane.b32.xlu1 %v3088_v19, %s4287_s21  ;;  %3096 = vrot.lane.b32.xlu0 %v3094_v20, %s4291_s30 }
 0x66e   : > { %3168 = vrot.lane.b32.xlu1 %v3156_v37, %s4295_s22  ;;  %3100 = vrot.lane.b32.xlu0 %v3088_v19, %s4295_s22 }
 0x672   : > { %3192 = vrot.lane.b32.xlu1 %v4797_v24, %s4287_s21  ;;  %3158 = vrot.lane.b32.xlu0 %v3156_v37, %s4287_s21 }
 0x676   : > { %3164 = vrot.lane.b32.xlu0 %v3162_v25, %s4291_s30 }
 0x6d0   : > { %v3070_v36 = vpop.permute.xlu1 %3069  ;;  %v3060_v43 = vpop.permute.xlu0 %3059 }
 0x6d1   : > { %v3062_v45 = vadd.f32 %v3060_v43, %v3056_v44 }
 0x6d4   : > { %v3125_v46 = vpop.permute.xlu1 %3124  ;;  %v3066_v29 = vpop.permute.xlu0 %3065 }
 0x6d5   : > { %v3068_v41 = vadd.f32 %v3066_v29, %v3062_v45  ;;  %v3127_v49 = vadd.f32 %v3125_v46, %v3121_v47 }
 0x6d7   : > { %v3072_v50 = vadd.f32 %v3070_v36, %v3068_v41 }
 0x6d8   : > { %v3131_v40 = vpop.permute.xlu1 %3130  ;;  %v3135_v51 = vpop.permute.xlu0 %3134 }
 0x6d9   : > { %v3133_v54 = vadd.f32 %v3131_v40, %v3127_v49  ;;  %v3138_v55 = vmul.f32 %v3072_v50, %v3072_v50  ;;  %v3104_v63 = vadd.f32 %v3072_v50, %v4416_v38 }
 0x6db   : > { %v3137_v48 = vadd.f32 %v3135_v51, %v3133_v54  ;;  %v3218_v2 = vmul.f32 2.0, %v3104_v63  ;;  %v3221_v7 = vmul.f32 %v3104_v63, %v3104_v63 }
 0x6dc   : > { %v3091_v57 = vpop.permute.xlu1 %3090  ;;  %v3097_v59 = vpop.permute.xlu0 %3096 }
 0x6dd   : > { %v3139_v61 = vsub.f32 %v3137_v48, %v3138_v55  ;;  %v3093_v6 = vadd.f32 %v3091_v57, %v3087_v56 }
 0x6df   : > { %v3099_v53 = vadd.f32 %v3097_v59, %v3093_v6 }
 0x6e0   : > { %v3101_v14 = vpop.permute.xlu0 %3100  ;;  %v3169_v42 = vpop.permute.xlu1 %3168 }
 0x6e1   : > { %v3103_v1 = vadd.f32 %v3101_v14, %v3099_v53 }
 0x6e3   : > { %v3105_v62 = vadd.f32 %v3103_v1, %v4416_v38  ;;  %v4818_v3 = vmul.f32 %v3103_v1, %v3072_v50  ;;  %v3172_v19 = vmul.f32 %v3103_v1, %v3103_v1 }
 0x6e4   : > { %v3159_v5 = vpop.permute.xlu0 %3158 }
 0x6e5   : > { %v3219_v8 = vmul.f32 %v3218_v2, %v3105_v62  ;;  %v3222_v9 = vmul.f32 %v3105_v62, %v3105_v62  ;;  %v3161_v11 = vadd.f32 %v3159_v5, %v3155_v10 }
 0x6e7   : > { %v3223_v28 = vadd.f32 %v3222_v9, %v3221_v7  ;;  %v3220_v37 = vadd.f32 %v3219_v8, %v4625_v39  ;;  %v4838_v9 = vld [vmem:[%s4883_s0 + $0x4] sm:$0x1] }
 0x6e8   : > { %v3165_v12 = vpop.permute.xlu0 %3164 }
 0x6e9   : > { %v3224_v15 = vadd.f32 %v3223_v28, %v4625_v39  ;;  %v3167_v17 = vadd.f32 %v3165_v12, %v3161_v11  ;;  %v3196_v12 = vmul.f32 0.33194062, %v4792_v16 }
 0x6eb   : > { %4269 = vrcp.f32 %v3224_v15  ;;  %v3171_v20 = vadd.f32 %v3169_v42, %v3167_v17  ;;  %v2684_v17 = vmul.f32 0.0076728435, %v4714_v23  ;;  %v3193_v42 = vpop.permute.xlu1 %3192  ;;  %v2730_v23 = vadd.f32 %v4769_v13, %v4746_v30 }
 0x6ed   : > { %v3173_v21 = vsub.f32 %v3171_v20, %v3172_v19  ;;  %4271 = vrcp.f32 %v2730_v23 }
 0x6ef   : > { %v4821_v22 = vadd.f32 %v3173_v21, %v3139_v61 }
 0x6f5   : > { %v4270_v25 = vpop.eup %4269 }
 0x6f6   : > { %v4824_v36 = vmul.f32 %v4270_v25, %v3220_v37 }
 0x726   : > { %v3310_v43 = vpop.f32.mrb[52].mxu0 }
 0x727   : > { %4140 = vmatmul.mubr.msk.f32.vlgmr.msra.gmra.mrb[52].mxu1 %vm3236_vm8, %v3310_v43  ;;  %v4136_v0 = vpop.f32.mrb[53].mxu0 }
 0x728   : > { %4148 = vmatpush3.msk.msra.mxu1 %vm3240_vm7, %v3235_v26  ;;  %4149 = vmatprep.mubr.msk.f32.mxu1 %vm4289_vm1, %v4288_v52 }
 0x72a   : > { %v3459_v44 = vpop.f32.mrb[54].mxu0 }
 0x72b   : > { %4150 = vmatmul.mubr.msk.f32.vlgmr.msra.gmra.mrb[54].mxu1 %vm3236_vm8, %v3459_v44  ;;  %v4146_v45 = vpop.f32.mrb[55].mxu0 }
 0x7fa   : > { %v3386_v46 = vpop.f32.mrb[52].mxu1 }
 0x7fb   : > { %v3538_v29 = vmul.f32 0.5553281, %v3386_v46  ;;  %v3565_v47 = vmul.f32 %v3386_v46, %v3386_v46  ;;  %v4141_v39 = vpop.f32.mrb[53].mxu1  ;;  %v3537_v50 = vmul.f32 0.44467196, %v3386_v46 }
 0x7fd   : > { %v3540_v41 = vrot.slane %v3538_v29, 1  ;;  %v3567_v49 = vmul.f32 0.5553281, %v3565_v47  ;;  %v3566_v26 = vmul.f32 0.44467196, %v3565_v47 }
 0x7fe   : > { %v3532_v40 = vpop.f32.mrb[54].mxu1 }
 0x7ff   : > { %v3551_v51 = vmul.f32 0.5553281, %v3532_v40  ;;  %v3581_v54 = vmul.f32 %v3532_v40, %v3532_v40  ;;  %v3597_v55 = vmul.f32 %v3532_v40, %v3386_v46  ;;  %v4151_v48 = vpop.f32.mrb[55].mxu1  ;;  %v3550_v56 = vmul.f32 0.44467196, %v3532_v40 }
 0x800   : > { %v3542_v57 = vadd.f32 %v3540_v41, %v3537_v50  ;;  %v3569_v52 = vrot.slane %v3567_v49, 1 }
 0x801   : > { %v3553_v59 = vrot.slane %v3551_v51, 1  ;;  %v3582_v61 = vmul.f32 0.44467196, %v3581_v54  ;;  %v3583_v6 = vmul.f32 0.5553281, %v3581_v54 }
 0x802   : > { %v3544_v63 = vmul.f32 0.5553281, %v3542_v57  ;;  %v3571_v53 = vadd.f32 %v3569_v52, %v3566_v26  ;;  %v3599_v5 = vmul.f32 0.5553281, %v3597_v55  ;;  %v3598_v28 = vmul.f32 0.44467196, %v3597_v55 }
 0x803   : > { %v3585_v14 = vrot.slane %v3583_v6, 1  ;;  %v3555_v2 = vadd.f32 %v3553_v59, %v3550_v56  ;;  %v3543_v19 = vmul.f32 0.44467196, %v3542_v57  ;;  %v3189_v52 = vmul.f32 0.13646486, %v4792_v16 }
 0x804   : > { %3546 = vrot.lane.b32.xlu1 %v3544_v63, %s4287_s21  ;;  %v3573_v1 = vmul.f32 0.5553281, %v3571_v53  ;;  %v3601_v10 = vrot.slane %v3599_v5, 1  ;;  %v3572_v25 = vmul.f32 0.44467196, %v3571_v53 }
 0x805   : > { %v3587_v62 = vadd.f32 %v3585_v14, %v3582_v61  ;;  %v3557_v8 = vmul.f32 0.5553281, %v3555_v2  ;;  %v3556_v29 = vmul.f32 0.44467196, %v3555_v2  ;;  %v3195_v53 = vadd.f32 %v3193_v42, %v3189_v52 }
 0x806   : > { %3575 = vrot.lane.b32.xlu0 %v3573_v1, %s4287_s21  ;;  %v3603_v11 = vadd.f32 %v3601_v10, %v3598_v28  ;;  %v4272_v10 = vpop.eup %4271 }
 0x807   : > { %v3589_v7 = vmul.f32 0.5553281, %v3587_v62 }
 0x808   : > { %v3605_v15 = vmul.f32 0.5553281, %v3603_v11  ;;  %v3604_v2 = vmul.f32 0.44467196, %v3603_v11 }
 0x809   : > { %3591 = vrot.lane.b32.xlu1 %v3589_v7, %s4287_s21 }
 0x80a   : > { %3559 = vrot.lane.b32.xlu0 %v3557_v8, %s4287_s21 }
 0x80d   : > { %2713 = vrot.lane.b32.xlu1 %v4720_v4, %s4292_s16  ;;  %v2690_v4 = vadd.f32 %v4756_v58, %v2684_v17 }
 0x80e   : > { %3615 = vrot.lane.b32.xlu0 %v4838_v9, %s4287_s21 }
 0x80f   : > { %v2696_v20 = vadd.f32 %v4808_v33, %v2690_v4  ;;  %v3588_v33 = vmul.f32 0.44467196, %v3587_v62 }
 0x811   : > { %2717 = vrot.lane.b32.xlu1 %v4733_v27, %s4294_s20  ;;  %v2702_v27 = vadd.f32 %v4814_v35, %v2696_v20 }
 0x812   : > { %3198 = vrot.lane.b32.xlu0 %v3196_v12, %s4291_s30 }
 0x813   : > { %v2708_v58 = vadd.f32 %v4810_v32, %v2702_v27  ;;  %v3215_v32 = vadd.f32 %v4821_v22, %v4748_v31 }
 0x815   : > { %3607 = vrot.lane.b32.xlu1 %v3605_v15, %s4287_s21  ;;  %v2712_v54 = vadd.f32 %v4812_v34, %v2708_v58  ;;  %4273 = vrcp.f32 %v3215_v32  ;;  %s4213_s21 = spop %4212 }
 0x816   : > { %3202 = vrot.lane.b32.xlu0 %v4797_v24, %s4295_s22  ;;  %s4215_s30 = spop %4214 }
 0x817   : > { %v2083_v58 = vstv %s4215_s30 }
 0x81f   : > { %v4274_v20 = vpop.eup %4273 }
 0x876   : > { %v3547_v21 = vpop.permute.xlu1 %3546 }
 0x877   : > { %v3549_v37 = vadd.f32 %v3547_v21, %v3543_v19 }
 0x878   : > { %v3576_v43 = vpop.permute.xlu0 %3575 }
 0x879   : > { %v3579_v0 = vmul.f32 %v3549_v37, %v3549_v37  ;;  %v3578_v44 = vadd.f32 %v3576_v43, %v3572_v25  ;;  %v3563_v45 = vadd.f32 %v3549_v37, %v4416_v38 }
 0x87b   : > { %v3580_v46 = vsub.f32 %v3578_v44, %v3579_v0  ;;  %v3592_v24 = vpop.permute.xlu1 %3591  ;;  %v3623_v41 = vmul.f32 2.0, %v3563_v45  ;;  %v3626_v48 = vmul.f32 %v3563_v45, %v3563_v45 }
 0x87c   : > { %v3560_v47 = vpop.permute.xlu0 %3559  ;;  %v3594_v49 = vadd.f32 %v3592_v24, %v3588_v33 }
 0x87d   : > { %v3562_v39 = vadd.f32 %v3560_v47, %v3556_v29  ;;  %v1258_v29 = vstv %s4632_s25 }
 0x87f   : > { %v3564_v35 = vadd.f32 %v3562_v39, %v4416_v38  ;;  %v3595_v50 = vmul.f32 %v3562_v39, %v3562_v39  ;;  %v2714_v40 = vpop.permute.xlu1 %2713  ;;  %v3611_v51 = vmul.f32 %v3562_v39, %v3549_v37 }
 0x880   : > { %v3616_v55 = vpop.permute.xlu0 %3615  ;;  %v2716_v57 = vadd.f32 %v2714_v40, %v2712_v54 }
 0x881   : > { %v3624_v26 = vmul.f32 %v3623_v41, %v3564_v35  ;;  %v3627_v56 = vmul.f32 %v3564_v35, %v3564_v35  ;;  %v3596_v13 = vsub.f32 %v3594_v49, %v3595_v50 }
 0x883   : > { %v3628_v59 = vadd.f32 %v3627_v56, %v3626_v48  ;;  %v3619_v61 = vadd.f32 %v3596_v13, %v3580_v46  ;;  %v2718_v38 = vpop.permute.xlu1 %2717  ;;  %v3625_v21 = vadd.f32 %v3624_v26, %v4838_v9 }
 0x884   : > { %v2720_v6 = vadd.f32 %v2718_v38, %v2716_v57  ;;  %v3199_v63 = vpop.permute.xlu0 %3198 }
 0x885   : > { %v3629_v14 = vadd.f32 %v3628_v59, %v4838_v9  ;;  %v3620_v34 = vadd.f32 %v3619_v61, %v3616_v55  ;;  %v3201_v62 = vadd.f32 %v3199_v63, %v3195_v53  ;;  %v1243_v9 = vstv %s4630_s24 }
 0x886   : > { %v2722_v1 = vsub.f32 %v2720_v6, %v4758_v60 }
 0x887   : > { %4275 = vrcp.f32 %v3629_v14  ;;  %v3608_v5 = vpop.permute.xlu1 %3607 }
 0x888   : > { %4277 = vrcp.f32 %v3620_v34  ;;  %v2723_v22 = vmul.f32 2.0, %v2722_v1  ;;  %v3610_v7 = vadd.f32 %v3608_v5, %v3604_v2  ;;  %v3203_v16 = vpop.permute.xlu0 %3202 }
 0x889   : > { %v3205_v8 = vadd.f32 %v3203_v16, %v3201_v62 }
 0x88a   : > { %v2728_v28 = vadd.f32 %v4746_v30, %v2723_v22  ;;  %v3612_v12 = vsub.f32 %v3610_v7, %v3611_v51 }
 0x88b   : > { %v3207_v15 = vsub.f32 %v3205_v8, %v4818_v3 }
 0x88c   : > { %v3613_v17 = vmul.f32 2.0, %v3612_v12  ;;  %v2732_v4 = vmul.f32 %v4272_v10, %v2728_v28 }
 0x88d   : > { %v3208_v42 = vmul.f32 2.0, %v3207_v15 }
 0x88e   : > { %v2742_v60 = vmul.f32 %v4772_v18, %v2732_v4  ;;  %v3618_v11 = vadd.f32 %v3616_v55, %v3613_v17 }
 0x88f   : > { %v3213_v19 = vadd.f32 %v4748_v31, %v3208_v42  ;;  %v2072_v31 = vstv %s4213_s21 }
 0x890   : > { %4216 = vpush %v2742_v60  ;;  %v3640_v44 = vsel %vm3639_vm9, %v1243_v9, %v2072_v31 }
 0x891   : > { %v4276_v37 = vpop.eup %4275  ;;  %4218 = vpush %v2732_v4  ;;  %v3217_v25 = vmul.f32 %v4274_v20, %v3213_v19 }
 0x892   : > { %v4278_v27 = vpop.eup %4277  ;;  %v3631_v30 = vmul.f32 %v4276_v37, %v3625_v21 }
 0x893   : > { %v3227_v3 = vmul.f32 %v4824_v36, %v3217_v25  ;;  %v3622_v43 = vmul.f32 %v4278_v27, %v3618_v11 }
 0x895   : > { %4220 = vpush %v3227_v3  ;;  %v3632_v0 = vmul.f32 %v3631_v30, %v3622_v43 }
 0x896   : > { %4222 = vpush %v3217_v25 }
 0x897   : > { %4224 = vpush %v3632_v0 }
 0x898   : > { %4226 = vpush %v3622_v43 }
 0x8c1   : > { %s4217_s16 = spop %4216 }
 0x8c2   : > { %v2745_v18 = vstv %s4217_s16  ;;  %s4219_s20 = spop %4218 }
 0x8c3   : > { %v3642_v36 = vsel %vm3641_vm10, %v3640_v44, %v2745_v18  ;;  %v2748_v33 = vstv %s4219_s20 }
 0x8c6   : > { %s4221_s22 = spop %4220 }
 0x8c7   : > { %v3230_v45 = vstv %s4221_s22  ;;  %s4223_s28 = spop %4222 }
 0x8c8   : > { %v3644_v46 = vsel %vm3643_vm11, %v3642_v36, %v3230_v45  ;;  %s4225_s29 = spop %4224  ;;  %v3233_v41 = vstv %s4223_s28 }
 0x8c9   : > { %v3635_v24 = vstv %s4225_s29  ;;  %s4227_s24 = spop %4226 }
 0x8ca   : > { %v3645_v23 = vsel %vm3236_vm8, %v3644_v46, %v3635_v24  ;;  %v3638_v35 = vstv %s4227_s24 }
 0x8cb   : > { %v3647_v47 = vsel %vm3646_vm12, %v3645_v23, %v1258_v29 }
 0x8cc   : > { %v3649_v39 = vsel %vm3648_vm13, %v3647_v47, %v2083_v58 }
 0x8cd   : > { %v3651_v49 = vsel %vm3650_vm14, %v3649_v39, %v2748_v33 }
 0x8ce   : > { %v3652_v50 = vsel %vm2751_vm5, %v3651_v49, %v3233_v41 }
 0x8cf   : > { %v3654_v40 = vsel %vm3653_vm15, %v3652_v50, %v3638_v35 }
 0x8d0   : > { %3656 = vst.msk [vmem:[%s510_s26] sm:$0x1] %vm3655_vm0, %v3654_v40 }
 0x8d1 PF: > { %s25_s18 = sadd.s32 1, %s4285_s18  }
 0x8d2   : > { %p22_p4 = scmp.ge.s32.totalorder %s25_s18, 8  }
 0x8d4   :  { %24 = sbr.rel (!%p22_p4) target bundleno = 1 (0x1), region = 113 }

</bundles_post_ra>
